<compile_context>
chip_gen: v5e
topology: v5e:2x2
jax: 0.10.0
libtpu: 0.0.40
codegen_flags: <defaults>
</compile_context>

<pallas_src>
import math
import functools

import jax
import jax.numpy as jnp
from jax import lax
from jax.experimental import pallas as pl
from jax.experimental.pallas import tpu as pltpu

SQRT2 = math.sqrt(2.0)


# --------------------------------- kernel ----------------------------------- #

def resblock_kernel(x_ref,
                    g1_ref, b1_ref, w1_ref, cb1_ref,
                    g2_ref, b2_ref, w2_ref, cb2_ref,
                    g3_ref, b3_ref, w3_ref, cb3_ref,
                    ws_ref, bs_ref,
                    o_ref,
                    *, eps, skiprescale, width, cout, bt):
    x = x_ref[...].astype(jnp.float32)                  # (BT, Cin, HW)
    hw = x.shape[-1]

    # Hoisted circular-wrap masks, shared by every tap of every conv layer.
    col = lax.broadcasted_iota(jnp.int32, (1, hw), 1) % width
    right_mask = col >= (width - 1)                     # dx = +1 wraps here
    left_mask = col < 1                                 # dx = -1 wraps here

    def norm_act(h, g_ref, b_ref):
        # GroupNorm (group_c=1 -> per-(image, channel), biased var) + SiLU, f32.
        # One-pass stats: the two lane reductions are independent (co-issue on XLU).
        m1 = jnp.mean(h, axis=-1, keepdims=True)        # (BT, C, 1)
        m2 = jnp.mean(h * h, axis=-1, keepdims=True)    # (BT, C, 1)
        var = m2 - m1 * m1
        scale = g_ref[...] * lax.rsqrt(var + eps)       # (BT, C, 1)
        shift = b_ref[...] - m1 * scale
        h = h * scale + shift
        return h * jax.nn.sigmoid(h)                    # SiLU (EUP sigmoid)

    def _roll(v, s):
        s = s % hw
        if s == 0:
            return v
        return pltpu.roll(v, s, 1)                      # XLU lane rotate (2-D)

    def shift_tap(v, dy, dx):
        # v[:, y*W + x] -> v[:, ((y+dy)%H)*W + ((x+dx)%W)] on the flat HW axis.
        # Whole-row (dy) shifts are exact flat rolls; column (dx) shifts need a
        # wrap fix-up on one column per row.  Rolls are fused (base includes dy).
        base = (-(dy * width + dx)) % hw
        if dx == 0:
            return _roll(v, base)
        main = _roll(v, base)
        wrap = _roll(v, base + (width if dx > 0 else -width))
        mask = right_mask if dx > 0 else left_mask
        return jnp.where(mask, wrap, main)

    def conv3x3_circular(h, w_ref, cb_ref):
        # h (BT, Cin, HW) f32 -> (BT, Cout, HW) f32.
        # Stacked-weight form: one matmul per image (M=9*Cout, K=Cin, N=HW),
        # then roll + accumulate the 9 Cout-aligned f32 output chunks.
        hq = h.astype(w_ref.dtype)                      # single cast at MXU boundary
        w = w_ref[...]                                  # (9*Cout, Cin)
        cb = cb_ref[...]                                # (Cout, 1)
        outs = []
        for t in range(bt):
            g = jnp.dot(w, hq[t], preferred_element_type=jnp.float32)   # (9*Cout, HW)
            acc = None
            k = 0
            for dy in (-1, 0, 1):
                for dx in (-1, 0, 1):
                    tap = shift_tap(g[k * cout:(k + 1) * cout], dy, dx)
                    acc = tap if acc is None else acc + tap
                    k += 1
            outs.append(acc + cb)
        return jnp.stack(outs, axis=0)                  # (BT, Cout, HW); aligned concat

    # --- block: NormConv2d x 3 (GroupNorm -> SiLU -> 3x3 circular conv) ---
    h = conv3x3_circular(norm_act(x, g1_ref, b1_ref), w1_ref, cb1_ref)
    h = conv3x3_circular(norm_act(h, g2_ref, b2_ref), w2_ref, cb2_ref)
    h = conv3x3_circular(norm_act(h, g3_ref, b3_ref), w3_ref, cb3_ref)

    # --- skip: 1x1 conv (Cin -> Cout) on the ORIGINAL x, residual add, rescale ---
    ws = ws_ref[...]
    bs = bs_ref[...]
    xq = x.astype(ws.dtype)
    for t in range(bt):
        skip = jnp.dot(ws, xq[t], preferred_element_type=jnp.float32) + bs
        res = h[t] + skip
        if skiprescale:
            res = res * (1.0 / SQRT2)
        o_ref[t] = res.astype(o_ref.dtype)              # minor dim = H*W (lane-dense store)


# -------------------------------- wrapper ----------------------------------- #

def resblock_forward(x_nchw, params, *, eps=1e-5, skiprescale=True,
                     mxu_dtype=jnp.bfloat16, block_batch=8,
                     single_buffer_params=False, vmem_limit_bytes=None):
    B, Cin, H, W = x_nchw.shape
    Cout = params["w1"].shape[-1]
    HW = H * W

    # Largest divisor of B that is <= block_batch (images per grid step).
    bt = max(1, min(block_batch, B))
    while B % bt:
        bt -= 1

    def conv_w_stacked(w):
        # HWIO (3,3,Ci,Co) -> (9*Co, Ci); tap row block k = (dy+1)*3 + (dx+1).
        co = w.shape[-1]
        return jnp.transpose(w, (0, 1, 3, 2)).reshape(9 * co, -1).astype(mxu_dtype)

    args = [
        x_nchw.reshape(B, Cin, HW),
        params["g1"], params["b1"], conv_w_stacked(params["w1"]), params["cb1"],
        params["g2"], params["b2"], conv_w_stacked(params["w2"]), params["cb2"],
        params["g3"], params["b3"], conv_w_stacked(params["w3"]), params["cb3"],
        params["ws"].astype(mxu_dtype), params["bs"],
    ]

    def const_spec(a):
        # Full array + constant index map -> stays VMEM-resident across the grid.
        idx = lambda i, n=a.ndim: (0,) * n
        if single_buffer_params:
            # v7x (64 MiB VMEM) at production channel counts: params never change
            # across the grid, so a single buffer suffices (saves VMEM headroom).
            return pl.BlockSpec(a.shape, idx, pipeline_mode=pl.Buffered(1))
        return pl.BlockSpec(a.shape, idx)

    in_specs = ([pl.BlockSpec((bt, Cin, HW), lambda i: (i, 0, 0))]
                + [const_spec(a) for a in args[1:]])
    out_spec = pl.BlockSpec((bt, Cout, HW), lambda i: (i, 0, 0))

    kern = functools.partial(resblock_kernel, eps=eps, skiprescale=skiprescale,
                             width=W, cout=Cout, bt=bt)

    # TODO(synk): at production sizes, tile over H with a circular halo row
    #             (pltpu.roll wraps within a tile, so whole-image blocks are
    #             required for correctness as written), keep the tile's minor
    #             dim a large multiple of 128 lanes, set vmem_limit_bytes for
    #             v7x's 64 MiB VMEM, enable single_buffer_params, and use
    #             CORE_PARALLEL / a leading size-2 axis if the batch grid axis
    #             does not shard across both v7x TensorCores (add a parallel
    #             spatial-tile axis when B == 1).
    out = pl.pallas_call(
        kern,
        out_shape=jax.ShapeDtypeStruct((B, Cout, HW), x_nchw.dtype),
        grid_spec=pltpu.PrefetchScalarGridSpec(
            num_scalar_prefetch=0,
            grid=(B // bt,),
            in_specs=in_specs,
            out_specs=out_spec,
        ),
        compiler_params=pltpu.CompilerParams(
            dimension_semantics=("parallel",),
            vmem_limit_bytes=vmem_limit_bytes),
    )(*args)
    return out.reshape(B, Cout, H, W)


# ------------------------- parameter init & reference ----------------------- #

def init_params(key, in_c, out_c):
    ks = jax.random.split(key, 8)
    f1 = 1.0 / math.sqrt(9 * in_c)
    f2 = 1.0 / math.sqrt(9 * out_c)
    fs = 1.0 / math.sqrt(in_c)
    return dict(
        g1=jnp.ones((in_c, 1), jnp.float32),  b1=jnp.zeros((in_c, 1), jnp.float32),
        w1=f1 * jax.random.normal(ks[0], (3, 3, in_c, out_c), jnp.float32),
        cb1=0.1 * jax.random.normal(ks[1], (out_c, 1), jnp.float32),
        g2=jnp.ones((out_c, 1), jnp.float32), b2=jnp.zeros((out_c, 1), jnp.float32),
        w2=f2 * jax.random.normal(ks[2], (3, 3, out_c, out_c), jnp.float32),
        cb2=0.1 * jax.random.normal(ks[3], (out_c, 1), jnp.float32),
        g3=jnp.ones((out_c, 1), jnp.float32), b3=jnp.zeros((out_c, 1), jnp.float32),
        w3=f2 * jax.random.normal(ks[4], (3, 3, out_c, out_c), jnp.float32),
        cb3=0.1 * jax.random.normal(ks[5], (out_c, 1), jnp.float32),
        ws=fs * jax.random.normal(ks[6], (out_c, in_c), jnp.float32),
        bs=0.1 * jax.random.normal(ks[7], (out_c, 1), jnp.float32),
    )


def resblock_reference(x_nchw, params, eps=1e-5, skiprescale=True):
    # Independent pure-JAX reference (wrap pad + lax.conv) for verification, NCHW.
    def gn(x, g, b):
        m = jnp.mean(x, axis=(2, 3), keepdims=True)
        v = jnp.mean((x - m) ** 2, axis=(2, 3), keepdims=True)
        return ((x - m) * lax.rsqrt(v + eps) * g.reshape(1, -1, 1, 1)
                + b.reshape(1, -1, 1, 1))

    def conv3(x, w_hwio, b):
        xp = jnp.pad(x, ((0, 0), (0, 0), (1, 1), (1, 1)), mode="wrap")
        y = lax.conv_general_dilated(xp, w_hwio, (1, 1), "VALID",
                                     dimension_numbers=("NCHW", "HWIO", "NCHW"))
        return y + b.reshape(1, -1, 1, 1)

    silu = lambda t: t * jax.nn.sigmoid(t)
    h = conv3(silu(gn(x_nchw, params["g1"], params["b1"])), params["w1"], params["cb1"])
    h = conv3(silu(gn(h, params["g2"], params["b2"])), params["w2"], params["cb2"])
    h = conv3(silu(gn(h, params["g3"], params["b3"])), params["w3"], params["cb3"])
    skip = (jnp.einsum("oc,bchw->bohw", params["ws"], x_nchw)
            + params["bs"].reshape(1, -1, 1, 1))
    out = h + skip
    if skiprescale:
        out = out / SQRT2
    return out


# ---------------------------------- main ------------------------------------ #

if __name__ == "__main__":
    B, Cin, Cout, S = 2, 4, 8, 16          # ResBlock(size=16, in_c=4, out_c=8)
    key = jax.random.PRNGKey(0)
    kx, kp = jax.random.split(key)

    x_nchw = jax.random.normal(kx, (B, Cin, S, S), jnp.float32)   # PyTorch layout
    params = init_params(kp, Cin, Cout)

    ref = jax.block_until_ready(resblock_reference(x_nchw, params))

    # f32 MXU operands: tight check (same math as the reference up to reassociation).
    out_f32 = jax.block_until_ready(
        resblock_forward(x_nchw, params, mxu_dtype=jnp.float32))
    assert out_f32.shape == (B, Cout, S, S)
    err_f32 = float(jnp.max(jnp.abs(out_f32 - ref)))
    assert err_f32 < 1e-3, f"f32 mismatch vs reference: max abs err = {err_f32}"

    # Default path: bf16 MXU operands, f32 GroupNorm stats / SiLU / accumulation.
    out_bf16 = jax.block_until_ready(resblock_forward(x_nchw, params))
    err_bf16 = float(jnp.max(jnp.abs(out_bf16 - ref)))
    assert err_bf16 < 0.2, f"bf16 mismatch vs reference: max abs err = {err_bf16}"

    print("KERNEL_OK")
</pallas_src>

<mosaic_0001>
module attributes {stable_mosaic.version = 11 : i64} {
  func.func @resblock_kernel(%arg0: i32, %arg1: memref<2x4x256xf32, #tpu.memory_space<vmem>>, %arg2: memref<4x1xf32, #tpu.memory_space<vmem>>, %arg3: memref<4x1xf32, #tpu.memory_space<vmem>>, %arg4: memref<72x4xf32, #tpu.memory_space<vmem>>, %arg5: memref<8x1xf32, #tpu.memory_space<vmem>>, %arg6: memref<8x1xf32, #tpu.memory_space<vmem>>, %arg7: memref<8x1xf32, #tpu.memory_space<vmem>>, %arg8: memref<72x8xf32, #tpu.memory_space<vmem>>, %arg9: memref<8x1xf32, #tpu.memory_space<vmem>>, %arg10: memref<8x1xf32, #tpu.memory_space<vmem>>, %arg11: memref<8x1xf32, #tpu.memory_space<vmem>>, %arg12: memref<72x8xf32, #tpu.memory_space<vmem>>, %arg13: memref<8x1xf32, #tpu.memory_space<vmem>>, %arg14: memref<8x4xf32, #tpu.memory_space<vmem>>, %arg15: memref<8x1xf32, #tpu.memory_space<vmem>>, %arg16: memref<2x8x256xf32, #tpu.memory_space<vmem>>) attributes {dimension_semantics = [#tpu.dimension_semantics<parallel>], iteration_bounds = array<i64: 1>, scalar_prefetch = 0 : i64, scratch_operands = 0 : i64, tpu.core_type = #tpu.core_type<tc>, window_params = [{transform_indices = @transform_0, window_bounds = array<i64: 2, 4, 256>}, {pipeline_mode = #tpu.pipeline_mode<synchronous>, transform_indices = @transform_1, window_bounds = array<i64: 4, 1>}, {pipeline_mode = #tpu.pipeline_mode<synchronous>, transform_indices = @transform_2, window_bounds = array<i64: 4, 1>}, {pipeline_mode = #tpu.pipeline_mode<synchronous>, transform_indices = @transform_3, window_bounds = array<i64: 72, 4>}, {pipeline_mode = #tpu.pipeline_mode<synchronous>, transform_indices = @transform_4, window_bounds = array<i64: 8, 1>}, {pipeline_mode = #tpu.pipeline_mode<synchronous>, transform_indices = @transform_5, window_bounds = array<i64: 8, 1>}, {pipeline_mode = #tpu.pipeline_mode<synchronous>, transform_indices = @transform_6, window_bounds = array<i64: 8, 1>}, {pipeline_mode = #tpu.pipeline_mode<synchronous>, transform_indices = @transform_7, window_bounds = array<i64: 72, 8>}, {pipeline_mode = #tpu.pipeline_mode<synchronous>, transform_indices = @transform_8, window_bounds = array<i64: 8, 1>}, {pipeline_mode = #tpu.pipeline_mode<synchronous>, transform_indices = @transform_9, window_bounds = array<i64: 8, 1>}, {pipeline_mode = #tpu.pipeline_mode<synchronous>, transform_indices = @transform_10, window_bounds = array<i64: 8, 1>}, {pipeline_mode = #tpu.pipeline_mode<synchronous>, transform_indices = @transform_11, window_bounds = array<i64: 72, 8>}, {pipeline_mode = #tpu.pipeline_mode<synchronous>, transform_indices = @transform_12, window_bounds = array<i64: 8, 1>}, {pipeline_mode = #tpu.pipeline_mode<synchronous>, transform_indices = @transform_13, window_bounds = array<i64: 8, 4>}, {pipeline_mode = #tpu.pipeline_mode<synchronous>, transform_indices = @transform_14, window_bounds = array<i64: 8, 1>}, {transform_indices = @transform_15, window_bounds = array<i64: 2, 8, 256>}]} {
    %c0 = arith.constant 0 : index
    %c0_0 = arith.constant 0 : index
    %c0_1 = arith.constant 0 : index
    %0 = vector.load %arg1[%c0, %c0_0, %c0_1] : memref<2x4x256xf32, #tpu.memory_space<vmem>>, vector<2x4x256xf32>
    %1 = tpu.iota {dimensions = array<i32: 1>} : vector<1x256xi32>
    %c16_i32 = arith.constant 16 : i32
    %c0_i32 = arith.constant 0 : i32
    %2 = arith.cmpi eq, %c16_i32, %c0_i32 : i32
    %c1_i32 = arith.constant 1 : i32
    %3 = arith.select %2, %c1_i32, %c16_i32 : i32
    %4 = vector.broadcast %3 : i32 to vector<1x256xi32>
    %5 = arith.remsi %1, %4 : vector<1x256xi32>
    %c0_i32_2 = arith.constant 0 : i32
    %6 = vector.broadcast %c0_i32_2 : i32 to vector<1x256xi32>
    %7 = arith.cmpi ne, %5, %6 : vector<1x256xi32>
    %c0_i32_3 = arith.constant 0 : i32
    %8 = vector.broadcast %c0_i32_3 : i32 to vector<1x256xi32>
    %9 = arith.cmpi slt, %5, %8 : vector<1x256xi32>
    %c0_i32_4 = arith.constant 0 : i32
    %10 = arith.cmpi slt, %3, %c0_i32_4 : i32
    %11 = vector.broadcast %10 : i1 to vector<1x256xi1>
    %12 = vector.broadcast %11 : vector<1x256xi1> to vector<1x256xi1>
    %13 = arith.xori %9, %12 : vector<1x256xi1>
    %14 = arith.andi %13, %7 : vector<1x256xi1>
    %15 = vector.broadcast %3 : i32 to vector<1x256xi32>
    %16 = arith.addi %5, %15 : vector<1x256xi32>
    %17 = arith.select %14, %16, %5 : vector<1x256xi1>, vector<1x256xi32>
    %c15_i32 = arith.constant 15 : i32
    %18 = vector.broadcast %c15_i32 : i32 to vector<1x256xi32>
    %19 = arith.cmpi sge, %17, %18 : vector<1x256xi32>
    %c1_i32_5 = arith.constant 1 : i32
    %20 = vector.broadcast %c1_i32_5 : i32 to vector<1x256xi32>
    %21 = arith.cmpi slt, %17, %20 : vector<1x256xi32>
    %cst = arith.constant dense<0.000000e+00> : vector<2x4xf32>
    %22 = vector.multi_reduction <add>, %0, %cst [2] : vector<2x4x256xf32> to vector<2x4xf32>
    %23 = vector.shape_cast %22 : vector<2x4xf32> to vector<2x4x1xf32>
    %cst_6 = arith.constant 2.560000e+02 : f32
    %24 = vector.broadcast %cst_6 : f32 to vector<2x4x1xf32>
    %25 = arith.divf %23, %24 : vector<2x4x1xf32>
    %26 = arith.mulf %0, %0 : vector<2x4x256xf32>
    %cst_7 = arith.constant dense<0.000000e+00> : vector<2x4xf32>
    %27 = vector.multi_reduction <add>, %26, %cst_7 [2] : vector<2x4x256xf32> to vector<2x4xf32>
    %28 = vector.shape_cast %27 : vector<2x4xf32> to vector<2x4x1xf32>
    %cst_8 = arith.constant 2.560000e+02 : f32
    %29 = vector.broadcast %cst_8 : f32 to vector<2x4x1xf32>
    %30 = arith.divf %28, %29 : vector<2x4x1xf32>
    %31 = arith.mulf %25, %25 : vector<2x4x1xf32>
    %32 = arith.subf %30, %31 : vector<2x4x1xf32>
    %c0_9 = arith.constant 0 : index
    %c0_10 = arith.constant 0 : index
    %33 = vector.load %arg2[%c0_9, %c0_10] : memref<4x1xf32, #tpu.memory_space<vmem>>, vector<4x1xf32>
    %cst_11 = arith.constant 9.99999974E-6 : f32
    %34 = vector.broadcast %cst_11 : f32 to vector<2x4x1xf32>
    %35 = arith.addf %32, %34 : vector<2x4x1xf32>
    %36 = math.rsqrt %35 : vector<2x4x1xf32>
    %37 = vector.shape_cast %33 : vector<4x1xf32> to vector<1x4x1xf32>
    %38 = vector.broadcast %37 : vector<1x4x1xf32> to vector<2x4x1xf32>
    %39 = arith.mulf %38, %36 : vector<2x4x1xf32>
    %c0_12 = arith.constant 0 : index
    %c0_13 = arith.constant 0 : index
    %40 = vector.load %arg3[%c0_12, %c0_13] : memref<4x1xf32, #tpu.memory_space<vmem>>, vector<4x1xf32>
    %41 = arith.mulf %25, %39 : vector<2x4x1xf32>
    %42 = vector.shape_cast %40 : vector<4x1xf32> to vector<1x4x1xf32>
    %43 = vector.broadcast %42 : vector<1x4x1xf32> to vector<2x4x1xf32>
    %44 = arith.subf %43, %41 : vector<2x4x1xf32>
    %45 = vector.broadcast %39 : vector<2x4x1xf32> to vector<2x4x256xf32>
    %46 = arith.mulf %0, %45 : vector<2x4x256xf32>
    %47 = vector.broadcast %44 : vector<2x4x1xf32> to vector<2x4x256xf32>
    %48 = arith.addf %46, %47 : vector<2x4x256xf32>
    %49 = arith.negf %48 : vector<2x4x256xf32>
    %50 = math.exp %49 : vector<2x4x256xf32>
    %cst_14 = arith.constant 1.000000e+00 : f32
    %51 = vector.broadcast %cst_14 : f32 to vector<2x4x256xf32>
    %52 = arith.addf %51, %50 : vector<2x4x256xf32>
    %53 = arith.divf %51, %52 : vector<2x4x256xf32>
    %54 = arith.mulf %48, %53 : vector<2x4x256xf32>
    %c0_15 = arith.constant 0 : index
    %c0_16 = arith.constant 0 : index
    %55 = vector.load %arg4[%c0_15, %c0_16] : memref<72x4xf32, #tpu.memory_space<vmem>>, vector<72x4xf32>
    %c0_17 = arith.constant 0 : index
    %c0_18 = arith.constant 0 : index
    %56 = vector.load %arg5[%c0_17, %c0_18] : memref<8x1xf32, #tpu.memory_space<vmem>>, vector<8x1xf32>
    %57 = vector.extract_strided_slice %54 {offsets = [0, 0, 0], sizes = [1, 4, 256], strides = [1, 1, 1]} : vector<2x4x256xf32> to vector<1x4x256xf32>
    %58 = vector.shape_cast %57 : vector<1x4x256xf32> to vector<4x256xf32>
    %cst_19 = arith.constant dense<0.000000e+00> : vector<72x256xf32>
    %59 = tpu.matmul %55, %58, %cst_19 {dimension_numbers = #tpu.dot_dimension_numbers<[1], [0], [0], [1], [0, 0, 1, 1], [], []>} : vector<72x4xf32>, vector<4x256xf32>, vector<72x256xf32> -> vector<72x256xf32>
    %60 = vector.extract_strided_slice %59 {offsets = [0, 0], sizes = [8, 256], strides = [1, 1]} : vector<72x256xf32> to vector<8x256xf32>
    %c17_i32 = arith.constant 17 : i32
    %61 = tpu.dynamic_rotate %60 by %c17_i32 dim 1 : vector<8x256xf32>, i32 -> vector<8x256xf32>
    %c1_i32_20 = arith.constant 1 : i32
    %62 = tpu.dynamic_rotate %60 by %c1_i32_20 dim 1 : vector<8x256xf32>, i32 -> vector<8x256xf32>
    %63 = vector.shape_cast %21 : vector<1x256xi1> to vector<1x256xi1>
    %64 = vector.broadcast %63 : vector<1x256xi1> to vector<8x256xi1>
    %65 = arith.select %64, %62, %61 : vector<8x256xi1>, vector<8x256xf32>
    %66 = vector.extract_strided_slice %59 {offsets = [8, 0], sizes = [8, 256], strides = [1, 1]} : vector<72x256xf32> to vector<8x256xf32>
    %c16_i32_21 = arith.constant 16 : i32
    %67 = tpu.dynamic_rotate %66 by %c16_i32_21 dim 1 : vector<8x256xf32>, i32 -> vector<8x256xf32>
    %68 = arith.addf %65, %67 : vector<8x256xf32>
    %69 = vector.extract_strided_slice %59 {offsets = [16, 0], sizes = [8, 256], strides = [1, 1]} : vector<72x256xf32> to vector<8x256xf32>
    %c15_i32_22 = arith.constant 15 : i32
    %70 = tpu.dynamic_rotate %69 by %c15_i32_22 dim 1 : vector<8x256xf32>, i32 -> vector<8x256xf32>
    %c31_i32 = arith.constant 31 : i32
    %71 = tpu.dynamic_rotate %69 by %c31_i32 dim 1 : vector<8x256xf32>, i32 -> vector<8x256xf32>
    %72 = vector.shape_cast %19 : vector<1x256xi1> to vector<1x256xi1>
    %73 = vector.broadcast %72 : vector<1x256xi1> to vector<8x256xi1>
    %74 = arith.select %73, %71, %70 : vector<8x256xi1>, vector<8x256xf32>
    %75 = arith.addf %68, %74 : vector<8x256xf32>
    %76 = vector.extract_strided_slice %59 {offsets = [24, 0], sizes = [8, 256], strides = [1, 1]} : vector<72x256xf32> to vector<8x256xf32>
    %c1_i32_23 = arith.constant 1 : i32
    %77 = tpu.dynamic_rotate %76 by %c1_i32_23 dim 1 : vector<8x256xf32>, i32 -> vector<8x256xf32>
    %c241_i32 = arith.constant 241 : i32
    %78 = tpu.dynamic_rotate %76 by %c241_i32 dim 1 : vector<8x256xf32>, i32 -> vector<8x256xf32>
    %79 = vector.shape_cast %21 : vector<1x256xi1> to vector<1x256xi1>
    %80 = vector.broadcast %79 : vector<1x256xi1> to vector<8x256xi1>
    %81 = arith.select %80, %78, %77 : vector<8x256xi1>, vector<8x256xf32>
    %82 = arith.addf %75, %81 : vector<8x256xf32>
    %83 = vector.extract_strided_slice %59 {offsets = [32, 0], sizes = [8, 256], strides = [1, 1]} : vector<72x256xf32> to vector<8x256xf32>
    %84 = arith.addf %82, %83 : vector<8x256xf32>
    %85 = vector.extract_strided_slice %59 {offsets = [40, 0], sizes = [8, 256], strides = [1, 1]} : vector<72x256xf32> to vector<8x256xf32>
    %c255_i32 = arith.constant 255 : i32
    %86 = tpu.dynamic_rotate %85 by %c255_i32 dim 1 : vector<8x256xf32>, i32 -> vector<8x256xf32>
    %c15_i32_24 = arith.constant 15 : i32
    %87 = tpu.dynamic_rotate %85 by %c15_i32_24 dim 1 : vector<8x256xf32>, i32 -> vector<8x256xf32>
    %88 = vector.shape_cast %19 : vector<1x256xi1> to vector<1x256xi1>
    %89 = vector.broadcast %88 : vector<1x256xi1> to vector<8x256xi1>
    %90 = arith.select %89, %87, %86 : vector<8x256xi1>, vector<8x256xf32>
    %91 = arith.addf %84, %90 : vector<8x256xf32>
    %92 = vector.extract_strided_slice %59 {offsets = [48, 0], sizes = [8, 256], strides = [1, 1]} : vector<72x256xf32> to vector<8x256xf32>
    %c241_i32_25 = arith.constant 241 : i32
    %93 = tpu.dynamic_rotate %92 by %c241_i32_25 dim 1 : vector<8x256xf32>, i32 -> vector<8x256xf32>
    %c225_i32 = arith.constant 225 : i32
    %94 = tpu.dynamic_rotate %92 by %c225_i32 dim 1 : vector<8x256xf32>, i32 -> vector<8x256xf32>
    %95 = vector.shape_cast %21 : vector<1x256xi1> to vector<1x256xi1>
    %96 = vector.broadcast %95 : vector<1x256xi1> to vector<8x256xi1>
    %97 = arith.select %96, %94, %93 : vector<8x256xi1>, vector<8x256xf32>
    %98 = arith.addf %91, %97 : vector<8x256xf32>
    %99 = vector.extract_strided_slice %59 {offsets = [56, 0], sizes = [8, 256], strides = [1, 1]} : vector<72x256xf32> to vector<8x256xf32>
    %c240_i32 = arith.constant 240 : i32
    %100 = tpu.dynamic_rotate %99 by %c240_i32 dim 1 : vector<8x256xf32>, i32 -> vector<8x256xf32>
    %101 = arith.addf %98, %100 : vector<8x256xf32>
    %102 = vector.extract_strided_slice %59 {offsets = [64, 0], sizes = [8, 256], strides = [1, 1]} : vector<72x256xf32> to vector<8x256xf32>
    %c239_i32 = arith.constant 239 : i32
    %103 = tpu.dynamic_rotate %102 by %c239_i32 dim 1 : vector<8x256xf32>, i32 -> vector<8x256xf32>
    %c255_i32_26 = arith.constant 255 : i32
    %104 = tpu.dynamic_rotate %102 by %c255_i32_26 dim 1 : vector<8x256xf32>, i32 -> vector<8x256xf32>
    %105 = vector.shape_cast %19 : vector<1x256xi1> to vector<1x256xi1>
    %106 = vector.broadcast %105 : vector<1x256xi1> to vector<8x256xi1>
    %107 = arith.select %106, %104, %103 : vector<8x256xi1>, vector<8x256xf32>
    %108 = arith.addf %101, %107 : vector<8x256xf32>
    %109 = vector.broadcast %56 : vector<8x1xf32> to vector<8x256xf32>
    %110 = arith.addf %108, %109 : vector<8x256xf32>
    %111 = vector.extract_strided_slice %54 {offsets = [1, 0, 0], sizes = [1, 4, 256], strides = [1, 1, 1]} : vector<2x4x256xf32> to vector<1x4x256xf32>
    %112 = vector.shape_cast %111 : vector<1x4x256xf32> to vector<4x256xf32>
    %cst_27 = arith.constant dense<0.000000e+00> : vector<72x256xf32>
    %113 = tpu.matmul %55, %112, %cst_27 {dimension_numbers = #tpu.dot_dimension_numbers<[1], [0], [0], [1], [0, 0, 1, 1], [], []>} : vector<72x4xf32>, vector<4x256xf32>, vector<72x256xf32> -> vector<72x256xf32>
    %114 = vector.extract_strided_slice %113 {offsets = [0, 0], sizes = [8, 256], strides = [1, 1]} : vector<72x256xf32> to vector<8x256xf32>
    %c17_i32_28 = arith.constant 17 : i32
    %115 = tpu.dynamic_rotate %114 by %c17_i32_28 dim 1 : vector<8x256xf32>, i32 -> vector<8x256xf32>
    %c1_i32_29 = arith.constant 1 : i32
    %116 = tpu.dynamic_rotate %114 by %c1_i32_29 dim 1 : vector<8x256xf32>, i32 -> vector<8x256xf32>
    %117 = vector.shape_cast %21 : vector<1x256xi1> to vector<1x256xi1>
    %118 = vector.broadcast %117 : vector<1x256xi1> to vector<8x256xi1>
    %119 = arith.select %118, %116, %115 : vector<8x256xi1>, vector<8x256xf32>
    %120 = vector.extract_strided_slice %113 {offsets = [8, 0], sizes = [8, 256], strides = [1, 1]} : vector<72x256xf32> to vector<8x256xf32>
    %c16_i32_30 = arith.constant 16 : i32
    %121 = tpu.dynamic_rotate %120 by %c16_i32_30 dim 1 : vector<8x256xf32>, i32 -> vector<8x256xf32>
    %122 = arith.addf %119, %121 : vector<8x256xf32>
    %123 = vector.extract_strided_slice %113 {offsets = [16, 0], sizes = [8, 256], strides = [1, 1]} : vector<72x256xf32> to vector<8x256xf32>
    %c15_i32_31 = arith.constant 15 : i32
    %124 = tpu.dynamic_rotate %123 by %c15_i32_31 dim 1 : vector<8x256xf32>, i32 -> vector<8x256xf32>
    %c31_i32_32 = arith.constant 31 : i32
    %125 = tpu.dynamic_rotate %123 by %c31_i32_32 dim 1 : vector<8x256xf32>, i32 -> vector<8x256xf32>
    %126 = vector.shape_cast %19 : vector<1x256xi1> to vector<1x256xi1>
    %127 = vector.broadcast %126 : vector<1x256xi1> to vector<8x256xi1>
    %128 = arith.select %127, %125, %124 : vector<8x256xi1>, vector<8x256xf32>
    %129 = arith.addf %122, %128 : vector<8x256xf32>
    %130 = vector.extract_strided_slice %113 {offsets = [24, 0], sizes = [8, 256], strides = [1, 1]} : vector<72x256xf32> to vector<8x256xf32>
    %c1_i32_33 = arith.constant 1 : i32
    %131 = tpu.dynamic_rotate %130 by %c1_i32_33 dim 1 : vector<8x256xf32>, i32 -> vector<8x256xf32>
    %c241_i32_34 = arith.constant 241 : i32
    %132 = tpu.dynamic_rotate %130 by %c241_i32_34 dim 1 : vector<8x256xf32>, i32 -> vector<8x256xf32>
    %133 = vector.shape_cast %21 : vector<1x256xi1> to vector<1x256xi1>
    %134 = vector.broadcast %133 : vector<1x256xi1> to vector<8x256xi1>
    %135 = arith.select %134, %132, %131 : vector<8x256xi1>, vector<8x256xf32>
    %136 = arith.addf %129, %135 : vector<8x256xf32>
    %137 = vector.extract_strided_slice %113 {offsets = [32, 0], sizes = [8, 256], strides = [1, 1]} : vector<72x256xf32> to vector<8x256xf32>
    %138 = arith.addf %136, %137 : vector<8x256xf32>
    %139 = vector.extract_strided_slice %113 {offsets = [40, 0], sizes = [8, 256], strides = [1, 1]} : vector<72x256xf32> to vector<8x256xf32>
    %c255_i32_35 = arith.constant 255 : i32
    %140 = tpu.dynamic_rotate %139 by %c255_i32_35 dim 1 : vector<8x256xf32>, i32 -> vector<8x256xf32>
    %c15_i32_36 = arith.constant 15 : i32
    %141 = tpu.dynamic_rotate %139 by %c15_i32_36 dim 1 : vector<8x256xf32>, i32 -> vector<8x256xf32>
    %142 = vector.shape_cast %19 : vector<1x256xi1> to vector<1x256xi1>
    %143 = vector.broadcast %142 : vector<1x256xi1> to vector<8x256xi1>
    %144 = arith.select %143, %141, %140 : vector<8x256xi1>, vector<8x256xf32>
    %145 = arith.addf %138, %144 : vector<8x256xf32>
    %146 = vector.extract_strided_slice %113 {offsets = [48, 0], sizes = [8, 256], strides = [1, 1]} : vector<72x256xf32> to vector<8x256xf32>
    %c241_i32_37 = arith.constant 241 : i32
    %147 = tpu.dynamic_rotate %146 by %c241_i32_37 dim 1 : vector<8x256xf32>, i32 -> vector<8x256xf32>
    %c225_i32_38 = arith.constant 225 : i32
    %148 = tpu.dynamic_rotate %146 by %c225_i32_38 dim 1 : vector<8x256xf32>, i32 -> vector<8x256xf32>
    %149 = vector.shape_cast %21 : vector<1x256xi1> to vector<1x256xi1>
    %150 = vector.broadcast %149 : vector<1x256xi1> to vector<8x256xi1>
    %151 = arith.select %150, %148, %147 : vector<8x256xi1>, vector<8x256xf32>
    %152 = arith.addf %145, %151 : vector<8x256xf32>
    %153 = vector.extract_strided_slice %113 {offsets = [56, 0], sizes = [8, 256], strides = [1, 1]} : vector<72x256xf32> to vector<8x256xf32>
    %c240_i32_39 = arith.constant 240 : i32
    %154 = tpu.dynamic_rotate %153 by %c240_i32_39 dim 1 : vector<8x256xf32>, i32 -> vector<8x256xf32>
    %155 = arith.addf %152, %154 : vector<8x256xf32>
    %156 = vector.extract_strided_slice %113 {offsets = [64, 0], sizes = [8, 256], strides = [1, 1]} : vector<72x256xf32> to vector<8x256xf32>
    %c239_i32_40 = arith.constant 239 : i32
    %157 = tpu.dynamic_rotate %156 by %c239_i32_40 dim 1 : vector<8x256xf32>, i32 -> vector<8x256xf32>
    %c255_i32_41 = arith.constant 255 : i32
    %158 = tpu.dynamic_rotate %156 by %c255_i32_41 dim 1 : vector<8x256xf32>, i32 -> vector<8x256xf32>
    %159 = vector.shape_cast %19 : vector<1x256xi1> to vector<1x256xi1>
    %160 = vector.broadcast %159 : vector<1x256xi1> to vector<8x256xi1>
    %161 = arith.select %160, %158, %157 : vector<8x256xi1>, vector<8x256xf32>
    %162 = arith.addf %155, %161 : vector<8x256xf32>
    %163 = vector.broadcast %56 : vector<8x1xf32> to vector<8x256xf32>
    %164 = arith.addf %162, %163 : vector<8x256xf32>
    %165 = vector.shape_cast %110 : vector<8x256xf32> to vector<1x8x256xf32>
    %166 = vector.shape_cast %164 : vector<8x256xf32> to vector<1x8x256xf32>
    %167 = tpu.concatenate %165, %166 in 0 : vector<1x8x256xf32>, vector<1x8x256xf32> -> vector<2x8x256xf32>
    %cst_42 = arith.constant dense<0.000000e+00> : vector<2x8xf32>
    %168 = vector.multi_reduction <add>, %167, %cst_42 [2] : vector<2x8x256xf32> to vector<2x8xf32>
    %169 = vector.shape_cast %168 : vector<2x8xf32> to vector<2x8x1xf32>
    %cst_43 = arith.constant 2.560000e+02 : f32
    %170 = vector.broadcast %cst_43 : f32 to vector<2x8x1xf32>
    %171 = arith.divf %169, %170 : vector<2x8x1xf32>
    %172 = arith.mulf %167, %167 : vector<2x8x256xf32>
    %cst_44 = arith.constant dense<0.000000e+00> : vector<2x8xf32>
    %173 = vector.multi_reduction <add>, %172, %cst_44 [2] : vector<2x8x256xf32> to vector<2x8xf32>
    %174 = vector.shape_cast %173 : vector<2x8xf32> to vector<2x8x1xf32>
    %cst_45 = arith.constant 2.560000e+02 : f32
    %175 = vector.broadcast %cst_45 : f32 to vector<2x8x1xf32>
    %176 = arith.divf %174, %175 : vector<2x8x1xf32>
    %177 = arith.mulf %171, %171 : vector<2x8x1xf32>
    %178 = arith.subf %176, %177 : vector<2x8x1xf32>
    %c0_46 = arith.constant 0 : index
    %c0_47 = arith.constant 0 : index
    %179 = vector.load %arg6[%c0_46, %c0_47] : memref<8x1xf32, #tpu.memory_space<vmem>>, vector<8x1xf32>
    %cst_48 = arith.constant 9.99999974E-6 : f32
    %180 = vector.broadcast %cst_48 : f32 to vector<2x8x1xf32>
    %181 = arith.addf %178, %180 : vector<2x8x1xf32>
    %182 = math.rsqrt %181 : vector<2x8x1xf32>
    %183 = vector.shape_cast %179 : vector<8x1xf32> to vector<1x8x1xf32>
    %184 = vector.broadcast %183 : vector<1x8x1xf32> to vector<2x8x1xf32>
    %185 = arith.mulf %184, %182 : vector<2x8x1xf32>
    %c0_49 = arith.constant 0 : index
    %c0_50 = arith.constant 0 : index
    %186 = vector.load %arg7[%c0_49, %c0_50] : memref<8x1xf32, #tpu.memory_space<vmem>>, vector<8x1xf32>
    %187 = arith.mulf %171, %185 : vector<2x8x1xf32>
    %188 = vector.shape_cast %186 : vector<8x1xf32> to vector<1x8x1xf32>
    %189 = vector.broadcast %188 : vector<1x8x1xf32> to vector<2x8x1xf32>
    %190 = arith.subf %189, %187 : vector<2x8x1xf32>
    %191 = vector.broadcast %185 : vector<2x8x1xf32> to vector<2x8x256xf32>
    %192 = arith.mulf %167, %191 : vector<2x8x256xf32>
    %193 = vector.broadcast %190 : vector<2x8x1xf32> to vector<2x8x256xf32>
    %194 = arith.addf %192, %193 : vector<2x8x256xf32>
    %195 = arith.negf %194 : vector<2x8x256xf32>
    %196 = math.exp %195 : vector<2x8x256xf32>
    %cst_51 = arith.constant 1.000000e+00 : f32
    %197 = vector.broadcast %cst_51 : f32 to vector<2x8x256xf32>
    %198 = arith.addf %197, %196 : vector<2x8x256xf32>
    %199 = arith.divf %197, %198 : vector<2x8x256xf32>
    %200 = arith.mulf %194, %199 : vector<2x8x256xf32>
    %c0_52 = arith.constant 0 : index
    %c0_53 = arith.constant 0 : index
    %201 = vector.load %arg8[%c0_52, %c0_53] : memref<72x8xf32, #tpu.memory_space<vmem>>, vector<72x8xf32>
    %c0_54 = arith.constant 0 : index
    %c0_55 = arith.constant 0 : index
    %202 = vector.load %arg9[%c0_54, %c0_55] : memref<8x1xf32, #tpu.memory_space<vmem>>, vector<8x1xf32>
    %203 = vector.extract_strided_slice %200 {offsets = [0, 0, 0], sizes = [1, 8, 256], strides = [1, 1, 1]} : vector<2x8x256xf32> to vector<1x8x256xf32>
    %204 = vector.shape_cast %203 : vector<1x8x256xf32> to vector<8x256xf32>
    %cst_56 = arith.constant dense<0.000000e+00> : vector<72x256xf32>
    %205 = tpu.matmul %201, %204, %cst_56 {dimension_numbers = #tpu.dot_dimension_numbers<[1], [0], [0], [1], [0, 0, 1, 1], [], []>} : vector<72x8xf32>, vector<8x256xf32>, vector<72x256xf32> -> vector<72x256xf32>
    %206 = vector.extract_strided_slice %205 {offsets = [0, 0], sizes = [8, 256], strides = [1, 1]} : vector<72x256xf32> to vector<8x256xf32>
    %c17_i32_57 = arith.constant 17 : i32
    %207 = tpu.dynamic_rotate %206 by %c17_i32_57 dim 1 : vector<8x256xf32>, i32 -> vector<8x256xf32>
    %c1_i32_58 = arith.constant 1 : i32
    %208 = tpu.dynamic_rotate %206 by %c1_i32_58 dim 1 : vector<8x256xf32>, i32 -> vector<8x256xf32>
    %209 = vector.shape_cast %21 : vector<1x256xi1> to vector<1x256xi1>
    %210 = vector.broadcast %209 : vector<1x256xi1> to vector<8x256xi1>
    %211 = arith.select %210, %208, %207 : vector<8x256xi1>, vector<8x256xf32>
    %212 = vector.extract_strided_slice %205 {offsets = [8, 0], sizes = [8, 256], strides = [1, 1]} : vector<72x256xf32> to vector<8x256xf32>
    %c16_i32_59 = arith.constant 16 : i32
    %213 = tpu.dynamic_rotate %212 by %c16_i32_59 dim 1 : vector<8x256xf32>, i32 -> vector<8x256xf32>
    %214 = arith.addf %211, %213 : vector<8x256xf32>
    %215 = vector.extract_strided_slice %205 {offsets = [16, 0], sizes = [8, 256], strides = [1, 1]} : vector<72x256xf32> to vector<8x256xf32>
    %c15_i32_60 = arith.constant 15 : i32
    %216 = tpu.dynamic_rotate %215 by %c15_i32_60 dim 1 : vector<8x256xf32>, i32 -> vector<8x256xf32>
    %c31_i32_61 = arith.constant 31 : i32
    %217 = tpu.dynamic_rotate %215 by %c31_i32_61 dim 1 : vector<8x256xf32>, i32 -> vector<8x256xf32>
    %218 = vector.shape_cast %19 : vector<1x256xi1> to vector<1x256xi1>
    %219 = vector.broadcast %218 : vector<1x256xi1> to vector<8x256xi1>
    %220 = arith.select %219, %217, %216 : vector<8x256xi1>, vector<8x256xf32>
    %221 = arith.addf %214, %220 : vector<8x256xf32>
    %222 = vector.extract_strided_slice %205 {offsets = [24, 0], sizes = [8, 256], strides = [1, 1]} : vector<72x256xf32> to vector<8x256xf32>
    %c1_i32_62 = arith.constant 1 : i32
    %223 = tpu.dynamic_rotate %222 by %c1_i32_62 dim 1 : vector<8x256xf32>, i32 -> vector<8x256xf32>
    %c241_i32_63 = arith.constant 241 : i32
    %224 = tpu.dynamic_rotate %222 by %c241_i32_63 dim 1 : vector<8x256xf32>, i32 -> vector<8x256xf32>
    %225 = vector.shape_cast %21 : vector<1x256xi1> to vector<1x256xi1>
    %226 = vector.broadcast %225 : vector<1x256xi1> to vector<8x256xi1>
    %227 = arith.select %226, %224, %223 : vector<8x256xi1>, vector<8x256xf32>
    %228 = arith.addf %221, %227 : vector<8x256xf32>
    %229 = vector.extract_strided_slice %205 {offsets = [32, 0], sizes = [8, 256], strides = [1, 1]} : vector<72x256xf32> to vector<8x256xf32>
    %230 = arith.addf %228, %229 : vector<8x256xf32>
    %231 = vector.extract_strided_slice %205 {offsets = [40, 0], sizes = [8, 256], strides = [1, 1]} : vector<72x256xf32> to vector<8x256xf32>
    %c255_i32_64 = arith.constant 255 : i32
    %232 = tpu.dynamic_rotate %231 by %c255_i32_64 dim 1 : vector<8x256xf32>, i32 -> vector<8x256xf32>
    %c15_i32_65 = arith.constant 15 : i32
    %233 = tpu.dynamic_rotate %231 by %c15_i32_65 dim 1 : vector<8x256xf32>, i32 -> vector<8x256xf32>
    %234 = vector.shape_cast %19 : vector<1x256xi1> to vector<1x256xi1>
    %235 = vector.broadcast %234 : vector<1x256xi1> to vector<8x256xi1>
    %236 = arith.select %235, %233, %232 : vector<8x256xi1>, vector<8x256xf32>
    %237 = arith.addf %230, %236 : vector<8x256xf32>
    %238 = vector.extract_strided_slice %205 {offsets = [48, 0], sizes = [8, 256], strides = [1, 1]} : vector<72x256xf32> to vector<8x256xf32>
    %c241_i32_66 = arith.constant 241 : i32
    %239 = tpu.dynamic_rotate %238 by %c241_i32_66 dim 1 : vector<8x256xf32>, i32 -> vector<8x256xf32>
    %c225_i32_67 = arith.constant 225 : i32
    %240 = tpu.dynamic_rotate %238 by %c225_i32_67 dim 1 : vector<8x256xf32>, i32 -> vector<8x256xf32>
    %241 = vector.shape_cast %21 : vector<1x256xi1> to vector<1x256xi1>
    %242 = vector.broadcast %241 : vector<1x256xi1> to vector<8x256xi1>
    %243 = arith.select %242, %240, %239 : vector<8x256xi1>, vector<8x256xf32>
    %244 = arith.addf %237, %243 : vector<8x256xf32>
    %245 = vector.extract_strided_slice %205 {offsets = [56, 0], sizes = [8, 256], strides = [1, 1]} : vector<72x256xf32> to vector<8x256xf32>
    %c240_i32_68 = arith.constant 240 : i32
    %246 = tpu.dynamic_rotate %245 by %c240_i32_68 dim 1 : vector<8x256xf32>, i32 -> vector<8x256xf32>
    %247 = arith.addf %244, %246 : vector<8x256xf32>
    %248 = vector.extract_strided_slice %205 {offsets = [64, 0], sizes = [8, 256], strides = [1, 1]} : vector<72x256xf32> to vector<8x256xf32>
    %c239_i32_69 = arith.constant 239 : i32
    %249 = tpu.dynamic_rotate %248 by %c239_i32_69 dim 1 : vector<8x256xf32>, i32 -> vector<8x256xf32>
    %c255_i32_70 = arith.constant 255 : i32
    %250 = tpu.dynamic_rotate %248 by %c255_i32_70 dim 1 : vector<8x256xf32>, i32 -> vector<8x256xf32>
    %251 = vector.shape_cast %19 : vector<1x256xi1> to vector<1x256xi1>
    %252 = vector.broadcast %251 : vector<1x256xi1> to vector<8x256xi1>
    %253 = arith.select %252, %250, %249 : vector<8x256xi1>, vector<8x256xf32>
    %254 = arith.addf %247, %253 : vector<8x256xf32>
    %255 = vector.broadcast %202 : vector<8x1xf32> to vector<8x256xf32>
    %256 = arith.addf %254, %255 : vector<8x256xf32>
    %257 = vector.extract_strided_slice %200 {offsets = [1, 0, 0], sizes = [1, 8, 256], strides = [1, 1, 1]} : vector<2x8x256xf32> to vector<1x8x256xf32>
    %258 = vector.shape_cast %257 : vector<1x8x256xf32> to vector<8x256xf32>
    %cst_71 = arith.constant dense<0.000000e+00> : vector<72x256xf32>
    %259 = tpu.matmul %201, %258, %cst_71 {dimension_numbers = #tpu.dot_dimension_numbers<[1], [0], [0], [1], [0, 0, 1, 1], [], []>} : vector<72x8xf32>, vector<8x256xf32>, vector<72x256xf32> -> vector<72x256xf32>
    %260 = vector.extract_strided_slice %259 {offsets = [0, 0], sizes = [8, 256], strides = [1, 1]} : vector<72x256xf32> to vector<8x256xf32>
    %c17_i32_72 = arith.constant 17 : i32
    %261 = tpu.dynamic_rotate %260 by %c17_i32_72 dim 1 : vector<8x256xf32>, i32 -> vector<8x256xf32>
    %c1_i32_73 = arith.constant 1 : i32
    %262 = tpu.dynamic_rotate %260 by %c1_i32_73 dim 1 : vector<8x256xf32>, i32 -> vector<8x256xf32>
    %263 = vector.shape_cast %21 : vector<1x256xi1> to vector<1x256xi1>
    %264 = vector.broadcast %263 : vector<1x256xi1> to vector<8x256xi1>
    %265 = arith.select %264, %262, %261 : vector<8x256xi1>, vector<8x256xf32>
    %266 = vector.extract_strided_slice %259 {offsets = [8, 0], sizes = [8, 256], strides = [1, 1]} : vector<72x256xf32> to vector<8x256xf32>
    %c16_i32_74 = arith.constant 16 : i32
    %267 = tpu.dynamic_rotate %266 by %c16_i32_74 dim 1 : vector<8x256xf32>, i32 -> vector<8x256xf32>
    %268 = arith.addf %265, %267 : vector<8x256xf32>
    %269 = vector.extract_strided_slice %259 {offsets = [16, 0], sizes = [8, 256], strides = [1, 1]} : vector<72x256xf32> to vector<8x256xf32>
    %c15_i32_75 = arith.constant 15 : i32
    %270 = tpu.dynamic_rotate %269 by %c15_i32_75 dim 1 : vector<8x256xf32>, i32 -> vector<8x256xf32>
    %c31_i32_76 = arith.constant 31 : i32
    %271 = tpu.dynamic_rotate %269 by %c31_i32_76 dim 1 : vector<8x256xf32>, i32 -> vector<8x256xf32>
    %272 = vector.shape_cast %19 : vector<1x256xi1> to vector<1x256xi1>
    %273 = vector.broadcast %272 : vector<1x256xi1> to vector<8x256xi1>
    %274 = arith.select %273, %271, %270 : vector<8x256xi1>, vector<8x256xf32>
    %275 = arith.addf %268, %274 : vector<8x256xf32>
    %276 = vector.extract_strided_slice %259 {offsets = [24, 0], sizes = [8, 256], strides = [1, 1]} : vector<72x256xf32> to vector<8x256xf32>
    %c1_i32_77 = arith.constant 1 : i32
    %277 = tpu.dynamic_rotate %276 by %c1_i32_77 dim 1 : vector<8x256xf32>, i32 -> vector<8x256xf32>
    %c241_i32_78 = arith.constant 241 : i32
    %278 = tpu.dynamic_rotate %276 by %c241_i32_78 dim 1 : vector<8x256xf32>, i32 -> vector<8x256xf32>
    %279 = vector.shape_cast %21 : vector<1x256xi1> to vector<1x256xi1>
    %280 = vector.broadcast %279 : vector<1x256xi1> to vector<8x256xi1>
    %281 = arith.select %280, %278, %277 : vector<8x256xi1>, vector<8x256xf32>
    %282 = arith.addf %275, %281 : vector<8x256xf32>
    %283 = vector.extract_strided_slice %259 {offsets = [32, 0], sizes = [8, 256], strides = [1, 1]} : vector<72x256xf32> to vector<8x256xf32>
    %284 = arith.addf %282, %283 : vector<8x256xf32>
    %285 = vector.extract_strided_slice %259 {offsets = [40, 0], sizes = [8, 256], strides = [1, 1]} : vector<72x256xf32> to vector<8x256xf32>
    %c255_i32_79 = arith.constant 255 : i32
    %286 = tpu.dynamic_rotate %285 by %c255_i32_79 dim 1 : vector<8x256xf32>, i32 -> vector<8x256xf32>
    %c15_i32_80 = arith.constant 15 : i32
    %287 = tpu.dynamic_rotate %285 by %c15_i32_80 dim 1 : vector<8x256xf32>, i32 -> vector<8x256xf32>
    %288 = vector.shape_cast %19 : vector<1x256xi1> to vector<1x256xi1>
    %289 = vector.broadcast %288 : vector<1x256xi1> to vector<8x256xi1>
    %290 = arith.select %289, %287, %286 : vector<8x256xi1>, vector<8x256xf32>
    %291 = arith.addf %284, %290 : vector<8x256xf32>
    %292 = vector.extract_strided_slice %259 {offsets = [48, 0], sizes = [8, 256], strides = [1, 1]} : vector<72x256xf32> to vector<8x256xf32>
    %c241_i32_81 = arith.constant 241 : i32
    %293 = tpu.dynamic_rotate %292 by %c241_i32_81 dim 1 : vector<8x256xf32>, i32 -> vector<8x256xf32>
    %c225_i32_82 = arith.constant 225 : i32
    %294 = tpu.dynamic_rotate %292 by %c225_i32_82 dim 1 : vector<8x256xf32>, i32 -> vector<8x256xf32>
    %295 = vector.shape_cast %21 : vector<1x256xi1> to vector<1x256xi1>
    %296 = vector.broadcast %295 : vector<1x256xi1> to vector<8x256xi1>
    %297 = arith.select %296, %294, %293 : vector<8x256xi1>, vector<8x256xf32>
    %298 = arith.addf %291, %297 : vector<8x256xf32>
    %299 = vector.extract_strided_slice %259 {offsets = [56, 0], sizes = [8, 256], strides = [1, 1]} : vector<72x256xf32> to vector<8x256xf32>
    %c240_i32_83 = arith.constant 240 : i32
    %300 = tpu.dynamic_rotate %299 by %c240_i32_83 dim 1 : vector<8x256xf32>, i32 -> vector<8x256xf32>
    %301 = arith.addf %298, %300 : vector<8x256xf32>
    %302 = vector.extract_strided_slice %259 {offsets = [64, 0], sizes = [8, 256], strides = [1, 1]} : vector<72x256xf32> to vector<8x256xf32>
    %c239_i32_84 = arith.constant 239 : i32
    %303 = tpu.dynamic_rotate %302 by %c239_i32_84 dim 1 : vector<8x256xf32>, i32 -> vector<8x256xf32>
    %c255_i32_85 = arith.constant 255 : i32
    %304 = tpu.dynamic_rotate %302 by %c255_i32_85 dim 1 : vector<8x256xf32>, i32 -> vector<8x256xf32>
    %305 = vector.shape_cast %19 : vector<1x256xi1> to vector<1x256xi1>
    %306 = vector.broadcast %305 : vector<1x256xi1> to vector<8x256xi1>
    %307 = arith.select %306, %304, %303 : vector<8x256xi1>, vector<8x256xf32>
    %308 = arith.addf %301, %307 : vector<8x256xf32>
    %309 = vector.broadcast %202 : vector<8x1xf32> to vector<8x256xf32>
    %310 = arith.addf %308, %309 : vector<8x256xf32>
    %311 = vector.shape_cast %256 : vector<8x256xf32> to vector<1x8x256xf32>
    %312 = vector.shape_cast %310 : vector<8x256xf32> to vector<1x8x256xf32>
    %313 = tpu.concatenate %311, %312 in 0 : vector<1x8x256xf32>, vector<1x8x256xf32> -> vector<2x8x256xf32>
    %cst_86 = arith.constant dense<0.000000e+00> : vector<2x8xf32>
    %314 = vector.multi_reduction <add>, %313, %cst_86 [2] : vector<2x8x256xf32> to vector<2x8xf32>
    %315 = vector.shape_cast %314 : vector<2x8xf32> to vector<2x8x1xf32>
    %cst_87 = arith.constant 2.560000e+02 : f32
    %316 = vector.broadcast %cst_87 : f32 to vector<2x8x1xf32>
    %317 = arith.divf %315, %316 : vector<2x8x1xf32>
    %318 = arith.mulf %313, %313 : vector<2x8x256xf32>
    %cst_88 = arith.constant dense<0.000000e+00> : vector<2x8xf32>
    %319 = vector.multi_reduction <add>, %318, %cst_88 [2] : vector<2x8x256xf32> to vector<2x8xf32>
    %320 = vector.shape_cast %319 : vector<2x8xf32> to vector<2x8x1xf32>
    %cst_89 = arith.constant 2.560000e+02 : f32
    %321 = vector.broadcast %cst_89 : f32 to vector<2x8x1xf32>
    %322 = arith.divf %320, %321 : vector<2x8x1xf32>
    %323 = arith.mulf %317, %317 : vector<2x8x1xf32>
    %324 = arith.subf %322, %323 : vector<2x8x1xf32>
    %c0_90 = arith.constant 0 : index
    %c0_91 = arith.constant 0 : index
    %325 = vector.load %arg10[%c0_90, %c0_91] : memref<8x1xf32, #tpu.memory_space<vmem>>, vector<8x1xf32>
    %cst_92 = arith.constant 9.99999974E-6 : f32
    %326 = vector.broadcast %cst_92 : f32 to vector<2x8x1xf32>
    %327 = arith.addf %324, %326 : vector<2x8x1xf32>
    %328 = math.rsqrt %327 : vector<2x8x1xf32>
    %329 = vector.shape_cast %325 : vector<8x1xf32> to vector<1x8x1xf32>
    %330 = vector.broadcast %329 : vector<1x8x1xf32> to vector<2x8x1xf32>
    %331 = arith.mulf %330, %328 : vector<2x8x1xf32>
    %c0_93 = arith.constant 0 : index
    %c0_94 = arith.constant 0 : index
    %332 = vector.load %arg11[%c0_93, %c0_94] : memref<8x1xf32, #tpu.memory_space<vmem>>, vector<8x1xf32>
    %333 = arith.mulf %317, %331 : vector<2x8x1xf32>
    %334 = vector.shape_cast %332 : vector<8x1xf32> to vector<1x8x1xf32>
    %335 = vector.broadcast %334 : vector<1x8x1xf32> to vector<2x8x1xf32>
    %336 = arith.subf %335, %333 : vector<2x8x1xf32>
    %337 = vector.broadcast %331 : vector<2x8x1xf32> to vector<2x8x256xf32>
    %338 = arith.mulf %313, %337 : vector<2x8x256xf32>
    %339 = vector.broadcast %336 : vector<2x8x1xf32> to vector<2x8x256xf32>
    %340 = arith.addf %338, %339 : vector<2x8x256xf32>
    %341 = arith.negf %340 : vector<2x8x256xf32>
    %342 = math.exp %341 : vector<2x8x256xf32>
    %cst_95 = arith.constant 1.000000e+00 : f32
    %343 = vector.broadcast %cst_95 : f32 to vector<2x8x256xf32>
    %344 = arith.addf %343, %342 : vector<2x8x256xf32>
    %345 = arith.divf %343, %344 : vector<2x8x256xf32>
    %346 = arith.mulf %340, %345 : vector<2x8x256xf32>
    %c0_96 = arith.constant 0 : index
    %c0_97 = arith.constant 0 : index
    %347 = vector.load %arg12[%c0_96, %c0_97] : memref<72x8xf32, #tpu.memory_space<vmem>>, vector<72x8xf32>
    %c0_98 = arith.constant 0 : index
    %c0_99 = arith.constant 0 : index
    %348 = vector.load %arg13[%c0_98, %c0_99] : memref<8x1xf32, #tpu.memory_space<vmem>>, vector<8x1xf32>
    %349 = vector.extract_strided_slice %346 {offsets = [0, 0, 0], sizes = [1, 8, 256], strides = [1, 1, 1]} : vector<2x8x256xf32> to vector<1x8x256xf32>
    %350 = vector.shape_cast %349 : vector<1x8x256xf32> to vector<8x256xf32>
    %cst_100 = arith.constant dense<0.000000e+00> : vector<72x256xf32>
    %351 = tpu.matmul %347, %350, %cst_100 {dimension_numbers = #tpu.dot_dimension_numbers<[1], [0], [0], [1], [0, 0, 1, 1], [], []>} : vector<72x8xf32>, vector<8x256xf32>, vector<72x256xf32> -> vector<72x256xf32>
    %352 = vector.extract_strided_slice %351 {offsets = [0, 0], sizes = [8, 256], strides = [1, 1]} : vector<72x256xf32> to vector<8x256xf32>
    %c17_i32_101 = arith.constant 17 : i32
    %353 = tpu.dynamic_rotate %352 by %c17_i32_101 dim 1 : vector<8x256xf32>, i32 -> vector<8x256xf32>
    %c1_i32_102 = arith.constant 1 : i32
    %354 = tpu.dynamic_rotate %352 by %c1_i32_102 dim 1 : vector<8x256xf32>, i32 -> vector<8x256xf32>
    %355 = vector.shape_cast %21 : vector<1x256xi1> to vector<1x256xi1>
    %356 = vector.broadcast %355 : vector<1x256xi1> to vector<8x256xi1>
    %357 = arith.select %356, %354, %353 : vector<8x256xi1>, vector<8x256xf32>
    %358 = vector.extract_strided_slice %351 {offsets = [8, 0], sizes = [8, 256], strides = [1, 1]} : vector<72x256xf32> to vector<8x256xf32>
    %c16_i32_103 = arith.constant 16 : i32
    %359 = tpu.dynamic_rotate %358 by %c16_i32_103 dim 1 : vector<8x256xf32>, i32 -> vector<8x256xf32>
    %360 = arith.addf %357, %359 : vector<8x256xf32>
    %361 = vector.extract_strided_slice %351 {offsets = [16, 0], sizes = [8, 256], strides = [1, 1]} : vector<72x256xf32> to vector<8x256xf32>
    %c15_i32_104 = arith.constant 15 : i32
    %362 = tpu.dynamic_rotate %361 by %c15_i32_104 dim 1 : vector<8x256xf32>, i32 -> vector<8x256xf32>
    %c31_i32_105 = arith.constant 31 : i32
    %363 = tpu.dynamic_rotate %361 by %c31_i32_105 dim 1 : vector<8x256xf32>, i32 -> vector<8x256xf32>
    %364 = vector.shape_cast %19 : vector<1x256xi1> to vector<1x256xi1>
    %365 = vector.broadcast %364 : vector<1x256xi1> to vector<8x256xi1>
    %366 = arith.select %365, %363, %362 : vector<8x256xi1>, vector<8x256xf32>
    %367 = arith.addf %360, %366 : vector<8x256xf32>
    %368 = vector.extract_strided_slice %351 {offsets = [24, 0], sizes = [8, 256], strides = [1, 1]} : vector<72x256xf32> to vector<8x256xf32>
    %c1_i32_106 = arith.constant 1 : i32
    %369 = tpu.dynamic_rotate %368 by %c1_i32_106 dim 1 : vector<8x256xf32>, i32 -> vector<8x256xf32>
    %c241_i32_107 = arith.constant 241 : i32
    %370 = tpu.dynamic_rotate %368 by %c241_i32_107 dim 1 : vector<8x256xf32>, i32 -> vector<8x256xf32>
    %371 = vector.shape_cast %21 : vector<1x256xi1> to vector<1x256xi1>
    %372 = vector.broadcast %371 : vector<1x256xi1> to vector<8x256xi1>
    %373 = arith.select %372, %370, %369 : vector<8x256xi1>, vector<8x256xf32>
    %374 = arith.addf %367, %373 : vector<8x256xf32>
    %375 = vector.extract_strided_slice %351 {offsets = [32, 0], sizes = [8, 256], strides = [1, 1]} : vector<72x256xf32> to vector<8x256xf32>
    %376 = arith.addf %374, %375 : vector<8x256xf32>
    %377 = vector.extract_strided_slice %351 {offsets = [40, 0], sizes = [8, 256], strides = [1, 1]} : vector<72x256xf32> to vector<8x256xf32>
    %c255_i32_108 = arith.constant 255 : i32
    %378 = tpu.dynamic_rotate %377 by %c255_i32_108 dim 1 : vector<8x256xf32>, i32 -> vector<8x256xf32>
    %c15_i32_109 = arith.constant 15 : i32
    %379 = tpu.dynamic_rotate %377 by %c15_i32_109 dim 1 : vector<8x256xf32>, i32 -> vector<8x256xf32>
    %380 = vector.shape_cast %19 : vector<1x256xi1> to vector<1x256xi1>
    %381 = vector.broadcast %380 : vector<1x256xi1> to vector<8x256xi1>
    %382 = arith.select %381, %379, %378 : vector<8x256xi1>, vector<8x256xf32>
    %383 = arith.addf %376, %382 : vector<8x256xf32>
    %384 = vector.extract_strided_slice %351 {offsets = [48, 0], sizes = [8, 256], strides = [1, 1]} : vector<72x256xf32> to vector<8x256xf32>
    %c241_i32_110 = arith.constant 241 : i32
    %385 = tpu.dynamic_rotate %384 by %c241_i32_110 dim 1 : vector<8x256xf32>, i32 -> vector<8x256xf32>
    %c225_i32_111 = arith.constant 225 : i32
    %386 = tpu.dynamic_rotate %384 by %c225_i32_111 dim 1 : vector<8x256xf32>, i32 -> vector<8x256xf32>
    %387 = vector.shape_cast %21 : vector<1x256xi1> to vector<1x256xi1>
    %388 = vector.broadcast %387 : vector<1x256xi1> to vector<8x256xi1>
    %389 = arith.select %388, %386, %385 : vector<8x256xi1>, vector<8x256xf32>
    %390 = arith.addf %383, %389 : vector<8x256xf32>
    %391 = vector.extract_strided_slice %351 {offsets = [56, 0], sizes = [8, 256], strides = [1, 1]} : vector<72x256xf32> to vector<8x256xf32>
    %c240_i32_112 = arith.constant 240 : i32
    %392 = tpu.dynamic_rotate %391 by %c240_i32_112 dim 1 : vector<8x256xf32>, i32 -> vector<8x256xf32>
    %393 = arith.addf %390, %392 : vector<8x256xf32>
    %394 = vector.extract_strided_slice %351 {offsets = [64, 0], sizes = [8, 256], strides = [1, 1]} : vector<72x256xf32> to vector<8x256xf32>
    %c239_i32_113 = arith.constant 239 : i32
    %395 = tpu.dynamic_rotate %394 by %c239_i32_113 dim 1 : vector<8x256xf32>, i32 -> vector<8x256xf32>
    %c255_i32_114 = arith.constant 255 : i32
    %396 = tpu.dynamic_rotate %394 by %c255_i32_114 dim 1 : vector<8x256xf32>, i32 -> vector<8x256xf32>
    %397 = vector.shape_cast %19 : vector<1x256xi1> to vector<1x256xi1>
    %398 = vector.broadcast %397 : vector<1x256xi1> to vector<8x256xi1>
    %399 = arith.select %398, %396, %395 : vector<8x256xi1>, vector<8x256xf32>
    %400 = arith.addf %393, %399 : vector<8x256xf32>
    %401 = vector.broadcast %348 : vector<8x1xf32> to vector<8x256xf32>
    %402 = arith.addf %400, %401 : vector<8x256xf32>
    %403 = vector.extract_strided_slice %346 {offsets = [1, 0, 0], sizes = [1, 8, 256], strides = [1, 1, 1]} : vector<2x8x256xf32> to vector<1x8x256xf32>
    %404 = vector.shape_cast %403 : vector<1x8x256xf32> to vector<8x256xf32>
    %cst_115 = arith.constant dense<0.000000e+00> : vector<72x256xf32>
    %405 = tpu.matmul %347, %404, %cst_115 {dimension_numbers = #tpu.dot_dimension_numbers<[1], [0], [0], [1], [0, 0, 1, 1], [], []>} : vector<72x8xf32>, vector<8x256xf32>, vector<72x256xf32> -> vector<72x256xf32>
    %406 = vector.extract_strided_slice %405 {offsets = [0, 0], sizes = [8, 256], strides = [1, 1]} : vector<72x256xf32> to vector<8x256xf32>
    %c17_i32_116 = arith.constant 17 : i32
    %407 = tpu.dynamic_rotate %406 by %c17_i32_116 dim 1 : vector<8x256xf32>, i32 -> vector<8x256xf32>
    %c1_i32_117 = arith.constant 1 : i32
    %408 = tpu.dynamic_rotate %406 by %c1_i32_117 dim 1 : vector<8x256xf32>, i32 -> vector<8x256xf32>
    %409 = vector.shape_cast %21 : vector<1x256xi1> to vector<1x256xi1>
    %410 = vector.broadcast %409 : vector<1x256xi1> to vector<8x256xi1>
    %411 = arith.select %410, %408, %407 : vector<8x256xi1>, vector<8x256xf32>
    %412 = vector.extract_strided_slice %405 {offsets = [8, 0], sizes = [8, 256], strides = [1, 1]} : vector<72x256xf32> to vector<8x256xf32>
    %c16_i32_118 = arith.constant 16 : i32
    %413 = tpu.dynamic_rotate %412 by %c16_i32_118 dim 1 : vector<8x256xf32>, i32 -> vector<8x256xf32>
    %414 = arith.addf %411, %413 : vector<8x256xf32>
    %415 = vector.extract_strided_slice %405 {offsets = [16, 0], sizes = [8, 256], strides = [1, 1]} : vector<72x256xf32> to vector<8x256xf32>
    %c15_i32_119 = arith.constant 15 : i32
    %416 = tpu.dynamic_rotate %415 by %c15_i32_119 dim 1 : vector<8x256xf32>, i32 -> vector<8x256xf32>
    %c31_i32_120 = arith.constant 31 : i32
    %417 = tpu.dynamic_rotate %415 by %c31_i32_120 dim 1 : vector<8x256xf32>, i32 -> vector<8x256xf32>
    %418 = vector.shape_cast %19 : vector<1x256xi1> to vector<1x256xi1>
    %419 = vector.broadcast %418 : vector<1x256xi1> to vector<8x256xi1>
    %420 = arith.select %419, %417, %416 : vector<8x256xi1>, vector<8x256xf32>
    %421 = arith.addf %414, %420 : vector<8x256xf32>
    %422 = vector.extract_strided_slice %405 {offsets = [24, 0], sizes = [8, 256], strides = [1, 1]} : vector<72x256xf32> to vector<8x256xf32>
    %c1_i32_121 = arith.constant 1 : i32
    %423 = tpu.dynamic_rotate %422 by %c1_i32_121 dim 1 : vector<8x256xf32>, i32 -> vector<8x256xf32>
    %c241_i32_122 = arith.constant 241 : i32
    %424 = tpu.dynamic_rotate %422 by %c241_i32_122 dim 1 : vector<8x256xf32>, i32 -> vector<8x256xf32>
    %425 = vector.shape_cast %21 : vector<1x256xi1> to vector<1x256xi1>
    %426 = vector.broadcast %425 : vector<1x256xi1> to vector<8x256xi1>
    %427 = arith.select %426, %424, %423 : vector<8x256xi1>, vector<8x256xf32>
    %428 = arith.addf %421, %427 : vector<8x256xf32>
    %429 = vector.extract_strided_slice %405 {offsets = [32, 0], sizes = [8, 256], strides = [1, 1]} : vector<72x256xf32> to vector<8x256xf32>
    %430 = arith.addf %428, %429 : vector<8x256xf32>
    %431 = vector.extract_strided_slice %405 {offsets = [40, 0], sizes = [8, 256], strides = [1, 1]} : vector<72x256xf32> to vector<8x256xf32>
    %c255_i32_123 = arith.constant 255 : i32
    %432 = tpu.dynamic_rotate %431 by %c255_i32_123 dim 1 : vector<8x256xf32>, i32 -> vector<8x256xf32>
    %c15_i32_124 = arith.constant 15 : i32
    %433 = tpu.dynamic_rotate %431 by %c15_i32_124 dim 1 : vector<8x256xf32>, i32 -> vector<8x256xf32>
    %434 = vector.shape_cast %19 : vector<1x256xi1> to vector<1x256xi1>
    %435 = vector.broadcast %434 : vector<1x256xi1> to vector<8x256xi1>
    %436 = arith.select %435, %433, %432 : vector<8x256xi1>, vector<8x256xf32>
    %437 = arith.addf %430, %436 : vector<8x256xf32>
    %438 = vector.extract_strided_slice %405 {offsets = [48, 0], sizes = [8, 256], strides = [1, 1]} : vector<72x256xf32> to vector<8x256xf32>
    %c241_i32_125 = arith.constant 241 : i32
    %439 = tpu.dynamic_rotate %438 by %c241_i32_125 dim 1 : vector<8x256xf32>, i32 -> vector<8x256xf32>
    %c225_i32_126 = arith.constant 225 : i32
    %440 = tpu.dynamic_rotate %438 by %c225_i32_126 dim 1 : vector<8x256xf32>, i32 -> vector<8x256xf32>
    %441 = vector.shape_cast %21 : vector<1x256xi1> to vector<1x256xi1>
    %442 = vector.broadcast %441 : vector<1x256xi1> to vector<8x256xi1>
    %443 = arith.select %442, %440, %439 : vector<8x256xi1>, vector<8x256xf32>
    %444 = arith.addf %437, %443 : vector<8x256xf32>
    %445 = vector.extract_strided_slice %405 {offsets = [56, 0], sizes = [8, 256], strides = [1, 1]} : vector<72x256xf32> to vector<8x256xf32>
    %c240_i32_127 = arith.constant 240 : i32
    %446 = tpu.dynamic_rotate %445 by %c240_i32_127 dim 1 : vector<8x256xf32>, i32 -> vector<8x256xf32>
    %447 = arith.addf %444, %446 : vector<8x256xf32>
    %448 = vector.extract_strided_slice %405 {offsets = [64, 0], sizes = [8, 256], strides = [1, 1]} : vector<72x256xf32> to vector<8x256xf32>
    %c239_i32_128 = arith.constant 239 : i32
    %449 = tpu.dynamic_rotate %448 by %c239_i32_128 dim 1 : vector<8x256xf32>, i32 -> vector<8x256xf32>
    %c255_i32_129 = arith.constant 255 : i32
    %450 = tpu.dynamic_rotate %448 by %c255_i32_129 dim 1 : vector<8x256xf32>, i32 -> vector<8x256xf32>
    %451 = vector.shape_cast %19 : vector<1x256xi1> to vector<1x256xi1>
    %452 = vector.broadcast %451 : vector<1x256xi1> to vector<8x256xi1>
    %453 = arith.select %452, %450, %449 : vector<8x256xi1>, vector<8x256xf32>
    %454 = arith.addf %447, %453 : vector<8x256xf32>
    %455 = vector.broadcast %348 : vector<8x1xf32> to vector<8x256xf32>
    %456 = arith.addf %454, %455 : vector<8x256xf32>
    %457 = vector.shape_cast %402 : vector<8x256xf32> to vector<1x8x256xf32>
    %458 = vector.shape_cast %456 : vector<8x256xf32> to vector<1x8x256xf32>
    %459 = tpu.concatenate %457, %458 in 0 : vector<1x8x256xf32>, vector<1x8x256xf32> -> vector<2x8x256xf32>
    %c0_130 = arith.constant 0 : index
    %c0_131 = arith.constant 0 : index
    %460 = vector.load %arg14[%c0_130, %c0_131] : memref<8x4xf32, #tpu.memory_space<vmem>>, vector<8x4xf32>
    %c0_132 = arith.constant 0 : index
    %c0_133 = arith.constant 0 : index
    %461 = vector.load %arg15[%c0_132, %c0_133] : memref<8x1xf32, #tpu.memory_space<vmem>>, vector<8x1xf32>
    %462 = vector.extract_strided_slice %0 {offsets = [0, 0, 0], sizes = [1, 4, 256], strides = [1, 1, 1]} : vector<2x4x256xf32> to vector<1x4x256xf32>
    %463 = vector.shape_cast %462 : vector<1x4x256xf32> to vector<4x256xf32>
    %cst_134 = arith.constant dense<0.000000e+00> : vector<8x256xf32>
    %464 = tpu.matmul %460, %463, %cst_134 {dimension_numbers = #tpu.dot_dimension_numbers<[1], [0], [0], [1], [0, 0, 1, 1], [], []>} : vector<8x4xf32>, vector<4x256xf32>, vector<8x256xf32> -> vector<8x256xf32>
    %465 = vector.broadcast %461 : vector<8x1xf32> to vector<8x256xf32>
    %466 = arith.addf %464, %465 : vector<8x256xf32>
    %467 = vector.extract_strided_slice %459 {offsets = [0, 0, 0], sizes = [1, 8, 256], strides = [1, 1, 1]} : vector<2x8x256xf32> to vector<1x8x256xf32>
    %468 = vector.shape_cast %467 : vector<1x8x256xf32> to vector<8x256xf32>
    %469 = arith.addf %468, %466 : vector<8x256xf32>
    %cst_135 = arith.constant 0.707106769 : f32
    %470 = vector.broadcast %cst_135 : f32 to vector<8x256xf32>
    %471 = arith.mulf %469, %470 : vector<8x256xf32>
    %c0_136 = arith.constant 0 : index
    %c0_137 = arith.constant 0 : index
    %c0_138 = arith.constant 0 : index
    %472 = vector.load %arg16[%c0_136, %c0_137, %c0_138] : memref<2x8x256xf32, #tpu.memory_space<vmem>>, vector<1x8x256xf32>
    %473 = vector.shape_cast %472 : vector<1x8x256xf32> to vector<8x256xf32>
    %474 = vector.shape_cast %471 : vector<8x256xf32> to vector<1x8x256xf32>
    tpu.vector_store %arg16[%c0_136, %c0_137, %c0_138], %474 {strides = array<i32>} : memref<2x8x256xf32, #tpu.memory_space<vmem>>, vector<1x8x256xf32>,
    %475 = vector.extract_strided_slice %0 {offsets = [1, 0, 0], sizes = [1, 4, 256], strides = [1, 1, 1]} : vector<2x4x256xf32> to vector<1x4x256xf32>
    %476 = vector.shape_cast %475 : vector<1x4x256xf32> to vector<4x256xf32>
    %cst_139 = arith.constant dense<0.000000e+00> : vector<8x256xf32>
    %477 = tpu.matmul %460, %476, %cst_139 {dimension_numbers = #tpu.dot_dimension_numbers<[1], [0], [0], [1], [0, 0, 1, 1], [], []>} : vector<8x4xf32>, vector<4x256xf32>, vector<8x256xf32> -> vector<8x256xf32>
    %478 = vector.broadcast %461 : vector<8x1xf32> to vector<8x256xf32>
    %479 = arith.addf %477, %478 : vector<8x256xf32>
    %480 = vector.extract_strided_slice %459 {offsets = [1, 0, 0], sizes = [1, 8, 256], strides = [1, 1, 1]} : vector<2x8x256xf32> to vector<1x8x256xf32>
    %481 = vector.shape_cast %480 : vector<1x8x256xf32> to vector<8x256xf32>
    %482 = arith.addf %481, %479 : vector<8x256xf32>
    %cst_140 = arith.constant 0.707106769 : f32
    %483 = vector.broadcast %cst_140 : f32 to vector<8x256xf32>
    %484 = arith.mulf %482, %483 : vector<8x256xf32>
    %c1 = arith.constant 1 : index
    %c0_141 = arith.constant 0 : index
    %c0_142 = arith.constant 0 : index
    %485 = vector.load %arg16[%c1, %c0_141, %c0_142] : memref<2x8x256xf32, #tpu.memory_space<vmem>>, vector<1x8x256xf32>
    %486 = vector.shape_cast %485 : vector<1x8x256xf32> to vector<8x256xf32>
    %487 = vector.shape_cast %484 : vector<8x256xf32> to vector<1x8x256xf32>
    tpu.vector_store %arg16[%c1, %c0_141, %c0_142], %487 {strides = array<i32>} : memref<2x8x256xf32, #tpu.memory_space<vmem>>, vector<1x8x256xf32>,
    return
  }
  func.func @transform_0(%arg0: i32) -> (i32, i32, i32) {
    %c0_i32 = arith.constant 0 : i32
    %c0_i32_0 = arith.constant 0 : i32
    %c0_i32_1 = arith.constant 0 : i32
    return %arg0, %c0_i32, %c0_i32_0 : i32, i32, i32
  }
  func.func @transform_1(%arg0: i32) -> (i32, i32) {
    %c0_i32 = arith.constant 0 : i32
    %c0_i32_0 = arith.constant 0 : i32
    %c0_i32_1 = arith.constant 0 : i32
    return %c0_i32, %c0_i32_0 : i32, i32
  }
  func.func @transform_2(%arg0: i32) -> (i32, i32) {
    %c0_i32 = arith.constant 0 : i32
    %c0_i32_0 = arith.constant 0 : i32
    %c0_i32_1 = arith.constant 0 : i32
    return %c0_i32, %c0_i32_0 : i32, i32
  }
  func.func @transform_3(%arg0: i32) -> (i32, i32) {
    %c0_i32 = arith.constant 0 : i32
    %c0_i32_0 = arith.constant 0 : i32
    %c0_i32_1 = arith.constant 0 : i32
    return %c0_i32, %c0_i32_0 : i32, i32
  }
  func.func @transform_4(%arg0: i32) -> (i32, i32) {
    %c0_i32 = arith.constant 0 : i32
    %c0_i32_0 = arith.constant 0 : i32
    %c0_i32_1 = arith.constant 0 : i32
    return %c0_i32, %c0_i32_0 : i32, i32
  }
  func.func @transform_5(%arg0: i32) -> (i32, i32) {
    %c0_i32 = arith.constant 0 : i32
    %c0_i32_0 = arith.constant 0 : i32
    %c0_i32_1 = arith.constant 0 : i32
    return %c0_i32, %c0_i32_0 : i32, i32
  }
  func.func @transform_6(%arg0: i32) -> (i32, i32) {
    %c0_i32 = arith.constant 0 : i32
    %c0_i32_0 = arith.constant 0 : i32
    %c0_i32_1 = arith.constant 0 : i32
    return %c0_i32, %c0_i32_0 : i32, i32
  }
  func.func @transform_7(%arg0: i32) -> (i32, i32) {
    %c0_i32 = arith.constant 0 : i32
    %c0_i32_0 = arith.constant 0 : i32
    %c0_i32_1 = arith.constant 0 : i32
    return %c0_i32, %c0_i32_0 : i32, i32
  }
  func.func @transform_8(%arg0: i32) -> (i32, i32) {
    %c0_i32 = arith.constant 0 : i32
    %c0_i32_0 = arith.constant 0 : i32
    %c0_i32_1 = arith.constant 0 : i32
    return %c0_i32, %c0_i32_0 : i32, i32
  }
  func.func @transform_9(%arg0: i32) -> (i32, i32) {
    %c0_i32 = arith.constant 0 : i32
    %c0_i32_0 = arith.constant 0 : i32
    %c0_i32_1 = arith.constant 0 : i32
    return %c0_i32, %c0_i32_0 : i32, i32
  }
  func.func @transform_10(%arg0: i32) -> (i32, i32) {
    %c0_i32 = arith.constant 0 : i32
    %c0_i32_0 = arith.constant 0 : i32
    %c0_i32_1 = arith.constant 0 : i32
    return %c0_i32, %c0_i32_0 : i32, i32
  }
  func.func @transform_11(%arg0: i32) -> (i32, i32) {
    %c0_i32 = arith.constant 0 : i32
    %c0_i32_0 = arith.constant 0 : i32
    %c0_i32_1 = arith.constant 0 : i32
    return %c0_i32, %c0_i32_0 : i32, i32
  }
  func.func @transform_12(%arg0: i32) -> (i32, i32) {
    %c0_i32 = arith.constant 0 : i32
    %c0_i32_0 = arith.constant 0 : i32
    %c0_i32_1 = arith.constant 0 : i32
    return %c0_i32, %c0_i32_0 : i32, i32
  }
  func.func @transform_13(%arg0: i32) -> (i32, i32) {
    %c0_i32 = arith.constant 0 : i32
    %c0_i32_0 = arith.constant 0 : i32
    %c0_i32_1 = arith.constant 0 : i32
    return %c0_i32, %c0_i32_0 : i32, i32
  }
  func.func @transform_14(%arg0: i32) -> (i32, i32) {
    %c0_i32 = arith.constant 0 : i32
    %c0_i32_0 = arith.constant 0 : i32
    %c0_i32_1 = arith.constant 0 : i32
    return %c0_i32, %c0_i32_0 : i32, i32
  }
  func.func @transform_15(%arg0: i32) -> (i32, i32, i32) {
    %c0_i32 = arith.constant 0 : i32
    %c0_i32_0 = arith.constant 0 : i32
    %c0_i32_1 = arith.constant 0 : i32
    return %arg0, %c0_i32, %c0_i32_0 : i32, i32, i32
  }
}

</mosaic_0001>

<bundles_post_ra>
// kernel: tpu_custom_call.1
= control target key start
LH: loop header
LB: loop body
LE: loop exit
PB: predicated region body
PF: predicated region fallthrough
CT: control target
= control target key end

     0   :  { %s3637_s0 = inlined_call_operand.vmem [shape: f32[2,4,256], index: 0, kind: input, shape index: {}]   ;;  %s3638_s1 = inlined_call_operand.vmem [shape: f32[4,1], index: 1, kind: input, shape index: {}]   ;;  %s3639_s2 = inlined_call_operand.vmem [shape: f32[4,1], index: 2, kind: input, shape index: {}]   ;;  %s3640_s3 = inlined_call_operand.vmem [shape: f32[72,4], index: 3, kind: input, shape index: {}]   ;;  %s3641_s4 = inlined_call_operand.vmem [shape: f32[8,1], index: 4, kind: input, shape index: {}]   ;;  %s3642_s5 = inlined_call_operand.vmem [shape: f32[8,1], index: 5, kind: input, shape index: {}]   ;;  %s3643_s6 = inlined_call_operand.vmem [shape: f32[8,1], index: 6, kind: input, shape index: {}]   ;;  %s3644_s7 = inlined_call_operand.vmem [shape: f32[72,8], index: 7, kind: input, shape index: {}]   ;;  %s3645_s8 = inlined_call_operand.vmem [shape: f32[8,1], index: 8, kind: input, shape index: {}]   ;;  %s3646_s9 = inlined_call_operand.vmem [shape: f32[8,1], index: 9, kind: input, shape index: {}]   ;;  %s3647_s10 = inlined_call_operand.vmem [shape: f32[8,1], index: 10, kind: input, shape index: {}]   ;;  %s3648_s11 = inlined_call_operand.vmem [shape: f32[72,8], index: 11, kind: input, shape index: {}]   ;;  %s3649_s12 = inlined_call_operand.vmem [shape: f32[8,1], index: 12, kind: input, shape index: {}]   ;;  %s3650_s13 = inlined_call_operand.vmem [shape: f32[8,4], index: 13, kind: input, shape index: {}]   ;;  %s3651_s14 = inlined_call_operand.vmem [shape: f32[8,1], index: 14, kind: input, shape index: {}]   ;;  %s3652_s15 = inlined_call_operand.hbm [shape: f32[2,8,256], index: 15, kind: output, shape index: {}]  }
   0x1   :  { %v2417_v0 = vld [vmem:[%s3637_s0 + $0x8] sm:$0xff]  ;;  %v2422_v1 = vld [vmem:[%s3637_s0] sm:$0xff] }
   0x2   :  { %20 = vsyncpa [#allocation3], 0  ;;  %90 = vst [vmem:[#allocation1 + $0x10] ss:$2 sm:$0xff] %v2417_v0  ;;  %v118_v2 = vmul.f32 %v2417_v0, %v2417_v0  ;;  %vm3656_vm0 = vcmask 1043456   ;;  %v117_v3 = vmul.f32 %v2422_v1, %v2422_v1  ;;  %v2319_v24 = vmov 256.0  }
   0x3   :  { %86 = vst [vmem:[#allocation1] ss:$2 sm:$0xff] %v2422_v1  ;;  %2239 = vrcp.f32 %v2319_v24  ;;  %v2320_v29 = vmov 0   ;;  %v148_v55 = vld [vmem:[%s3638_s1] sm:$0xf]  ;;  %vm3655_vm12 = vcmask 31744  }
   0x4   :  { %2237 = vset.pattern.permute.xlu0 %v2320_v29  ;;  %2236 = vset.pattern.permute.xlu2 %v2320_v29  ;;  %v173_v62 = vld [vmem:[%s3639_s2] sm:$0xf]  ;;  %s2322_s25 = smov 1   ;;  %s2324_s2 = smov 16  }
   0x5   :  { %2238 = vset.pattern.permute.xlu1 %v2320_v29  ;;  %s2326_s26 = smov 31   ;;  %s2327_s27 = smov 113  }
   0x6   :  { %s2328_s28 = smov 127   ;;  %s2329_s29 = smov 97  }
   0x7   :  { %s2330_s30 = smov 112   ;;  %s2331_s16 = smov 111  }
   0x9   :  { %v91_v4 = vld.sshfl [vmem:[#allocation1 + $0x10] sm:$0xff pattern:$0x75316420]  ;;  %v92_v5 = vld.sshfl [vmem:[#allocation1 + $0x18] sm:$0xff pattern:$0x75316420]  ;;  %v2240_v25 = vpop.eup %2239 }
   0xa   :  { %v103_v6 = vsel %vm3656_vm0, %v91_v4, 0.0  ;;  %v104_v7 = vsel %vm3656_vm0, %v92_v5, 0.0  ;;  %125 = vst [vmem:[#allocation1 + $0x10] ss:$2 sm:$0xff] %v118_v2  ;;  %v109_v26 = vmul.f32 256.0, %v2240_v25  ;;  %vm113_vm1 = vweird.f32 %v2240_v25 }
   0xb   :  { %v105_v8 = vadd.f32 %v104_v7, %v103_v6  ;;  %v87_v9 = vld.sshfl [vmem:[#allocation1] sm:$0xff pattern:$0x75316420]  ;;  %v88_v10 = vld.sshfl [vmem:[#allocation1 + $0x8] sm:$0xff pattern:$0x75316420] }
   0xc   :  { %v98_v11 = vsel %vm3656_vm0, %v87_v9, 0.0  ;;  %v99_v12 = vsel %vm3656_vm0, %v88_v10, 0.0  ;;  %121 = vst [vmem:[#allocation1] ss:$2 sm:$0xff] %v117_v3  ;;  %v110_v27 = vsub.f32 1.0, %v109_v26  ;;  %v267_v6 = vld [vmem:[%s3641_s4] sm:$0xff] }
   0xd   :  { %106 = vadd.xlane.f32.xlu1 %v105_v8  ;;  %v100_v13 = vadd.f32 %v99_v12, %v98_v11  ;;  %v2321_v7 = vmov 839922192   ;;  %s2325_s4 = smov 15  }
   0xe   :  { %v111_v28 = vmul.f32 %v2240_v25, %v110_v27  ;;  %v187_v8 = vunpack.c.l.s4 %v2321_v7 }
   0xf   :  { %101 = vadd.xlane.f32.xlu0 %v100_v13 }
  0x10   :  { %v112_v30 = vadd.f32 %v2240_v25, %v111_v28  ;;  %v188_v10 = vunpack.c.0.s8 %v187_v8 }
  0x11   :  { %v126_v14 = vld.sshfl [vmem:[#allocation1 + $0x10] sm:$0xff pattern:$0x75316420]  ;;  %v127_v15 = vld.sshfl [vmem:[#allocation1 + $0x18] sm:$0xff pattern:$0x75316420] }
  0x12   :  { %v137_v16 = vsel %vm3656_vm0, %v126_v14, 0.0  ;;  %v138_v17 = vsel %vm3656_vm0, %v127_v15, 0.0  ;;  %v2438_v32 = vsel %vm113_vm1, %v2240_v25, %v112_v30 }
  0x13   :  { %v139_v18 = vadd.f32 %v138_v17, %v137_v16  ;;  %v122_v19 = vld.sshfl [vmem:[#allocation1] sm:$0xff pattern:$0x75316420]  ;;  %v123_v20 = vld.sshfl [vmem:[#allocation1 + $0x8] sm:$0xff pattern:$0x75316420] }
  0x14   :  { %v132_v21 = vsel %vm3656_vm0, %v122_v19, 0.0  ;;  %v133_v22 = vsel %vm3656_vm0, %v123_v20, 0.0  ;;  %3664 = vst [vmem:[#allocation5_spill] sm:$0xff] %v2438_v32 }
  0x15   :  { %140 = vadd.xlane.f32.xlu1 %v139_v18  ;;  %v134_v23 = vadd.f32 %v133_v22, %v132_v21 }
  0x17   :  { %135 = vadd.xlane.f32.xlu0 %v134_v23 }
  0x80   :  { %v107_v31 = vpop.xlane.xlu1 %106 }
  0x81   :  { %v116_v34 = vmul.f32 %v2438_v32, %v107_v31 }
  0x82   :  { %v102_v33 = vpop.xlane.xlu0 %101 }
  0x83   :  { %v115_v35 = vmul.f32 %v2438_v32, %v102_v33  ;;  %v145_v37 = vmul.f32 %v116_v34, %v116_v34 }
  0x85   :  { %v144_v38 = vmul.f32 %v115_v35, %v115_v35 }
  0x88   :  { %v141_v36 = vpop.xlane.xlu1 %140 }
  0x89   :  { %v143_v39 = vmul.f32 %v141_v36, %v2438_v32 }
  0x8a   :  { %v136_v40 = vpop.xlane.xlu0 %135 }
  0x8b   :  { %v147_v41 = vsub.f32 %v143_v39, %v145_v37  ;;  %v142_v42 = vmul.f32 %v136_v40, %v2438_v32 }
  0x8d   :  { %v150_v43 = vadd.f32 1e-05, %v147_v41  ;;  %v146_v44 = vsub.f32 %v142_v42, %v144_v38  ;;  %v258_v42 = vld [vmem:[%s3640_s3] sm:$0xff] }
  0x8f   :  { %2241 = vrsqrt.f32 %v150_v43  ;;  %v149_v45 = vadd.f32 1e-05, %v146_v44  ;;  %vm167_vm3 = vweird.f32 %v150_v43 }
  0x91   :  { %2243 = vrsqrt.f32 %v149_v45  ;;  %vm157_vm6 = vweird.f32 %v149_v45 }
  0x95   :  { %v2242_v46 = vpop.eup %2241 }
  0x96   :  { %v162_v47 = vmul.f32 %v2242_v46, %v150_v43  ;;  %vm168_vm2 = vweird.f32 %v2242_v46 }
  0x97   :  { %v2244_v48 = vpop.eup %2243  ;;  %vm169_vm5 = vmor %vm167_vm3, %vm168_vm2 }
  0x98   :  { %v163_v49 = vmul.f32 %v2242_v46, %v162_v47  ;;  %v152_v50 = vmul.f32 %v2244_v48, %v149_v45  ;;  %vm158_vm4 = vweird.f32 %v2244_v48 }
  0x99   :  { %vm159_vm7 = vmor %vm157_vm6, %vm158_vm4 }
  0x9a   :  { %v164_v51 = vmul.f32 0.5, %v163_v49  ;;  %v153_v52 = vmul.f32 %v2244_v48, %v152_v50 }
  0x9c   :  { %v165_v53 = vsub.f32 1.5, %v164_v51  ;;  %v154_v54 = vmul.f32 0.5, %v153_v52  ;;  %v259_v52 = vld [vmem:[%s3640_s3 + $0x8] sm:$0xff] }
  0x9e   :  { %v166_v56 = vmul.f32 %v2242_v46, %v165_v53  ;;  %v155_v57 = vsub.f32 1.5, %v154_v54 }
  0xa0   :  { %v170_v58 = vsel %vm169_vm5, %v2242_v46, %v166_v56  ;;  %v156_v59 = vmul.f32 %v2244_v48, %v155_v57 }
  0xa1   :  { %v172_v60 = vmul.f32 %v170_v58, %v148_v55  ;;  %v261_v58 = vld [vmem:[%s3640_s3 + $0x18] sm:$0xff] }
  0xa2   :  { %v160_v61 = vsel %vm159_vm7, %v2244_v48, %v156_v59 }
  0xa3   :  { %184 = vperm.xlu0 %2237, %v172_v60   ;;  %v171_v63 = vmul.f32 %v160_v61, %v148_v55  ;;  %v175_v2 = vmul.f32 %v172_v60, %v116_v34  ;;  %v260_v55 = vld [vmem:[%s3640_s3 + $0x10] sm:$0xff] }
  0xa4   :  { %v264_v61 = vld [vmem:[%s3640_s3 + $0x30] sm:$0xff] }
  0xa5   :  { %180 = vperm.xlu2 %2236, %v171_v63   ;;  %v177_v3 = vsub.f32 %v173_v62, %v175_v2  ;;  %v174_v4 = vmul.f32 %v171_v63, %v115_v35  ;;  %v266_v63 = vld [vmem:[%s3640_s3 + $0x40] sm:$0xff] }
  0xa7   :  { %204 = vperm.xlu1 %2238, %v177_v3   ;;  %v176_v5 = vsub.f32 %v173_v62, %v174_v4  ;;  %v265_v62 = vld [vmem:[%s3640_s3 + $0x38] sm:$0xff] }
  0xad   :  { %200 = vperm.xlu2 %2236, %v176_v5  }
  0xaf   :  { %524 = vperm.xlu1 %2238, %v267_v6  }
  0xff   :  { %v181_v9 = vpop.permute.xlu2 %180 }
 0x100   :  { %v189_v11 = vperm.slane %v181_v9, %v188_v10 }
 0x102   :  { %v196_v13 = vmul.f32 %v189_v11, %v2422_v1 }
 0x107   :  { %v201_v12 = vpop.permute.xlu2 %200 }
 0x108   :  { %v209_v14 = vperm.slane %v201_v12, %v188_v10 }
 0x10a   :  { %v216_v15 = vadd.f32 %v209_v14, %v196_v13 }
 0x10c   :  { %v2091_v16 = vmul.f32 -1.442695, %v216_v15 }
 0x10e   :  { %2245 = vpow2.f32 %v2091_v16 }
 0x114   :  { %v2246_v17 = vpop.eup %2245 }
 0x115   :  { %v224_v18 = vadd.f32 1.0, %v2246_v17  ;;  %v185_v19 = vpop.permute.xlu0 %184 }
 0x116   :  { %v193_v20 = vperm.slane %v185_v19, %v188_v10 }
 0x117   :  { %2247 = vrcp.f32 %v224_v18  ;;  %v237_v29 = vand.u32 2147483648, %v224_v18  ;;  %v235_v31 = vand.u32 2147483647, %v224_v18  ;;  %vm231_vm9 = vweird.f32 %v224_v18 }
 0x118   :  { %v197_v22 = vmul.f32 %v193_v20, %v2417_v0 }
 0x119   :  { %v205_v21 = vpop.permute.xlu1 %204  ;;  %v238_v34 = vor.u32 1.1754944e-38, %v237_v29  ;;  %vm236_vm11 = vcmp.eq.f32.partialorder %v235_v31, 8.507059e+37 }
 0x11a   :  { %v213_v23 = vperm.slane %v205_v21, %v188_v10 }
 0x11c   :  { %v217_v24 = vadd.f32 %v213_v23, %v197_v22 }
 0x11d   :  { %v2248_v25 = vpop.eup %2247 }
 0x11e   :  { %v227_v26 = vmul.f32 %v2248_v25, %v224_v18  ;;  %v2092_v27 = vmul.f32 -1.442695, %v217_v24  ;;  %vm232_vm8 = vweird.f32 %v2248_v25 }
 0x11f   :  { %vm233_vm10 = vmor %vm231_vm9, %vm232_vm8 }
 0x120   :  { %v228_v28 = vsub.f32 1.0, %v227_v26  ;;  %2249 = vpow2.f32 %v2092_v27 }
 0x122   :  { %v229_v30 = vmul.f32 %v2248_v25, %v228_v28 }
 0x124   :  { %v230_v33 = vadd.f32 %v2248_v25, %v229_v30 }
 0x126   :  { %v2250_v35 = vpop.eup %2249  ;;  %v234_v36 = vsel %vm233_vm10, %v2248_v25, %v230_v33 }
 0x127   :  { %v239_v37 = vsel %vm236_vm11, %v238_v34, %v234_v36  ;;  %v225_v38 = vadd.f32 1.0, %v2250_v35  ;;  %v2580_v34 = vpop.permute.xlu1 %524 }
 0x128   :  { %v256_v39 = vmul.f32 %v239_v37, %v216_v15 }
 0x129   :  { %2251 = vrcp.f32 %v225_v38  ;;  %v252_v46 = vand.u32 2147483648, %v225_v38  ;;  %v250_v48 = vand.u32 2147483647, %v225_v38  ;;  %vm246_vm14 = vweird.f32 %v225_v38 }
 0x12a   :  { %269 = vst [vmem:[#allocation1] ss:$2 sm:$0xff] %v256_v39 }
 0x12b   :  { %v253_v50 = vor.u32 1.1754944e-38, %v252_v46  ;;  %vm251_vm1 = vcmp.eq.f32.partialorder %v250_v48, 8.507059e+37 }
 0x12f   :  { %v2252_v40 = vpop.eup %2251 }
 0x130   :  { %v242_v41 = vmul.f32 %v2252_v40, %v225_v38  ;;  %vm247_vm13 = vweird.f32 %v2252_v40 }
 0x131   :  { %v270_v43 = vld.sshfl [vmem:[#allocation1] sm:$0xff pattern:$0x75316420]  ;;  %v271_v44 = vld.sshfl [vmem:[#allocation1 + $0x8] sm:$0xff pattern:$0x75316420]  ;;  %vm248_vm15 = vmor %vm246_vm14, %vm247_vm13 }
 0x132   :  { %v243_v45 = vsub.f32 1.0, %v242_v41  ;;  %2093 = vmatpush.msk.msra.mxu0 %vm3656_vm0, %v270_v43  ;;  %2103 = vmatpush.msk.msra.mxu1 %vm3656_vm0, %v271_v44 }
 0x133   :  { %2094 = vmatmul.msk.f32.vlgmr.msra.gmra.mxu0 %vm3655_vm12, %v258_v42  ;;  %2104 = vmatmul.msk.f32.vlgmr.msra.gmra.mxu1 %vm3655_vm12, %v258_v42 }
 0x134   :  { %v244_v47 = vmul.f32 %v2252_v40, %v243_v45 }
 0x136   :  { %v245_v49 = vadd.f32 %v2252_v40, %v244_v47 }
 0x138   :  { %v249_v51 = vsel %vm248_vm15, %v2252_v40, %v245_v49 }
 0x139   :  { %v254_v53 = vsel %vm251_vm1, %v253_v50, %v249_v51 }
 0x13a   :  { %v257_v54 = vmul.f32 %v254_v53, %v217_v24 }
 0x13b   :  { %2105 = vmatmul.msk.f32.gmra.mxu1 %vm3655_vm12, %v259_v52  ;;  %2095 = vmatmul.msk.f32.gmra.mxu0 %vm3655_vm12, %v259_v52 }
 0x13c   :  { %530 = vst [vmem:[#allocation1] ss:$2 sm:$0xff] %v257_v54 }
 0x143   :  { %2096 = vmatmul.msk.f32.gmra.mxu0 %vm3655_vm12, %v260_v55  ;;  %v531_v56 = vld.sshfl [vmem:[#allocation1] sm:$0xff pattern:$0x75316420]  ;;  %v532_v57 = vld.sshfl [vmem:[#allocation1 + $0x8] sm:$0xff pattern:$0x75316420]  ;;  %2106 = vmatmul.msk.f32.gmra.mxu1 %vm3655_vm12, %v260_v55 }
 0x144   :  { %2113 = vmatpush.msk.msra.mxu2 %vm3656_vm0, %v531_v56  ;;  %2123 = vmatpush.msk.msra.mxu3 %vm3656_vm0, %v532_v57  ;;  %1963 = vst [vmem:[#allocation1] ss:$2 sm:$0xff] %v2422_v1  ;;  %v262_v1 = vld [vmem:[%s3640_s3 + $0x20] sm:$0xff] }
 0x145   :  { %2114 = vmatmul.msk.f32.vlgmr.msra.gmra.mxu2 %vm3655_vm12, %v258_v42  ;;  %2124 = vmatmul.msk.f32.vlgmr.msra.gmra.mxu3 %vm3655_vm12, %v258_v42 }
 0x14b   :  { %v2480_v59 = vld.sshfl [vmem:[#allocation1] sm:$0xff pattern:$0x75316420]  ;;  %v2482_v60 = vld.sshfl [vmem:[#allocation1 + $0x8] sm:$0xff pattern:$0x75316420]  ;;  %2097 = vmatmul.msk.f32.gmra.mxu0 %vm3655_vm12, %v261_v58  ;;  %2107 = vmatmul.msk.f32.gmra.mxu1 %vm3655_vm12, %v261_v58 }
 0x14c   :  { %3665 = vst [vmem:[#allocation6_spill] sm:$0xff] %v2480_v59 }
 0x14d   :  { %3666 = vst [vmem:[#allocation7_spill] sm:$0xff] %v2482_v60  ;;  %2115 = vmatmul.msk.f32.gmra.mxu2 %vm3655_vm12, %v259_v52  ;;  %2125 = vmatmul.msk.f32.gmra.mxu3 %vm3655_vm12, %v259_v52 }
 0x14e   :  { %2019 = vst [vmem:[#allocation1] ss:$2 sm:$0xff] %v2417_v0  ;;  %v263_v0 = vld [vmem:[%s3640_s3 + $0x28] sm:$0xff]  ;;  %s2323_s3 = smov 17  }
 0x153   :  { %2098 = vmatmul.msk.f32.gmra.mxu0 %vm3655_vm12, %v262_v1  ;;  %2108 = vmatmul.msk.f32.gmra.mxu1 %vm3655_vm12, %v262_v1 }
 0x155   :  { %2116 = vmatmul.msk.f32.gmra.mxu2 %vm3655_vm12, %v260_v55  ;;  %2126 = vmatmul.msk.f32.gmra.mxu3 %vm3655_vm12, %v260_v55 }
 0x15b   :  { %2099 = vmatmul.msk.f32.gmra.mxu0 %vm3655_vm12, %v263_v0  ;;  %2109 = vmatmul.msk.f32.gmra.mxu1 %vm3655_vm12, %v263_v0 }
 0x15d   :  { %2117 = vmatmul.msk.f32.gmra.mxu2 %vm3655_vm12, %v261_v58  ;;  %2127 = vmatmul.msk.f32.gmra.mxu3 %vm3655_vm12, %v261_v58 }
 0x163   :  { %2100 = vmatmul.msk.f32.gmra.mxu0 %vm3655_vm12, %v264_v61  ;;  %2110 = vmatmul.msk.f32.gmra.mxu1 %vm3655_vm12, %v264_v61 }
 0x165   :  { %2118 = vmatmul.msk.f32.gmra.mxu2 %vm3655_vm12, %v262_v1  ;;  %2128 = vmatmul.msk.f32.gmra.mxu3 %vm3655_vm12, %v262_v1 }
 0x16b   :  { %2101 = vmatmul.msk.f32.gmra.mxu0 %vm3655_vm12, %v265_v62  ;;  %2111 = vmatmul.msk.f32.gmra.mxu1 %vm3655_vm12, %v265_v62 }
 0x16d   :  { %2119 = vmatmul.msk.f32.gmra.mxu2 %vm3655_vm12, %v263_v0  ;;  %2129 = vmatmul.msk.f32.gmra.mxu3 %vm3655_vm12, %v263_v0 }
 0x173   :  { %2112 = vmatmul.msk.f32.gmra.mxu1 %vm3655_vm12, %v266_v63  ;;  %2102 = vmatmul.msk.f32.gmra.mxu0 %vm3655_vm12, %v266_v63 }
 0x175   :  { %2120 = vmatmul.msk.f32.gmra.mxu2 %vm3655_vm12, %v264_v61  ;;  %2130 = vmatmul.msk.f32.gmra.mxu3 %vm3655_vm12, %v264_v61 }
 0x17d   :  { %2121 = vmatmul.msk.f32.gmra.mxu2 %vm3655_vm12, %v265_v62  ;;  %2131 = vmatmul.msk.f32.gmra.mxu3 %vm3655_vm12, %v265_v62 }
 0x185   :  { %2122 = vmatmul.msk.f32.gmra.mxu2 %vm3655_vm12, %v266_v63  ;;  %2132 = vmatmul.msk.f32.gmra.mxu3 %vm3655_vm12, %v266_v63 }
 0x1b0   :  { %v321_v2 = vpop.f32.mrf.mxu0  ;;  %v365_v3 = vpop.f32.mrf.mxu1 }
 0x1b1   :  { %399 = vrot.lane.b32.xlu1 %v321_v2, %s2322_s25  ;;  %392 = vrot.lane.b32.xlu0 %v321_v2, %s2323_s3 }
 0x1b2   :  { %394 = vrot.lane.b32.xlu2 %v365_v3, %s2323_s3 }
 0x1b8   :  { %v368_v4 = vpop.f32.mrf.mxu1  ;;  %v324_v5 = vpop.f32.mrf.mxu0 }
 0x1b9   :  { %414 = vrot.lane.b32.xlu1 %v368_v4, %s2324_s2  ;;  %401 = vrot.lane.b32.xlu0 %v365_v3, %s2322_s25 }
 0x1ba   :  { %412 = vrot.lane.b32.xlu2 %v324_v5, %s2324_s2 }
 0x1c0   :  { %v327_v6 = vpop.f32.mrf.mxu0  ;;  %v371_v7 = vpop.f32.mrf.mxu1 }
 0x1c1   :  { %421 = vrot.lane.b32.xlu1 %v327_v6, %s2325_s4  ;;  %423 = vrot.lane.b32.xlu0 %v371_v7, %s2325_s4 }
 0x1c8   :  { %v554_v8 = vpop.f32.mrf.mxu2  ;;  %v598_v9 = vpop.f32.mrf.mxu3 }
 0x1c9   :  { %430 = vrot.lane.b32.xlu1 %v371_v7, %s2326_s26  ;;  %625 = vrot.lane.b32.xlu2 %v554_v8, %s2323_s3  ;;  %v330_v10 = vpop.f32.mrf.mxu0  ;;  %v374_v13 = vpop.f32.mrf.mxu1 }
 0x1ca   :  { %449 = vrot.lane.b32.xlu0 %v330_v10, %s2327_s27 }
 0x1d0   :  { %v557_v11 = vpop.f32.mrf.mxu2  ;;  %v601_v12 = vpop.f32.mrf.mxu3 }
 0x1d1   :  { %627 = vrot.lane.b32.xlu2 %v598_v9, %s2323_s3  ;;  %639 = vrot.lane.b32.xlu1 %v557_v11, %s2324_s2  ;;  %v2547_v17 = vpop.f32.mrf.mxu0  ;;  %v2552_v19 = vpop.f32.mrf.mxu1 }
 0x1d2   :  { %3667 = vst [vmem:[#allocation8_spill] sm:$0xff] %v2552_v19 }
 0x1d8   :  { %v560_v14 = vpop.f32.mrf.mxu2  ;;  %v604_v15 = vpop.f32.mrf.mxu3 }
 0x1d9   :  { %649 = vrot.lane.b32.xlu0 %v604_v15, %s2325_s4  ;;  %631 = vrot.lane.b32.xlu2 %v554_v8, %s2322_s25  ;;  %v336_v20 = vpop.f32.mrf.mxu0  ;;  %v380_v21 = vpop.f32.mrf.mxu1 }
 0x1da   :  { %445 = vrot.lane.b32.xlu1 %v374_v13, %s2322_s25 }
 0x1e0   :  { %v563_v16 = vpop.f32.mrf.mxu2  ;;  %v607_v18 = vpop.f32.mrf.mxu3 }
 0x1e1   :  { %633 = vrot.lane.b32.xlu2 %v598_v9, %s2322_s25  ;;  %663 = vrot.lane.b32.xlu0 %v563_v16, %s2322_s25  ;;  %v339_v24 = vpop.f32.mrf.mxu0  ;;  %v383_v25 = vpop.f32.mrf.mxu1 }
 0x1e2   :  { %647 = vrot.lane.b32.xlu1 %v560_v14, %s2325_s4 }
 0x1e8   :  { %v2557_v22 = vpop.f32.mrf.mxu2  ;;  %v2561_v23 = vpop.f32.mrf.mxu3 }
 0x1e9   :  { %428 = vrot.lane.b32.xlu2 %v327_v6, %s2326_s26  ;;  %671 = vrot.lane.b32.xlu0 %v607_v18, %s2327_s27  ;;  %v342_v41 = vpop.f32.mrf.mxu0  ;;  %v386_v42 = vpop.f32.mrf.mxu1 }
 0x1ea   :  { %655 = vrot.lane.b32.xlu1 %v604_v15, %s2326_s26 }
 0x1f0   :  { %v569_v26 = vpop.f32.mrf.mxu2  ;;  %v613_v27 = vpop.f32.mrf.mxu3 }
 0x1f1   :  { %641 = vrot.lane.b32.xlu2 %v601_v12, %s2324_s2  ;;  %462 = vrot.lane.b32.xlu0 %v336_v20, %s2328_s28  ;;  %v389_v46 = vpop.f32.mrf.mxu1  ;;  %v345_v49 = vpop.f32.mrf.mxu0 }
 0x1f2   :  { %669 = vrot.lane.b32.xlu1 %v563_v16, %s2327_s27  ;;  %v53_v16 = vlaneseq }
 0x1f8   :  { %v572_v28 = vpop.f32.mrf.mxu2  ;;  %v616_v29 = vpop.f32.mrf.mxu3 }
 0x1f9   :  { %443 = vrot.lane.b32.xlu2 %v330_v10, %s2322_s25  ;;  %471 = vrot.lane.b32.xlu0 %v380_v21, %s2325_s4 }
 0x1fa   :  { %469 = vrot.lane.b32.xlu1 %v336_v20, %s2325_s4 }
 0x200   :  { %v575_v31 = vpop.f32.mrf.mxu2  ;;  %v619_v35 = vpop.f32.mrf.mxu3 }
 0x201   :  { %451 = vrot.lane.b32.xlu2 %v374_v13, %s2327_s27  ;;  %485 = vrot.lane.b32.xlu0 %v339_v24, %s2329_s29 }
 0x202   :  { %481 = vrot.lane.b32.xlu1 %v383_v25, %s2327_s27 }
 0x208   :  { %v578_v36 = vpop.f32.mrf.mxu2  ;;  %v622_v40 = vpop.f32.mrf.mxu3 }
 0x209   :  { %653 = vrot.lane.b32.xlu2 %v560_v14, %s2326_s26  ;;  %687 = vrot.lane.b32.xlu0 %v569_v26, %s2325_s4 }
 0x20a   :  { %683 = vrot.lane.b32.xlu1 %v613_v27, %s2328_s28 }
 0x20c   :  { %v2570_v30 = vpop.permute.xlu2 %394 }
 0x211   :  { %665 = vrot.lane.b32.xlu2 %v607_v18, %s2322_s25  ;;  %699 = vrot.lane.b32.xlu0 %v616_v29, %s2327_s27 }
 0x212   :  { %697 = vrot.lane.b32.xlu1 %v572_v28, %s2327_s27 }
 0x214   :  { %v2577_v33 = vpop.permute.xlu2 %412 }
 0x219   :  { %464 = vrot.lane.b32.xlu2 %v380_v21, %s2328_s28  ;;  %713 = vrot.lane.b32.xlu0 %v575_v31, %s2330_s30  ;;  %v2650_v21 = vand.u32 127, %v53_v16 }
 0x21a   :  { %705 = vrot.lane.b32.xlu1 %v616_v29, %s2329_s29 }
 0x21b   :  { %vm403_vm2 = vcmp.lt.s32.totalorder %v2650_v21, 1  ;;  %vm396_vm3 = vcmp.lt.s32.totalorder %v2650_v21, 17  ;;  %vm416_vm4 = vcmp.lt.s32.totalorder %v2650_v21, 16  ;;  %vm3663_vm7 = vcmp.lt.s32.totalorder %v2650_v21, 15 }
 0x21c   :  { %vm3662_vm10 = vcmp.lt.s32.totalorder %v2650_v21, 31  ;;  %vm3661_vm11 = vcmp.lt.s32.totalorder %v2650_v21, 113  ;;  %vm3660_vm13 = vcmp.lt.s32.totalorder %v2650_v21, 127  ;;  %vm3659_vm14 = vcmp.lt.s32.totalorder %v2650_v21, 97 }
 0x21d   :  { %vm3658_vm15 = vcmp.lt.s32.totalorder %v2650_v21, 112  ;;  %vm3657_vm1 = vcmp.lt.s32.totalorder %v2650_v21, 111 }
 0x221   :  { %479 = vrot.lane.b32.xlu2 %v339_v24, %s2327_s27  ;;  %721 = vrot.lane.b32.xlu0 %v578_v36, %s2331_s16  ;;  %v55_v24 = vadd.s32 128, %v2650_v21 }
 0x222   :  { %727 = vrot.lane.b32.xlu1 %v578_v36, %s2328_s28 }
 0x223   :  { %v2585_v37 = vpop.permute.xlu1 %399  ;;  %v2587_v38 = vpop.permute.xlu2 %625 }
 0x224   :  { %v2589_v39 = vpop.permute.xlu0 %392 }
 0x229   :  { %487 = vrot.lane.b32.xlu2 %v383_v25, %s2329_s29  ;;  %729 = vrot.lane.b32.xlu0 %v622_v40, %s2328_s28 }
 0x22a   :  { %496 = vrot.lane.b32.xlu1 %v342_v41, %s2330_s30 }
 0x22b   :  { %v2594_v43 = vpop.permute.xlu1 %414  ;;  %v2596_v44 = vpop.permute.xlu2 %627 }
 0x22c   :  { %v2598_v45 = vpop.permute.xlu0 %401  ;;  %v630_v16 = vsel %vm396_vm3, %v2596_v44, %v2587_v38 }
 0x22d   :  { %v2683_v41 = vsel %vm403_vm2, %v2585_v37, %v2598_v45 }
 0x231   :  { %681 = vrot.lane.b32.xlu2 %v569_v26, %s2328_s28  ;;  %498 = vrot.lane.b32.xlu0 %v386_v42, %s2330_s30  ;;  %v60_v26 = vand.u32 15, %v2650_v21  ;;  %v629_v42 = vsel %vm396_vm3, %v2587_v38, %v2596_v44 }
 0x232   :  { %507 = vrot.lane.b32.xlu1 %v389_v46, %s2331_s16 }
 0x233   :  { %v2603_v47 = vpop.permute.xlu1 %421  ;;  %v632_v48 = vpop.permute.xlu2 %631  ;;  %vm2661_vm5 = vcmp.lt.s32.totalorder %v60_v26, 1  ;;  %vm2670_vm8 = vcmp.ge.s32.totalorder %v60_v26, 15 }
 0x234   :  { %v2605_v50 = vpop.permute.xlu0 %423 }
 0x239   :  { %689 = vrot.lane.b32.xlu2 %v613_v27, %s2325_s4  ;;  %512 = vrot.lane.b32.xlu0 %v345_v49, %s2328_s28  ;;  %v67_v27 = vand.u32 15, %v55_v24 }
 0x23b   :  { %v2609_v51 = vpop.permute.xlu1 %430  ;;  %v634_v52 = vpop.permute.xlu2 %633  ;;  %vm2665_vm6 = vcmp.lt.s32.totalorder %v67_v27, 1  ;;  %vm2674_vm9 = vcmp.ge.s32.totalorder %v67_v27, 15 }
 0x23c   :  { %v2612_v53 = vpop.permute.xlu0 %449  ;;  %v635_v24 = vsel %vm403_vm2, %v632_v48, %v634_v52 }
 0x241   :  { %703 = vrot.lane.b32.xlu2 %v572_v28, %s2329_s29 }
 0x243   :  { %v2614_v54 = vpop.permute.xlu2 %428  ;;  %v640_v55 = vpop.permute.xlu1 %639 }
 0x249   :  { %715 = vrot.lane.b32.xlu2 %v619_v35, %s2330_s30 }
 0x24b   :  { %v650_v56 = vpop.permute.xlu0 %649  ;;  %v642_v57 = vpop.permute.xlu2 %641 }
 0x24c   :  { %v2617_v58 = vpop.permute.xlu1 %445  ;;  %v644_v26 = vsel %vm416_vm4, %v642_v57, %v640_v55  ;;  %v643_v60 = vsel %vm416_vm4, %v640_v55, %v642_v57  ;;  %v638_v57 = vsel %vm2665_vm6, %v635_v24, %v629_v42 }
 0x251   :  { %723 = vrot.lane.b32.xlu2 %v622_v40, %s2331_s16 }
 0x253   :  { %v664_v1 = vpop.permute.xlu0 %663  ;;  %v2620_v0 = vpop.permute.xlu2 %443 }
 0x254   :  { %v648_v61 = vpop.permute.xlu1 %647 }
 0x255   :  { %v652_v59 = vsel %vm3663_vm7, %v650_v56, %v648_v61 }
 0x259   :  { %505 = vrot.lane.b32.xlu2 %v345_v49, %s2331_s16 }
 0x25b   :  { %v672_v62 = vpop.permute.xlu0 %671  ;;  %v2623_v63 = vpop.permute.xlu2 %451 }
 0x25c   :  { %v656_v2 = vpop.permute.xlu1 %655 }
 0x261   :  { %514 = vrot.lane.b32.xlu2 %v389_v46, %s2328_s28  ;;  %v636_v46 = vsel %vm403_vm2, %v634_v52, %v632_v48  ;;  %v651_v52 = vsel %vm3663_vm7, %v648_v61, %v650_v56  ;;  %v646_v56 = vadd.f32 %v643_v60, %v638_v57  ;;  %v398_v60 = vsel %vm396_vm3, %v2570_v30, %v2589_v39 }
 0x262   :  { %v637_v48 = vsel %vm2661_vm5, %v636_v46, %v630_v16 }
 0x263   :  { %v2626_v3 = vpop.permute.xlu0 %462  ;;  %v654_v4 = vpop.permute.xlu2 %653 }
 0x264   :  { %v670_v7 = vpop.permute.xlu1 %669  ;;  %v658_v49 = vsel %vm3662_vm10, %v656_v2, %v654_v4  ;;  %v657_v27 = vsel %vm3662_vm10, %v654_v4, %v656_v2  ;;  %v645_v4 = vadd.f32 %v644_v26, %v637_v48 }
 0x265   :  { %v659_v2 = vsel %vm2670_vm8, %v658_v49, %v652_v59  ;;  %v660_v32 = vsel %vm2674_vm9, %v657_v27, %v651_v52  ;;  %v673_v19 = vsel %vm3661_vm11, %v670_v7, %v672_v62  ;;  %v405_v59 = vsel %vm403_vm2, %v2598_v45, %v2585_v37 }
 0x266   :  { %v397_v49 = vsel %vm396_vm3, %v2589_v39, %v2570_v30  ;;  %v417_v37 = vsel %vm416_vm4, %v2577_v33, %v2594_v43  ;;  %v418_v45 = vsel %vm416_vm4, %v2594_v43, %v2577_v33  ;;  %v426_v30 = vsel %vm3663_vm7, %v2603_v47, %v2605_v50 }
 0x267   :  { %v427_v43 = vsel %vm3663_vm7, %v2605_v50, %v2603_v47  ;;  %v434_v27 = vsel %vm3662_vm10, %v2609_v51, %v2614_v54 }
 0x26b   :  { %v666_v5 = vpop.permute.xlu2 %665  ;;  %v2628_v6 = vpop.permute.xlu0 %471 }
 0x26c   :  { %v2632_v9 = vpop.permute.xlu1 %469  ;;  %v668_v38 = vsel %vm403_vm2, %v666_v5, %v664_v1  ;;  %v667_v55 = vsel %vm403_vm2, %v664_v1, %v666_v5  ;;  %v674_v1 = vsel %vm3661_vm11, %v672_v62, %v670_v7  ;;  %v661_v5 = vadd.f32 %v659_v2, %v645_v4 }
 0x26d   :  { %v675_v61 = vsel %vm2661_vm5, %v673_v19, %v668_v38  ;;  %v676_v42 = vsel %vm2665_vm6, %v674_v1, %v667_v55  ;;  %v662_v19 = vadd.f32 %v660_v32, %v646_v56  ;;  %v410_v62 = vsel %vm2661_vm5, %v405_v59, %v398_v60 }
 0x26e   :  { %v411_v7 = vsel %vm2665_vm6, %v2683_v41, %v397_v49  ;;  %v677_v24 = vadd.f32 %v675_v61, %v661_v5  ;;  %v433_v41 = vsel %vm3662_vm10, %v2614_v54, %v2609_v51  ;;  %v439_v4 = vsel %vm2670_vm8, %v434_v27, %v427_v43 }
 0x26f   :  { %v678_v39 = vadd.f32 %v676_v42, %v662_v19  ;;  %v420_v57 = vadd.f32 %v417_v37, %v411_v7  ;;  %v454_v56 = vsel %vm3661_vm11, %v2612_v53, %v2623_v63  ;;  %v455_v1 = vsel %vm3661_vm11, %v2623_v63, %v2612_v53 }
 0x270   :  { %v679_v38 = vadd.f32 %v677_v24, %v2557_v22  ;;  %v419_v22 = vadd.f32 %v418_v45, %v410_v62  ;;  %v447_v42 = vsel %vm403_vm2, %v2620_v0, %v2617_v58 }
 0x271   :  { %v680_v51 = vadd.f32 %v678_v39, %v2561_v23  ;;  %v440_v23 = vsel %vm2674_vm9, %v433_v41, %v426_v30 }
 0x272   :  { %v441_v24 = vadd.f32 %v439_v4, %v419_v22  ;;  %v442_v30 = vadd.f32 %v440_v23, %v420_v57 }
 0x273   :  { %v2630_v8 = vpop.permute.xlu2 %464  ;;  %v2634_v10 = vpop.permute.xlu0 %485 }
 0x274   :  { %v2638_v12 = vpop.permute.xlu1 %481 }
 0x27b   :  { %v2636_v11 = vpop.permute.xlu2 %479  ;;  %v2640_v13 = vpop.permute.xlu0 %687 }
 0x27c   :  { %v2644_v15 = vpop.permute.xlu1 %683  ;;  %v484_v22 = vsel %vm3661_vm11, %v2638_v12, %v2636_v11 }
 0x283   :  { %v2642_v14 = vpop.permute.xlu2 %487  ;;  %v2646_v18 = vpop.permute.xlu0 %699 }
 0x284   :  { %v2653_v25 = vpop.permute.xlu1 %697 }
 0x28b   :  { %v2648_v20 = vpop.permute.xlu2 %681  ;;  %v2656_v28 = vpop.permute.xlu0 %713 }
 0x28c   :  { %v706_v46 = vpop.permute.xlu1 %705  ;;  %v686_v47 = vsel %vm3660_vm13, %v2644_v15, %v2648_v20 }
 0x293   :  { %v690_v29 = vpop.permute.xlu2 %689  ;;  %v722_v16 = vpop.permute.xlu0 %721 }
 0x294   :  { %v691_v32 = vsel %vm3663_vm7, %v2640_v13, %v690_v29  ;;  %v692_v33 = vsel %vm3663_vm7, %v690_v29, %v2640_v13  ;;  %v685_v13 = vsel %vm3660_vm13, %v2648_v20, %v2644_v15  ;;  %v701_v15 = vsel %vm3661_vm11, %v2653_v25, %v2646_v18  ;;  %v728_v2 = vpop.permute.xlu1 %727 }
 0x295   :  { %v693_v48 = vsel %vm2670_vm8, %v692_v33, %v685_v13  ;;  %v694_v52 = vsel %vm2674_vm9, %v691_v32, %v686_v47  ;;  %v702_v20 = vsel %vm3661_vm11, %v2646_v18, %v2653_v25  ;;  %v468_v13 = vsel %vm3660_vm13, %v2630_v8, %v2626_v3 }
 0x296   :  { %v696_v59 = vadd.f32 %v694_v52, %v680_v51  ;;  %v473_v47 = vsel %vm3663_vm7, %v2632_v9, %v2628_v6  ;;  %v483_v51 = vsel %vm3661_vm11, %v2636_v11, %v2638_v12 }
 0x29b   :  { %v704_v44 = vpop.permute.xlu2 %703  ;;  %v730_v55 = vpop.permute.xlu0 %729 }
 0x29c   :  { %v707_v50 = vsel %vm3659_vm14, %v704_v44, %v706_v46  ;;  %v708_v29 = vsel %vm3659_vm14, %v706_v46, %v704_v44  ;;  %v695_v46 = vadd.f32 %v693_v48, %v679_v38  ;;  %v731_v49 = vsel %vm3660_vm13, %v728_v2, %v730_v55 }
 0x29d   :  { %v709_v54 = vsel %vm2661_vm5, %v707_v50, %v701_v15  ;;  %v710_v44 = vsel %vm2665_vm6, %v708_v29, %v702_v20  ;;  %v732_v60 = vsel %vm3660_vm13, %v730_v55, %v728_v2  ;;  %v474_v50 = vsel %vm3663_vm7, %v2628_v6, %v2632_v9  ;;  %v497_v29 = vpop.permute.xlu1 %496 }
 0x29e   :  { %v711_v61 = vadd.f32 %v709_v54, %v695_v46  ;;  %v712_v5 = vadd.f32 %v710_v44, %v696_v59  ;;  %v491_v6 = vsel %vm3659_vm14, %v2642_v14, %v2634_v10  ;;  %v476_v15 = vsel %vm2674_vm9, %v473_v47, %v468_v13 }
 0x29f   :  { %v493_v2 = vsel %vm2665_vm6, %v491_v6, %v484_v22  ;;  %v763_v6 = vld [vmem:[%s3642_s5] sm:$0xff] }
 0x2a3   :  { %v716_v26 = vpop.permute.xlu2 %715  ;;  %v499_v27 = vpop.permute.xlu0 %498 }
 0x2a4   :  { %v717_v18 = vsel %vm3658_vm15, %v2656_v28, %v716_v26  ;;  %v718_v25 = vsel %vm3658_vm15, %v716_v26, %v2656_v28  ;;  %v448_v28 = vsel %vm403_vm2, %v2617_v58, %v2620_v0  ;;  %v457_v58 = vsel %vm2665_vm6, %v455_v1, %v447_v42 }
 0x2a5   :  { %v719_v53 = vadd.f32 %v717_v18, %v711_v61  ;;  %v720_v63 = vadd.f32 %v718_v25, %v712_v5  ;;  %v456_v62 = vsel %vm2661_vm5, %v454_v56, %v448_v28  ;;  %v459_v43 = vadd.f32 %v457_v58, %v442_v30 }
 0x2a6   :  { %v458_v33 = vadd.f32 %v456_v62, %v441_v24  ;;  %v467_v26 = vsel %vm3660_vm13, %v2626_v3, %v2630_v8  ;;  %v490_v8 = vsel %vm3659_vm14, %v2634_v10, %v2642_v14  ;;  %v3676_v14 = vld [vmem:[#allocation8_spill] sm:$0xff]  ;;  %v501_v4 = vsel %vm3658_vm15, %v497_v29, %v499_v27 }
 0x2a7   :  { %v475_v52 = vsel %vm2670_vm8, %v474_v50, %v467_v26  ;;  %v461_v54 = vadd.f32 %v459_v43, %v3676_v14  ;;  %v492_v44 = vsel %vm2661_vm5, %v490_v8, %v483_v51  ;;  %v502_v46 = vsel %vm3658_vm15, %v499_v27, %v497_v29 }
 0x2a8   :  { %v460_v10 = vadd.f32 %v458_v33, %v2547_v17  ;;  %v508_v17 = vpop.permute.xlu1 %507 }
 0x2a9   :  { %v478_v57 = vadd.f32 %v476_v15, %v461_v54 }
 0x2aa   :  { %v477_v55 = vadd.f32 %v475_v52, %v460_v10 }
 0x2ab   :  { %v724_v37 = vpop.permute.xlu2 %723  ;;  %v495_v12 = vadd.f32 %v493_v2, %v478_v57  ;;  %v513_v59 = vpop.permute.xlu0 %512 }
 0x2ac   :  { %v725_v19 = vsel %vm3657_vm1, %v722_v16, %v724_v37  ;;  %v726_v45 = vsel %vm3657_vm1, %v724_v37, %v722_v16  ;;  %v494_v11 = vadd.f32 %v492_v44, %v477_v55 }
 0x2ad   :  { %v733_v0 = vsel %vm2670_vm8, %v731_v49, %v725_v19  ;;  %v734_v7 = vsel %vm2674_vm9, %v732_v60, %v726_v45  ;;  %v504_v18 = vadd.f32 %v502_v46, %v495_v12  ;;  %v910_v12 = vld [vmem:[%s3645_s8] sm:$0xff] }
 0x2ae   :  { %v735_v39 = vadd.f32 %v733_v0, %v719_v53  ;;  %v736_v32 = vadd.f32 %v734_v7, %v720_v63  ;;  %v503_v23 = vadd.f32 %v501_v4, %v494_v11  ;;  %v3677_v0 = vld [vmem:[#allocation5_spill] sm:$0xff] }
 0x2b0   :  { %v2854_v16 = vadd.f32 %v735_v39, %v2580_v34  ;;  %v2857_v41 = vadd.f32 %v736_v32, %v2580_v34 }
 0x2b2   :  { %v742_v38 = vadd.f32 %v2857_v41, %v2854_v16  ;;  %v749_v48 = vmul.f32 %v2854_v16, %v2854_v16  ;;  %v750_v3 = vmul.f32 %v2857_v41, %v2857_v41 }
 0x2b3   :  { %v506_v9 = vpop.permute.xlu2 %505 }
 0x2b4   :  { %743 = vadd.xlane.f32.xlu1 %v742_v38  ;;  %v754_v20 = vadd.f32 %v750_v3, %v749_v48  ;;  %v510_v56 = vsel %vm3657_vm1, %v506_v9, %v508_v17  ;;  %v511_v1 = vsel %vm3657_vm1, %v508_v17, %v506_v9 }
 0x2b6   :  { %755 = vadd.xlane.f32.xlu0 %v754_v20  ;;  %v788_v20 = vld [vmem:[%s3643_s6] sm:$0xff] }
 0x2bb   :  { %v515_v25 = vpop.permute.xlu2 %514 }
 0x2bc   :  { %v516_v61 = vsel %vm3660_vm13, %v513_v59, %v515_v25  ;;  %v517_v5 = vsel %vm3660_vm13, %v515_v25, %v513_v59 }
 0x2bd   :  { %v518_v42 = vsel %vm2670_vm8, %v516_v61, %v510_v56  ;;  %v519_v28 = vsel %vm2674_vm9, %v517_v5, %v511_v1 }
 0x2be   :  { %v520_v49 = vadd.f32 %v518_v42, %v503_v23  ;;  %v521_v60 = vadd.f32 %v519_v28, %v504_v18 }
 0x2c0   :  { %v2924_v37 = vadd.f32 %v2580_v34, %v520_v49  ;;  %v2927_v53 = vadd.f32 %v2580_v34, %v521_v60 }
 0x2c2   :  { %v739_v63 = vadd.f32 %v2927_v53, %v2924_v37  ;;  %v747_v19 = vmul.f32 %v2924_v37, %v2924_v37  ;;  %v748_v45 = vmul.f32 %v2927_v53, %v2927_v53 }
 0x2c4   :  { %740 = vadd.xlane.f32.xlu2 %v739_v63  ;;  %v751_v62 = vadd.f32 %v748_v45, %v747_v19 }
 0x2c6   :  { %752 = vadd.xlane.f32.xlu1 %v751_v62 }
 0x327   :  { %v744_v58 = vpop.xlane.xlu1 %743 }
 0x328   :  { %v746_v7 = vmul.f32 %v744_v58, %v3677_v0 }
 0x329   :  { %v756_v24 = vpop.xlane.xlu0 %755 }
 0x32a   :  { %v760_v30 = vmul.f32 %v746_v7, %v746_v7  ;;  %v758_v34 = vmul.f32 %v756_v24, %v3677_v0 }
 0x32c   :  { %v762_v39 = vsub.f32 %v758_v34, %v760_v30 }
 0x32e   :  { %v765_v32 = vadd.f32 1e-05, %v762_v39 }
 0x330   :  { %2253 = vrsqrt.f32 %v765_v32  ;;  %vm782_vm0 = vweird.f32 %v765_v32 }
 0x336   :  { %v2254_v33 = vpop.eup %2253 }
 0x337   :  { %v777_v43 = vmul.f32 %v2254_v33, %v765_v32  ;;  %v741_v26 = vpop.xlane.xlu2 %740  ;;  %vm783_vm12 = vweird.f32 %v2254_v33 }
 0x338   :  { %v745_v13 = vmul.f32 %v741_v26, %v3677_v0  ;;  %vm784_vm1 = vmor %vm782_vm0, %vm783_vm12 }
 0x339   :  { %v778_v47 = vmul.f32 %v2254_v33, %v777_v43  ;;  %v753_v50 = vpop.xlane.xlu1 %752 }
 0x33a   :  { %v759_v29 = vmul.f32 %v745_v13, %v745_v13  ;;  %v757_v27 = vmul.f32 %v753_v50, %v3677_v0 }
 0x33b   :  { %v779_v38 = vmul.f32 0.5, %v778_v47 }
 0x33c   :  { %v761_v48 = vsub.f32 %v757_v27, %v759_v29 }
 0x33d   :  { %v780_v3 = vsub.f32 1.5, %v779_v38 }
 0x33e   :  { %v764_v8 = vadd.f32 1e-05, %v761_v48 }
 0x33f   :  { %v781_v9 = vmul.f32 %v2254_v33, %v780_v3 }
 0x340   :  { %2255 = vrsqrt.f32 %v764_v8  ;;  %vm772_vm14 = vweird.f32 %v764_v8 }
 0x341   :  { %v785_v52 = vsel %vm784_vm1, %v2254_v33, %v781_v9 }
 0x342   :  { %v787_v15 = vmul.f32 %v785_v52, %v763_v6 }
 0x344   :  { %800 = vperm.xlu2 %2236, %v787_v15   ;;  %v790_v51 = vmul.f32 %v787_v15, %v746_v7 }
 0x346   :  { %v2256_v22 = vpop.eup %2255  ;;  %v792_v10 = vsub.f32 %v788_v20, %v790_v51 }
 0x347   :  { %v767_v14 = vmul.f32 %v2256_v22, %v764_v8  ;;  %vm773_vm15 = vweird.f32 %v2256_v22 }
 0x348   :  { %814 = vperm.xlu0 %2237, %v792_v10   ;;  %vm774_vm13 = vmor %vm772_vm14, %vm773_vm15 }
 0x349   :  { %v768_v54 = vmul.f32 %v2256_v22, %v767_v14 }
 0x34b   :  { %v769_v44 = vmul.f32 0.5, %v768_v54 }
 0x34d   :  { %v770_v2 = vsub.f32 1.5, %v769_v44 }
 0x34f   :  { %v771_v55 = vmul.f32 %v2256_v22, %v770_v2 }
 0x351   :  { %v775_v57 = vsel %vm774_vm13, %v2256_v22, %v771_v55  ;;  %v901_v22 = vld [vmem:[%s3644_s7] sm:$0xff] }
 0x352   :  { %v786_v4 = vmul.f32 %v775_v57, %v763_v6 }
 0x354   :  { %795 = vperm.xlu1 %2238, %v786_v4   ;;  %v789_v46 = vmul.f32 %v786_v4, %v745_v13 }
 0x356   :  { %v791_v11 = vsub.f32 %v788_v20, %v789_v46 }
 0x358   :  { %809 = vperm.xlu0 %2237, %v791_v11  }
 0x360   :  { %1141 = vperm.xlu0 %2237, %v910_v12   ;;  %v902_v12 = vld [vmem:[%s3644_s7 + $0x8] sm:$0xff] }
 0x39e   :  { %v801_v17 = vpop.permute.xlu2 %800 }
 0x39f   :  { %v805_v59 = vmul.f32 %v801_v17, %v2854_v16  ;;  %v806_v23 = vmul.f32 %v801_v17, %v2857_v41 }
 0x3ba   :  { %v815_v18 = vpop.permute.xlu0 %814 }
 0x3bb   :  { %v819_v25 = vadd.f32 %v815_v18, %v805_v59  ;;  %v820_v56 = vadd.f32 %v815_v18, %v806_v23 }
 0x3bd   :  { %v2135_v1 = vmul.f32 -1.442695, %v819_v25  ;;  %v2136_v61 = vmul.f32 -1.442695, %v820_v56 }
 0x3bf   :  { %2257 = vpow2.f32 %v2135_v1 }
 0x3c0   :  { %2259 = vpow2.f32 %v2136_v61 }
 0x3c5   :  { %v2258_v5 = vpop.eup %2257 }
 0x3c6   :  { %v2260_v42 = vpop.eup %2259  ;;  %v835_v28 = vadd.f32 1.0, %v2258_v5  ;;  %v796_v49 = vpop.permute.xlu1 %795 }
 0x3c7   :  { %v836_v60 = vadd.f32 1.0, %v2260_v42  ;;  %v803_v63 = vmul.f32 %v796_v49, %v2924_v37  ;;  %v804_v16 = vmul.f32 %v796_v49, %v2927_v53 }
 0x3c8   :  { %2261 = vrcp.f32 %v835_v28  ;;  %v878_v32 = vand.u32 2147483648, %v835_v28  ;;  %v876_v53 = vand.u32 2147483647, %v835_v28  ;;  %vm872_vm13 = vweird.f32 %v835_v28 }
 0x3c9   :  { %2263 = vrcp.f32 %v836_v60  ;;  %v893_v43 = vand.u32 2147483648, %v836_v60  ;;  %v891_v13 = vand.u32 2147483647, %v836_v60  ;;  %vm887_vm15 = vweird.f32 %v836_v60 }
 0x3ca   :  { %v810_v19 = vpop.permute.xlu0 %809  ;;  %v879_v38 = vor.u32 1.1754944e-38, %v878_v32  ;;  %vm877_vm1 = vcmp.eq.f32.partialorder %v876_v53, 8.507059e+37 }
 0x3cb   :  { %v2952_v41 = vadd.f32 %v810_v19, %v803_v63  ;;  %v2954_v45 = vadd.f32 %v810_v19, %v804_v16  ;;  %v894_v6 = vor.u32 1.1754944e-38, %v893_v43  ;;  %vm892_vm10 = vcmp.eq.f32.partialorder %v891_v13, 8.507059e+37  ;;  %v904_v63 = vld [vmem:[%s3644_s7 + $0x18] sm:$0xff]  ;;  %v905_v16 = vld [vmem:[%s3644_s7 + $0x20] sm:$0xff]  ;;  %v906_v19 = vld [vmem:[%s3644_s7 + $0x28] sm:$0xff] }
 0x3cd   :  { %v2133_v62 = vmul.f32 -1.442695, %v2952_v41  ;;  %v2134_v58 = vmul.f32 -1.442695, %v2954_v45 }
 0x3ce   :  { %v2262_v7 = vpop.eup %2261 }
 0x3cf   :  { %v2264_v24 = vpop.eup %2263  ;;  %2265 = vpow2.f32 %v2133_v62  ;;  %v868_v30 = vmul.f32 %v2262_v7, %v835_v28  ;;  %vm873_vm0 = vweird.f32 %v2262_v7  ;;  %v909_v62 = vld [vmem:[%s3644_s7 + $0x40] sm:$0xff] }
 0x3d0   :  { %2267 = vpow2.f32 %v2134_v58  ;;  %v883_v34 = vmul.f32 %v2264_v24, %v836_v60  ;;  %vm888_vm12 = vweird.f32 %v2264_v24  ;;  %vm874_vm14 = vmor %vm872_vm13, %vm873_vm0  ;;  %vm911_vm0 = vcmask 64512   ;;  %v903_v60 = vld [vmem:[%s3644_s7 + $0x10] sm:$0xff] }
 0x3d1   :  { %v869_v39 = vsub.f32 1.0, %v868_v30  ;;  %vm889_vm11 = vmor %vm887_vm15, %vm888_vm12 }
 0x3d2   :  { %v884_v37 = vsub.f32 1.0, %v883_v34 }
 0x3d3   :  { %v870_v33 = vmul.f32 %v2262_v7, %v869_v39 }
 0x3d4   :  { %v885_v26 = vmul.f32 %v2264_v24, %v884_v37 }
 0x3d5   :  { %v2266_v47 = vpop.eup %2265  ;;  %v871_v50 = vadd.f32 %v2262_v7, %v870_v33 }
 0x3d6   :  { %v2268_v29 = vpop.eup %2267  ;;  %v833_v27 = vadd.f32 1.0, %v2266_v47  ;;  %v886_v48 = vadd.f32 %v2264_v24, %v885_v26 }
 0x3d7   :  { %v834_v3 = vadd.f32 1.0, %v2268_v29  ;;  %v875_v8 = vsel %vm874_vm14, %v2262_v7, %v871_v50 }
 0x3d8   :  { %2269 = vrcp.f32 %v833_v27  ;;  %v880_v9 = vsel %vm877_vm1, %v879_v38, %v875_v8  ;;  %v890_v52 = vsel %vm889_vm11, %v2264_v24, %v886_v48  ;;  %v848_v55 = vand.u32 2147483648, %v833_v27 }
 0x3d9   :  { %2271 = vrcp.f32 %v834_v3  ;;  %v899_v15 = vmul.f32 %v880_v9, %v819_v25  ;;  %v895_v20 = vsel %vm892_vm10, %v894_v6, %v890_v52  ;;  %v846_v46 = vand.u32 2147483647, %v833_v27 }
 0x3da   :  { %v900_v51 = vmul.f32 %v895_v20, %v820_v56  ;;  %v863_v11 = vand.u32 2147483648, %v834_v3  ;;  %v861_v59 = vand.u32 2147483647, %v834_v3  ;;  %vm842_vm12 = vweird.f32 %v833_v27 }
 0x3db   :  { %1161 = vmatpush.msrb.mxu2 %v899_v15  ;;  %v849_v18 = vor.u32 1.1754944e-38, %v848_v55  ;;  %vm857_vm14 = vweird.f32 %v834_v3  ;;  %vm847_vm15 = vcmp.eq.f32.partialorder %v846_v46, 8.507059e+37 }
 0x3dc   :  { %1205 = vmatpush.msrb.mxu3 %v900_v51  ;;  %2155 = vmatmul.msk.f32.vlgmr.msrb.gmra.mxu2 %vm911_vm0, %v901_v22  ;;  %v864_v1 = vor.u32 1.1754944e-38, %v863_v11  ;;  %vm862_vm7 = vcmp.eq.f32.partialorder %v861_v59, 8.507059e+37 }
 0x3dd   :  { %2164 = vmatmul.msk.f32.vlgmr.msrb.gmra.mxu3 %vm911_vm0, %v901_v22 }
 0x3de   :  { %v2270_v10 = vpop.eup %2269 }
 0x3df   :  { %v2272_v14 = vpop.eup %2271  ;;  %v838_v54 = vmul.f32 %v2270_v10, %v833_v27  ;;  %vm843_vm10 = vweird.f32 %v2270_v10 }
 0x3e0   :  { %v853_v44 = vmul.f32 %v2272_v14, %v834_v3  ;;  %vm858_vm11 = vweird.f32 %v2272_v14  ;;  %vm844_vm13 = vmor %vm842_vm12, %vm843_vm10 }
 0x3e1   :  { %v839_v2 = vsub.f32 1.0, %v838_v54  ;;  %vm859_vm1 = vmor %vm857_vm14, %vm858_vm11  ;;  %vm3680_vm11 = vcmp.lt.s32.totalorder %v2650_v21, 31 }
 0x3e2   :  { %v854_v57 = vsub.f32 1.0, %v853_v44  ;;  %vm3681_vm12 = vmmov %vm3680_vm11 }
 0x3e3   :  { %v840_v4 = vmul.f32 %v2270_v10, %v839_v2  ;;  %v3073_v2 = vpop.permute.xlu0 %1141 }
 0x3e4   :  { %v855_v17 = vmul.f32 %v2272_v14, %v854_v57  ;;  %2156 = vmatmul.msk.f32.gmra.mxu2 %vm911_vm0, %v902_v12 }
 0x3e5   :  { %v841_v23 = vadd.f32 %v2270_v10, %v840_v4  ;;  %2165 = vmatmul.msk.f32.gmra.mxu3 %vm911_vm0, %v902_v12 }
 0x3e6   :  { %v856_v25 = vadd.f32 %v2272_v14, %v855_v17 }
 0x3e7   :  { %v845_v56 = vsel %vm844_vm13, %v2270_v10, %v841_v23  ;;  %vm3682_vm13 = vcmp.lt.s32.totalorder %v2650_v21, 113 }
 0x3e8   :  { %v850_v61 = vsel %vm847_vm15, %v849_v18, %v845_v56  ;;  %v860_v5 = vsel %vm859_vm1, %v2272_v14, %v856_v25  ;;  %vm3683_vm14 = vmmov %vm3682_vm13 }
 0x3e9   :  { %v897_v42 = vmul.f32 %v850_v61, %v2952_v41  ;;  %v865_v28 = vsel %vm862_vm7, %v864_v1, %v860_v5  ;;  %v907_v41 = vld [vmem:[%s3644_s7 + $0x30] sm:$0xff]  ;;  %vm3678_vm7 = vcmp.lt.s32.totalorder %v2650_v21, 15  ;;  %vm3684_vm15 = vmmov %vm3680_vm11 }
 0x3ea   :  { %v898_v49 = vmul.f32 %v865_v28, %v2954_v45  ;;  %v908_v45 = vld [vmem:[%s3644_s7 + $0x38] sm:$0xff]  ;;  %vm3679_vm10 = vmmov %vm3678_vm7 }
 0x3eb   :  { %954 = vmatpush.msrb.mxu0 %v897_v42  ;;  %vm3685_vm1 = vmmov %vm3680_vm11 }
 0x3ec   :  { %998 = vmatpush.msrb.mxu1 %v898_v49  ;;  %2137 = vmatmul.msk.f32.vlgmr.msrb.gmra.mxu0 %vm911_vm0, %v901_v22 }
 0x3ed   :  { %2146 = vmatmul.msk.f32.vlgmr.msrb.gmra.mxu1 %vm911_vm0, %v901_v22  ;;  %2157 = vmatmul.msk.f32.gmra.mxu2 %vm911_vm0, %v903_v60 }
 0x3ee   :  { %2166 = vmatmul.msk.f32.gmra.mxu3 %vm911_vm0, %v903_v60 }
 0x3f4   :  { %2138 = vmatmul.msk.f32.gmra.mxu0 %vm911_vm0, %v902_v12 }
 0x3f5   :  { %2147 = vmatmul.msk.f32.gmra.mxu1 %vm911_vm0, %v902_v12  ;;  %2158 = vmatmul.msk.f32.gmra.mxu2 %vm911_vm0, %v904_v63 }
 0x3f6   :  { %2167 = vmatmul.msk.f32.gmra.mxu3 %vm911_vm0, %v904_v63 }
 0x3fc   :  { %2139 = vmatmul.msk.f32.gmra.mxu0 %vm911_vm0, %v903_v60 }
 0x3fd   :  { %2148 = vmatmul.msk.f32.gmra.mxu1 %vm911_vm0, %v903_v60  ;;  %2159 = vmatmul.msk.f32.gmra.mxu2 %vm911_vm0, %v905_v16 }
 0x3fe   :  { %2168 = vmatmul.msk.f32.gmra.mxu3 %vm911_vm0, %v905_v16 }
 0x404   :  { %2140 = vmatmul.msk.f32.gmra.mxu0 %vm911_vm0, %v904_v63 }
 0x405   :  { %2149 = vmatmul.msk.f32.gmra.mxu1 %vm911_vm0, %v904_v63  ;;  %2160 = vmatmul.msk.f32.gmra.mxu2 %vm911_vm0, %v906_v19 }
 0x406   :  { %2169 = vmatmul.msk.f32.gmra.mxu3 %vm911_vm0, %v906_v19 }
 0x40c   :  { %2141 = vmatmul.msk.f32.gmra.mxu0 %vm911_vm0, %v905_v16 }
 0x40d   :  { %2150 = vmatmul.msk.f32.gmra.mxu1 %vm911_vm0, %v905_v16  ;;  %2161 = vmatmul.msk.f32.gmra.mxu2 %vm911_vm0, %v907_v41 }
 0x40e   :  { %2170 = vmatmul.msk.f32.gmra.mxu3 %vm911_vm0, %v907_v41 }
 0x414   :  { %2142 = vmatmul.msk.f32.gmra.mxu0 %vm911_vm0, %v906_v19 }
 0x415   :  { %2151 = vmatmul.msk.f32.gmra.mxu1 %vm911_vm0, %v906_v19  ;;  %2162 = vmatmul.msk.f32.gmra.mxu2 %vm911_vm0, %v908_v45 }
 0x416   :  { %2171 = vmatmul.msk.f32.gmra.mxu3 %vm911_vm0, %v908_v45 }
 0x41c   :  { %2143 = vmatmul.msk.f32.gmra.mxu0 %vm911_vm0, %v907_v41 }
 0x41d   :  { %2152 = vmatmul.msk.f32.gmra.mxu1 %vm911_vm0, %v907_v41  ;;  %2163 = vmatmul.msk.f32.gmra.mxu2 %vm911_vm0, %v909_v62 }
 0x41e   :  { %2172 = vmatmul.msk.f32.gmra.mxu3 %vm911_vm0, %v909_v62 }
 0x424   :  { %2144 = vmatmul.msk.f32.gmra.mxu0 %vm911_vm0, %v908_v45 }
 0x425   :  { %2153 = vmatmul.msk.f32.gmra.mxu1 %vm911_vm0, %v908_v45 }
 0x42c   :  { %2145 = vmatmul.msk.f32.gmra.mxu0 %vm911_vm0, %v909_v62 }
 0x42d   :  { %2154 = vmatmul.msk.f32.gmra.mxu1 %vm911_vm0, %v909_v62 }
 0x45f   :  { %v1163_v32 = vpop.f32.mrf.mxu2 }
 0x460   :  { %v1207_v37 = vpop.f32.mrf.mxu3 }
 0x467   :  { %v1166_v53 = vpop.f32.mrf.mxu2 }
 0x468   :  { %v1210_v26 = vpop.f32.mrf.mxu3 }
 0x469   :  { %v956_v58 = vpop.f32.mrf.mxu0 }
 0x46a   :  { %v1000_v7 = vpop.f32.mrf.mxu1  ;;  %1033 = vrot.lane.b32.xlu1 %v956_v58, %s2322_s25  ;;  %1027 = vrot.lane.b32.xlu0 %v956_v58, %s2323_s3 }
 0x46b   :  { %1029 = vrot.lane.b32.xlu2 %v1000_v7, %s2323_s3 }
 0x470   :  { %v1169_v13 = vpop.f32.mrf.mxu2 }
 0x471   :  { %v959_v24 = vpop.f32.mrf.mxu0  ;;  %v1213_v29 = vpop.f32.mrf.mxu3 }
 0x472   :  { %v1003_v30 = vpop.f32.mrf.mxu1  ;;  %1035 = vrot.lane.b32.xlu0 %v1000_v7, %s2322_s25 }
 0x473   :  { %1043 = vrot.lane.b32.xlu1 %v1003_v30, %s2324_s2  ;;  %1041 = vrot.lane.b32.xlu2 %v959_v24, %s2324_s2 }
 0x478   :  { %v1172_v48 = vpop.f32.mrf.mxu2 }
 0x479   :  { %v962_v34 = vpop.f32.mrf.mxu0  ;;  %v1216_v8 = vpop.f32.mrf.mxu3 }
 0x47a   :  { %v1006_v39 = vpop.f32.mrf.mxu1  ;;  %1049 = vrot.lane.b32.xlu0 %v962_v34, %s2325_s4 }
 0x47b   :  { %1051 = vrot.lane.b32.xlu2 %v1006_v39, %s2325_s4  ;;  %1055 = vrot.lane.b32.xlu1 %v962_v34, %s2326_s26 }
 0x480   :  { %v3060_v6 = vpop.f32.mrf.mxu2 }
 0x481   :  { %v965_v33 = vpop.f32.mrf.mxu0  ;;  %v3065_v15 = vpop.f32.mrf.mxu3 }
 0x482   :  { %1057 = vrot.lane.b32.xlu0 %v1006_v39, %s2326_s26  ;;  %v1009_v43 = vpop.f32.mrf.mxu1 }
 0x483   :  { %1234 = vrot.lane.b32.xlu2 %v1163_v32, %s2323_s3  ;;  %1236 = vrot.lane.b32.xlu1 %v1207_v37, %s2323_s3 }
 0x488   :  { %v1178_v51 = vpop.f32.mrf.mxu2 }
 0x489   :  { %v3044_v47 = vpop.f32.mrf.mxu0  ;;  %v1222_v10 = vpop.f32.mrf.mxu3 }
 0x48a   :  { %1240 = vrot.lane.b32.xlu0 %v1163_v32, %s2322_s25  ;;  %v3046_v50 = vpop.f32.mrf.mxu1 }
 0x48b   :  { %1242 = vrot.lane.b32.xlu2 %v1207_v37, %s2322_s25  ;;  %1065 = vrot.lane.b32.xlu1 %v965_v33, %s2322_s25 }
 0x490   :  { %v1181_v44 = vpop.f32.mrf.mxu2 }
 0x491   :  { %v971_v27 = vpop.f32.mrf.mxu0  ;;  %v1225_v57 = vpop.f32.mrf.mxu3 }
 0x492   :  { %1067 = vrot.lane.b32.xlu0 %v1009_v43, %s2322_s25  ;;  %v1015_v38 = vpop.f32.mrf.mxu1 }
 0x493   :  { %1071 = vrot.lane.b32.xlu2 %v965_v33, %s2327_s27  ;;  %1073 = vrot.lane.b32.xlu1 %v1009_v43, %s2327_s27 }
 0x498   :  { %v1184_v59 = vpop.f32.mrf.mxu2 }
 0x499   :  { %v974_v3 = vpop.f32.mrf.mxu0  ;;  %v1228_v49 = vpop.f32.mrf.mxu3 }
 0x49a   :  { %1250 = vrot.lane.b32.xlu0 %v1210_v26, %s2324_s2  ;;  %v1018_v9 = vpop.f32.mrf.mxu1 }
 0x49b   :  { %1256 = vrot.lane.b32.xlu2 %v1169_v13, %s2325_s4  ;;  %1248 = vrot.lane.b32.xlu1 %v1166_v53, %s2324_s2 }
 0x4a0   :  { %v1187_v16 = vpop.f32.mrf.mxu2 }
 0x4a1   :  { %v977_v52 = vpop.f32.mrf.mxu0  ;;  %v1231_v24 = vpop.f32.mrf.mxu3 }
 0x4a2   :  { %1262 = vrot.lane.b32.xlu0 %v1169_v13, %s2326_s26  ;;  %v1021_v54 = vpop.f32.mrf.mxu1 }
 0x4a3   :  { %1264 = vrot.lane.b32.xlu2 %v1213_v29, %s2326_s26  ;;  %1258 = vrot.lane.b32.xlu1 %v1213_v29, %s2325_s4 }
 0x4a9   :  { %v980_v14 = vpop.f32.mrf.mxu0 }
 0x4aa   :  { %1083 = vrot.lane.b32.xlu0 %v971_v27, %s2328_s28  ;;  %v1024_v7 = vpop.f32.mrf.mxu1 }
 0x4ab   :  { %1085 = vrot.lane.b32.xlu2 %v1015_v38, %s2328_s28  ;;  %1089 = vrot.lane.b32.xlu1 %v971_v27, %s2325_s4 }
 0x4b2   :  { %1091 = vrot.lane.b32.xlu0 %v1015_v38, %s2325_s4 }
 0x4b3   :  { %1278 = vrot.lane.b32.xlu2 %v1172_v48, %s2327_s27  ;;  %1272 = vrot.lane.b32.xlu1 %v1172_v48, %s2322_s25 }
 0x4ba   :  { %1274 = vrot.lane.b32.xlu0 %v1216_v8, %s2322_s25 }
 0x4bb   :  { %1280 = vrot.lane.b32.xlu1 %v1216_v8, %s2327_s27  ;;  %1105 = vrot.lane.b32.xlu2 %v974_v3, %s2329_s29 }
 0x4c2   :  { %1101 = vrot.lane.b32.xlu0 %v1018_v9, %s2327_s27 }
 0x4c3   :  { %1099 = vrot.lane.b32.xlu1 %v974_v3, %s2327_s27  ;;  %1115 = vrot.lane.b32.xlu2 %v977_v52, %s2330_s30 }
 0x4c5   :  { %v1030_v20 = vpop.permute.xlu2 %1029 }
 0x4ca   :  { %1296 = vrot.lane.b32.xlu0 %v1178_v51, %s2325_s4 }
 0x4cb   :  { %1107 = vrot.lane.b32.xlu1 %v1018_v9, %s2329_s29  ;;  %1290 = vrot.lane.b32.xlu2 %v1178_v51, %s2328_s28 }
 0x4cd   :  { %v1042_v22 = vpop.permute.xlu2 %1041 }
 0x4d2   :  { %1123 = vrot.lane.b32.xlu0 %v980_v14, %s2331_s16 }
 0x4d3   :  { %1117 = vrot.lane.b32.xlu1 %v1021_v54, %s2330_s30  ;;  %1298 = vrot.lane.b32.xlu2 %v1222_v10, %s2325_s4 }
 0x4d5   :  { %v1052_v55 = vpop.permute.xlu2 %1051 }
 0x4da   :  { %1306 = vrot.lane.b32.xlu0 %v1181_v44, %s2327_s27 }
 0x4db   :  { %1292 = vrot.lane.b32.xlu1 %v1222_v10, %s2328_s28  ;;  %1308 = vrot.lane.b32.xlu2 %v1225_v57, %s2327_s27 }
 0x4dc   :  { %v1034_v4 = vpop.permute.xlu1 %1033  ;;  %v1028_v46 = vpop.permute.xlu0 %1027 }
 0x4dd   :  { %v1235_v11 = vpop.permute.xlu2 %1234  ;;  %v1031_v12 = vsel %vm396_vm3, %v1028_v46, %v1030_v20  ;;  %v1032_v17 = vsel %vm396_vm3, %v1030_v20, %v1028_v46 }
 0x4e2   :  { %1314 = vrot.lane.b32.xlu0 %v1225_v57, %s2329_s29 }
 0x4e3   :  { %1312 = vrot.lane.b32.xlu1 %v1181_v44, %s2329_s29  ;;  %1322 = vrot.lane.b32.xlu2 %v1184_v59, %s2330_s30 }
 0x4e4   :  { %v1036_v23 = vpop.permute.xlu0 %1035 }
 0x4e5   :  { %v1044_v18 = vpop.permute.xlu1 %1043  ;;  %v1243_v25 = vpop.permute.xlu2 %1242  ;;  %v1037_v56 = vsel %vm403_vm2, %v1034_v4, %v1036_v23  ;;  %v1038_v1 = vsel %vm403_vm2, %v1036_v23, %v1034_v4 }
 0x4e6   :  { %v1045_v61 = vsel %vm416_vm4, %v1042_v22, %v1044_v18  ;;  %v1046_v5 = vsel %vm416_vm4, %v1044_v18, %v1042_v22  ;;  %v1039_v42 = vsel %vm2661_vm5, %v1038_v1, %v1032_v17  ;;  %v1040_v28 = vsel %vm2665_vm6, %v1037_v56, %v1031_v12 }
 0x4e7   :  { %v1047_v60 = vadd.f32 %v1046_v5, %v1039_v42  ;;  %v1048_v63 = vadd.f32 %v1045_v61, %v1040_v28 }
 0x4ea   :  { %1336 = vrot.lane.b32.xlu0 %v1187_v16, %s2328_s28 }
 0x4eb   :  { %1324 = vrot.lane.b32.xlu1 %v1228_v49, %s2330_s30  ;;  %1330 = vrot.lane.b32.xlu2 %v1187_v16, %s2331_s16 }
 0x4ec   :  { %v1050_v19 = vpop.permute.xlu0 %1049 }
 0x4ed   :  { %v1056_v41 = vpop.permute.xlu1 %1055  ;;  %v1072_v45 = vpop.permute.xlu2 %1071  ;;  %v1053_v62 = vsel %vm3678_vm7, %v1050_v19, %v1052_v55  ;;  %v1054_v58 = vsel %vm3679_vm10, %v1052_v55, %v1050_v19  ;;  %vm3686_vm10 = vmmov %vm3678_vm7 }
 0x4f2   :  { %1131 = vrot.lane.b32.xlu0 %v1024_v7, %s2328_s28 }
 0x4f3   :  { %1332 = vrot.lane.b32.xlu1 %v1231_v24, %s2331_s16  ;;  %1338 = vrot.lane.b32.xlu2 %v1231_v24, %s2328_s28 }
 0x4f4   :  { %v1058_v30 = vpop.permute.xlu0 %1057 }
 0x4f5   :  { %v1237_v34 = vpop.permute.xlu1 %1236  ;;  %v1257_v39 = vpop.permute.xlu2 %1256  ;;  %v1059_v32 = vsel %vm3680_vm11, %v1056_v41, %v1058_v30  ;;  %v1060_v37 = vsel %vm3681_vm12, %v1058_v30, %v1056_v41  ;;  %vm3687_vm11 = vcmp.lt.s32.totalorder %v2650_v21, 127 }
 0x4f6   :  { %v1238_v33 = vsel %vm396_vm3, %v1235_v11, %v1237_v34  ;;  %v1239_v53 = vsel %vm396_vm3, %v1237_v34, %v1235_v11  ;;  %v1061_v43 = vsel %vm2670_vm8, %v1060_v37, %v1054_v58  ;;  %v1062_v26 = vsel %vm2674_vm9, %v1059_v32, %v1053_v62  ;;  %vm3688_vm12 = vmmov %vm3687_vm11 }
 0x4f7   :  { %v1063_v13 = vadd.f32 %v1061_v43, %v1047_v60  ;;  %v1064_v29 = vadd.f32 %v1062_v26, %v1048_v63 }
 0x4fb   :  { %1125 = vrot.lane.b32.xlu2 %v1024_v7, %s2331_s16  ;;  %1129 = vrot.lane.b32.xlu1 %v980_v14, %s2328_s28 }
 0x4fc   :  { %v1241_v27 = vpop.permute.xlu0 %1240 }
 0x4fd   :  { %v1265_v38 = vpop.permute.xlu2 %1264  ;;  %v1066_v48 = vpop.permute.xlu1 %1065  ;;  %v1244_v3 = vsel %vm403_vm2, %v1241_v27, %v1243_v25  ;;  %v1245_v8 = vsel %vm403_vm2, %v1243_v25, %v1241_v27 }
 0x4fe   :  { %v1246_v9 = vsel %vm2661_vm5, %v1245_v8, %v1239_v53  ;;  %v1247_v52 = vsel %vm2665_vm6, %v1244_v3, %v1238_v33 }
 0x504   :  { %v1068_v20 = vpop.permute.xlu0 %1067 }
 0x505   :  { %v1074_v51 = vpop.permute.xlu1 %1073  ;;  %v1069_v22 = vsel %vm403_vm2, %v1066_v48, %v1068_v20  ;;  %v1070_v10 = vsel %vm403_vm2, %v1068_v20, %v1066_v48  ;;  %v1086_v14 = vpop.permute.xlu2 %1085 }
 0x506   :  { %v1075_v54 = vsel %vm3682_vm13, %v1072_v45, %v1074_v51  ;;  %v1076_v44 = vsel %vm3683_vm14, %v1074_v51, %v1072_v45  ;;  %vm3689_vm13 = vmmov %vm3678_vm7 }
 0x507   :  { %v1077_v55 = vsel %vm2661_vm5, %v1075_v54, %v1070_v10  ;;  %v1078_v57 = vsel %vm2665_vm6, %v1076_v44, %v1069_v22  ;;  %vm3690_vm14 = vmmov %vm3678_vm7 }
 0x508   :  { %v1079_v4 = vadd.f32 %v1077_v55, %v1063_v13  ;;  %v1080_v46 = vadd.f32 %v1078_v57, %v1064_v29 }
 0x50a   :  { %v1081_v34 = vadd.f32 %v1079_v4, %v3044_v47 }
 0x50c   :  { %v1251_v11 = vpop.permute.xlu0 %1250 }
 0x50d   :  { %v1249_v12 = vpop.permute.xlu1 %1248  ;;  %v1279_v25 = vpop.permute.xlu2 %1278 }
 0x50e   :  { %v1252_v17 = vsel %vm416_vm4, %v1249_v12, %v1251_v11  ;;  %v1253_v59 = vsel %vm416_vm4, %v1251_v11, %v1249_v12 }
 0x50f   :  { %v1254_v23 = vadd.f32 %v1253_v59, %v1246_v9  ;;  %v1255_v18 = vadd.f32 %v1252_v17, %v1247_v52 }
 0x514   :  { %v1263_v56 = vpop.permute.xlu0 %1262 }
 0x515   :  { %v1259_v1 = vpop.permute.xlu1 %1258  ;;  %v1266_v61 = vsel %vm3684_vm15, %v1263_v56, %v1265_v38  ;;  %v1267_v5 = vsel %vm3685_vm1, %v1265_v38, %v1263_v56  ;;  %v3157_v19 = vpop.permute.xlu2 %1105  ;;  %vm3691_vm15 = vcmp.lt.s32.totalorder %v2650_v21, 113 }
 0x516   :  { %v1260_v42 = vsel %vm3678_vm7, %v1257_v39, %v1259_v1  ;;  %v1261_v28 = vsel %vm3686_vm10, %v1259_v1, %v1257_v39  ;;  %v1082_v39 = vadd.f32 %v1080_v46, %v3046_v50  ;;  %vm3692_vm1 = vmmov %vm3691_vm15 }
 0x517   :  { %v1268_v49 = vsel %vm2670_vm8, %v1267_v5, %v1261_v28  ;;  %v1269_v60 = vsel %vm2674_vm9, %v1266_v61, %v1260_v42  ;;  %vm3693_vm7 = vmmov %vm3687_vm11 }
 0x518   :  { %v1270_v63 = vadd.f32 %v1268_v49, %v1254_v23  ;;  %v1271_v16 = vadd.f32 %v1269_v60, %v1255_v18  ;;  %vm3694_vm10 = vmmov %vm3693_vm7 }
 0x51c   :  { %v1084_v41 = vpop.permute.xlu0 %1083 }
 0x51d   :  { %v1090_v45 = vpop.permute.xlu1 %1089  ;;  %v1087_v62 = vsel %vm3687_vm11, %v1084_v41, %v1086_v14  ;;  %v1088_v58 = vsel %vm3688_vm12, %v1086_v14, %v1084_v41  ;;  %v3163_v7 = vpop.permute.xlu2 %1115  ;;  %vm3695_vm11 = vmmov %vm3689_vm13 }
 0x51e   :  { %vm3696_vm12 = vmmov %vm3695_vm11 }
 0x524   :  { %v1092_v24 = vpop.permute.xlu0 %1091 }
 0x525   :  { %v1273_v30 = vpop.permute.xlu1 %1272  ;;  %v1093_v32 = vsel %vm3689_vm13, %v1090_v45, %v1092_v24  ;;  %v1094_v37 = vsel %vm3690_vm14, %v1092_v24, %v1090_v45  ;;  %v1291_v29 = vpop.permute.xlu2 %1290  ;;  %vm3697_vm13 = vcmp.lt.s32.totalorder %v2650_v21, 97 }
 0x526   :  { %v1095_v33 = vsel %vm2670_vm8, %v1094_v37, %v1087_v62  ;;  %v1096_v53 = vsel %vm2674_vm9, %v1093_v32, %v1088_v58  ;;  %vm3698_vm14 = vmmov %vm3697_vm13 }
 0x527   :  { %v3175_v43 = vadd.f32 %v1095_v33, %v1081_v34  ;;  %v3177_v26 = vadd.f32 %v1096_v53, %v1082_v39 }
 0x52c   :  { %v1275_v13 = vpop.permute.xlu0 %1274 }
 0x52d   :  { %v1281_v47 = vpop.permute.xlu1 %1280  ;;  %v1299_v38 = vpop.permute.xlu2 %1298  ;;  %v1276_v44 = vsel %vm403_vm2, %v1273_v30, %v1275_v13  ;;  %v1277_v55 = vsel %vm403_vm2, %v1275_v13, %v1273_v30 }
 0x52e   :  { %v1282_v14 = vsel %vm3691_vm15, %v1279_v25, %v1281_v47  ;;  %v1283_v54 = vsel %vm3692_vm1, %v1281_v47, %v1279_v25  ;;  %vm3699_vm15 = vmmov %vm3692_vm1 }
 0x52f   :  { %v1284_v46 = vsel %vm2661_vm5, %v1282_v14, %v1277_v55  ;;  %v1285_v11 = vsel %vm2665_vm6, %v1283_v54, %v1276_v44 }
 0x530   :  { %v1286_v12 = vadd.f32 %v1284_v46, %v1270_v63  ;;  %v1287_v17 = vadd.f32 %v1285_v11, %v1271_v16 }
 0x532   :  { %v1288_v28 = vadd.f32 %v1286_v12, %v3060_v6  ;;  %v1289_v49 = vadd.f32 %v1287_v17, %v3065_v15 }
 0x534   :  { %v1102_v50 = vpop.permute.xlu0 %1101 }
 0x535   :  { %v1100_v27 = vpop.permute.xlu1 %1099  ;;  %v1309_v8 = vpop.permute.xlu2 %1308 }
 0x53c   :  { %v1297_v48 = vpop.permute.xlu0 %1296 }
 0x53d   :  { %v1108_v3 = vpop.permute.xlu1 %1107  ;;  %v1323_v20 = vpop.permute.xlu2 %1322  ;;  %v1300_v25 = vsel %vm3695_vm11, %v1297_v48, %v1299_v38  ;;  %v1301_v56 = vsel %vm3696_vm12, %v1299_v38, %v1297_v48  ;;  %vm3702_vm11 = vmmov %vm3697_vm13 }
 0x53e   :  { %v1109_v39 = vsel %vm3702_vm11, %v3157_v19, %v1108_v3  ;;  %vm3703_vm12 = vmmov %vm3702_vm11  ;;  %vm3710_vm11 = vcmp.lt.s32.totalorder %v2650_v21, 112 }
 0x53f   :  { %v1110_v32 = vsel %vm3703_vm12, %v1108_v3, %v3157_v19  ;;  %vm3711_vm12 = vmmov %vm3710_vm11 }
 0x544   :  { %v3179_v9 = vpop.permute.xlu0 %1123 }
 0x545   :  { %v1118_v52 = vpop.permute.xlu1 %1117  ;;  %v1331_v57 = vpop.permute.xlu2 %1330 }
 0x546   :  { %v1119_v14 = vsel %vm3710_vm11, %v3163_v7, %v1118_v52 }
 0x54c   :  { %v1307_v22 = vpop.permute.xlu0 %1306 }
 0x54d   :  { %v1293_v51 = vpop.permute.xlu1 %1292  ;;  %v1339_v60 = vpop.permute.xlu2 %1338  ;;  %v1310_v63 = vsel %vm3699_vm15, %v1307_v22, %v1309_v8  ;;  %v1311_v16 = vsel %vm3692_vm1, %v1309_v8, %v1307_v22  ;;  %vm3706_vm15 = vcmp.lt.s32.totalorder %v2650_v21, 111 }
 0x54e   :  { %v1294_v59 = vsel %vm3693_vm7, %v1291_v29, %v1293_v51  ;;  %v1295_v23 = vsel %vm3694_vm10, %v1293_v51, %v1291_v29  ;;  %vm3700_vm7 = vcmp.lt.s32.totalorder %v2650_v21, 112  ;;  %vm3707_vm1 = vmmov %vm3706_vm15 }
 0x54f   :  { %v1302_v5 = vsel %vm2670_vm8, %v1301_v56, %v1294_v59  ;;  %v1303_v42 = vsel %vm2674_vm9, %v1300_v25, %v1295_v23  ;;  %vm3701_vm10 = vmmov %vm3700_vm7 }
 0x550   :  { %v1304_v62 = vadd.f32 %v1302_v5, %v1288_v28  ;;  %v1305_v58 = vadd.f32 %v1303_v42, %v1289_v49 }
 0x554   :  { %v1315_v4 = vpop.permute.xlu0 %1314 }
 0x555   :  { %v1313_v10 = vpop.permute.xlu1 %1312 }
 0x556   :  { %v1316_v1 = vsel %vm3697_vm13, %v1313_v10, %v1315_v4  ;;  %v1317_v61 = vsel %vm3698_vm14, %v1315_v4, %v1313_v10  ;;  %vm3704_vm13 = vcmp.lt.s32.totalorder %v2650_v21, 127 }
 0x557   :  { %v1318_v41 = vsel %vm2661_vm5, %v1316_v1, %v1310_v63  ;;  %v1319_v45 = vsel %vm2665_vm6, %v1317_v61, %v1311_v16  ;;  %vm3705_vm14 = vmmov %vm3704_vm13 }
 0x558   :  { %v1320_v30 = vadd.f32 %v1318_v41, %v1304_v62  ;;  %v1321_v34 = vadd.f32 %v1319_v45, %v1305_v58 }
 0x55c   :  { %v1337_v24 = vpop.permute.xlu0 %1336 }
 0x55d   :  { %v1325_v18 = vpop.permute.xlu1 %1324  ;;  %v1340_v37 = vsel %vm3704_vm13, %v1337_v24, %v1339_v60  ;;  %v1341_v33 = vsel %vm3705_vm14, %v1339_v60, %v1337_v24  ;;  %vm3712_vm13 = vmmov %vm3707_vm1 }
 0x55e   :  { %v1326_v6 = vsel %vm3700_vm7, %v1323_v20, %v1325_v18  ;;  %v1327_v15 = vsel %vm3701_vm10, %v1325_v18, %v1323_v20  ;;  %vm3708_vm7 = vcmp.lt.s32.totalorder %v2650_v21, 113  ;;  %vm3713_vm14 = vmmov %vm3707_vm1 }
 0x55f   :  { %v1328_v13 = vadd.f32 %v1326_v6, %v1320_v30  ;;  %v1329_v47 = vadd.f32 %v1327_v15, %v1321_v34  ;;  %v1103_v48 = vsel %vm3708_vm7, %v1100_v27, %v1102_v50  ;;  %vm3709_vm10 = vmmov %vm3708_vm7 }
 0x560   :  { %v1104_v19 = vsel %vm3709_vm10, %v1102_v50, %v1100_v27  ;;  %v1111_v20 = vsel %vm2661_vm5, %v1109_v39, %v1103_v48  ;;  %v1120_v50 = vsel %vm3711_vm12, %v1118_v52, %v3163_v7  ;;  %v1126_v27 = vpop.permute.xlu2 %1125  ;;  %v1372_v48 = vld [vmem:[%s3646_s9] sm:$0xff] }
 0x561   :  { %v1112_v51 = vsel %vm2665_vm6, %v1110_v32, %v1104_v19  ;;  %v1113_v55 = vadd.f32 %v1111_v20, %v3175_v43  ;;  %v1127_v17 = vsel %vm3712_vm13, %v3179_v9, %v1126_v27  ;;  %v1128_v43 = vsel %vm3713_vm14, %v1126_v27, %v3179_v9 }
 0x563   :  { %v1121_v52 = vadd.f32 %v1119_v14, %v1113_v55 }
 0x564   :  { %v1132_v4 = vpop.permute.xlu0 %1131 }
 0x565   :  { %v1333_v53 = vpop.permute.xlu1 %1332 }
 0x566   :  { %v1334_v29 = vsel %vm3706_vm15, %v1331_v57, %v1333_v53  ;;  %v1335_v38 = vsel %vm3707_vm1, %v1333_v53, %v1331_v57  ;;  %v1114_v57 = vadd.f32 %v1112_v51, %v3177_v26  ;;  %vm3714_vm15 = vcmp.lt.s32.totalorder %v2650_v21, 127  ;;  %v1397_v51 = vld [vmem:[%s3647_s10] sm:$0xff] }
 0x567   :  { %v1342_v3 = vsel %vm2670_vm8, %v1340_v37, %v1334_v29  ;;  %v1343_v8 = vsel %vm2674_vm9, %v1341_v33, %v1335_v38  ;;  %vm3715_vm1 = vmmov %vm3714_vm15 }
 0x568   :  { %v1344_v22 = vadd.f32 %v1342_v3, %v1328_v13  ;;  %v1345_v10 = vadd.f32 %v1343_v8, %v1329_v47  ;;  %v1122_v12 = vadd.f32 %v1120_v50, %v1114_v57 }
 0x56a   :  { %v3256_v54 = vadd.f32 %v1344_v22, %v3073_v2  ;;  %v3259_v44 = vadd.f32 %v1345_v10, %v3073_v2 }
 0x56c   :  { %v1351_v46 = vadd.f32 %v3259_v44, %v3256_v54  ;;  %v1358_v11 = vmul.f32 %v3256_v54, %v3256_v54  ;;  %v1359_v7 = vmul.f32 %v3259_v44, %v3259_v44 }
 0x56d   :  { %v1130_v59 = vpop.permute.xlu1 %1129 }
 0x56e   :  { %v1133_v26 = vsel %vm3714_vm15, %v1130_v59, %v1132_v4  ;;  %v1134_v23 = vsel %vm3715_vm1, %v1132_v4, %v1130_v59  ;;  %1352 = vadd.xlane.f32.xlu2 %v1351_v46  ;;  %v1363_v18 = vadd.f32 %v1359_v7, %v1358_v11  ;;  %v1519_v46 = vld [vmem:[%s3649_s12] sm:$0xff] }
 0x56f   :  { %v1135_v25 = vsel %vm2670_vm8, %v1133_v26, %v1127_v17  ;;  %v1136_v56 = vsel %vm2674_vm9, %v1134_v23, %v1128_v43 }
 0x570   :  { %v1137_v1 = vadd.f32 %v1135_v25, %v1121_v52  ;;  %v1138_v61 = vadd.f32 %v1136_v56, %v1122_v12  ;;  %1364 = vadd.xlane.f32.xlu1 %v1363_v18 }
 0x572   :  { %v3284_v5 = vadd.f32 %v3073_v2, %v1137_v1  ;;  %v3287_v9 = vadd.f32 %v3073_v2, %v1138_v61 }
 0x574   :  { %v1348_v42 = vadd.f32 %v3287_v9, %v3284_v5  ;;  %v1356_v28 = vmul.f32 %v3284_v5, %v3284_v5  ;;  %v1357_v49 = vmul.f32 %v3287_v9, %v3287_v9 }
 0x576   :  { %1349 = vadd.xlane.f32.xlu0 %v1348_v42  ;;  %v1360_v60 = vadd.f32 %v1357_v49, %v1356_v28 }
 0x578   :  { %1361 = vadd.xlane.f32.xlu2 %v1360_v60 }
 0x5e1   :  { %v1353_v63 = vpop.xlane.xlu2 %1352 }
 0x5e2   :  { %v1355_v16 = vmul.f32 %v1353_v63, %v3677_v0 }
 0x5e3   :  { %v1365_v41 = vpop.xlane.xlu1 %1364 }
 0x5e4   :  { %v1369_v45 = vmul.f32 %v1355_v16, %v1355_v16  ;;  %v1367_v2 = vmul.f32 %v1365_v41, %v3677_v0 }
 0x5e6   :  { %v1371_v62 = vsub.f32 %v1367_v2, %v1369_v45 }
 0x5e8   :  { %v1374_v58 = vadd.f32 1e-05, %v1371_v62 }
 0x5e9   :  { %v1350_v24 = vpop.xlane.xlu0 %1349 }
 0x5ea   :  { %2273 = vrsqrt.f32 %v1374_v58  ;;  %v1354_v6 = vmul.f32 %v1350_v24, %v3677_v0  ;;  %vm1391_vm10 = vweird.f32 %v1374_v58 }
 0x5eb   :  { %v1362_v15 = vpop.xlane.xlu2 %1361 }
 0x5ec   :  { %v1368_v30 = vmul.f32 %v1354_v6, %v1354_v6  ;;  %v1366_v34 = vmul.f32 %v1362_v15, %v3677_v0 }
 0x5ee   :  { %v1370_v39 = vsub.f32 %v1366_v34, %v1368_v30 }
 0x5f0   :  { %v2274_v32 = vpop.eup %2273  ;;  %v1373_v37 = vadd.f32 1e-05, %v1370_v39 }
 0x5f1   :  { %v1386_v33 = vmul.f32 %v2274_v32, %v1374_v58  ;;  %vm1392_vm7 = vweird.f32 %v2274_v32 }
 0x5f2   :  { %2275 = vrsqrt.f32 %v1373_v37  ;;  %vm1393_vm11 = vmor %vm1391_vm10, %vm1392_vm7  ;;  %vm1381_vm13 = vweird.f32 %v1373_v37 }
 0x5f3   :  { %v1387_v53 = vmul.f32 %v2274_v32, %v1386_v33 }
 0x5f5   :  { %v1388_v13 = vmul.f32 0.5, %v1387_v53 }
 0x5f7   :  { %v1389_v47 = vsub.f32 1.5, %v1388_v13 }
 0x5f8   :  { %v2276_v29 = vpop.eup %2275 }
 0x5f9   :  { %v1376_v38 = vmul.f32 %v2276_v29, %v1373_v37  ;;  %v1390_v19 = vmul.f32 %v2274_v32, %v1389_v47  ;;  %vm1382_vm12 = vweird.f32 %v2276_v29 }
 0x5fa   :  { %vm1383_vm14 = vmor %vm1381_vm13, %vm1382_vm12 }
 0x5fb   :  { %v1377_v3 = vmul.f32 %v2276_v29, %v1376_v38  ;;  %v1394_v0 = vsel %vm1393_vm11, %v2274_v32, %v1390_v19 }
 0x5fc   :  { %v1396_v8 = vmul.f32 %v1394_v0, %v1372_v48 }
 0x5fd   :  { %v1378_v20 = vmul.f32 0.5, %v1377_v3 }
 0x5fe   :  { %1409 = vperm.xlu1 %2238, %v1396_v8   ;;  %v1399_v22 = vmul.f32 %v1396_v8, %v1355_v16 }
 0x5ff   :  { %v1379_v10 = vsub.f32 1.5, %v1378_v20 }
 0x600   :  { %v1401_v14 = vsub.f32 %v1397_v51, %v1399_v22 }
 0x601   :  { %v1380_v50 = vmul.f32 %v2276_v29, %v1379_v10 }
 0x602   :  { %1423 = vperm.xlu0 %2237, %v1401_v14  }
 0x603   :  { %v1384_v27 = vsel %vm1383_vm14, %v2276_v29, %v1380_v50 }
 0x604   :  { %v1395_v55 = vmul.f32 %v1384_v27, %v1372_v48  ;;  %v1510_v27 = vld [vmem:[%s3648_s11] sm:$0xff] }
 0x606   :  { %1404 = vperm.xlu2 %2236, %v1395_v55   ;;  %v1398_v57 = vmul.f32 %v1395_v55, %v1354_v6 }
 0x608   :  { %v1400_v4 = vsub.f32 %v1397_v51, %v1398_v57 }
 0x60a   :  { %1418 = vperm.xlu0 %2237, %v1400_v4  }
 0x60e   :  { %1749 = vperm.xlu2 %2236, %v1519_v46  }
 0x660   :  { %v1405_v23 = vpop.permute.xlu2 %1404 }
 0x661   :  { %v1412_v18 = vmul.f32 %v1405_v23, %v3284_v5  ;;  %v1413_v25 = vmul.f32 %v1405_v23, %v3287_v9 }
 0x670   :  { %v1410_v11 = vpop.permute.xlu1 %1409 }
 0x671   :  { %v1414_v7 = vmul.f32 %v1410_v11, %v3256_v54  ;;  %v1415_v52 = vmul.f32 %v1410_v11, %v3259_v44 }
 0x674   :  { %v1424_v12 = vpop.permute.xlu0 %1423 }
 0x675   :  { %v1428_v17 = vadd.f32 %v1424_v12, %v1414_v7  ;;  %v1429_v59 = vadd.f32 %v1424_v12, %v1415_v52 }
 0x677   :  { %v2175_v43 = vmul.f32 -1.442695, %v1428_v17  ;;  %v2176_v26 = vmul.f32 -1.442695, %v1429_v59 }
 0x679   :  { %2277 = vpow2.f32 %v2175_v43 }
 0x67a   :  { %2279 = vpow2.f32 %v2176_v26 }
 0x67c   :  { %v1419_v56 = vpop.permute.xlu0 %1418 }
 0x67d   :  { %v3312_v1 = vadd.f32 %v1419_v56, %v1412_v18  ;;  %v3314_v61 = vadd.f32 %v1419_v56, %v1413_v25  ;;  %v1511_v18 = vld [vmem:[%s3648_s11 + $0x8] sm:$0xff]  ;;  %v3716_v56 = vld [vmem:[#allocation6_spill] sm:$0xff] }
 0x67f   :  { %v2278_v54 = vpop.eup %2277  ;;  %v2173_v44 = vmul.f32 -1.442695, %v3312_v1  ;;  %v2174_v49 = vmul.f32 -1.442695, %v3314_v61 }
 0x680   :  { %v2280_v42 = vpop.eup %2279  ;;  %v1444_v28 = vadd.f32 1.0, %v2278_v54  ;;  %v1512_v54 = vld [vmem:[%s3648_s11 + $0x10] sm:$0xff] }
 0x681   :  { %v1445_v60 = vadd.f32 1.0, %v2280_v42  ;;  %2281 = vpow2.f32 %v2173_v44  ;;  %v1514_v44 = vld [vmem:[%s3648_s11 + $0x20] sm:$0xff]  ;;  %v1515_v42 = vld [vmem:[%s3648_s11 + $0x28] sm:$0xff] }
 0x682   :  { %2283 = vrcp.f32 %v1444_v28  ;;  %v1485_v24 = vand.u32 2147483647, %v1444_v28  ;;  %v1487_v6 = vand.u32 2147483648, %v1444_v28  ;;  %vm1481_vm7 = vweird.f32 %v1444_v28 }
 0x683   :  { %2285 = vrcp.f32 %v1445_v60  ;;  %v1502_v34 = vand.u32 2147483648, %v1445_v60  ;;  %v1500_v32 = vand.u32 2147483647, %v1445_v60  ;;  %vm1496_vm11 = vweird.f32 %v1445_v60 }
 0x684   :  { %2287 = vpow2.f32 %v2174_v49  ;;  %v1488_v53 = vor.u32 1.1754944e-38, %v1487_v6  ;;  %vm1486_vm12 = vcmp.eq.f32.partialorder %v1485_v24, 8.507059e+37  ;;  %v1517_v49 = vld [vmem:[%s3648_s11 + $0x38] sm:$0xff] }
 0x685   :  { %v1503_v29 = vor.u32 1.1754944e-38, %v1502_v34  ;;  %vm1501_vm14 = vcmp.eq.f32.partialorder %v1500_v32, 8.507059e+37 }
 0x687   :  { %v2282_v5 = vpop.eup %2281 }
 0x688   :  { %v2284_v63 = vpop.eup %2283  ;;  %v1442_v9 = vadd.f32 1.0, %v2282_v5 }
 0x689   :  { %v2286_v16 = vpop.eup %2285  ;;  %v1477_v41 = vmul.f32 %v2284_v63, %v1444_v28  ;;  %vm1482_vm15 = vweird.f32 %v2284_v63  ;;  %v1516_v28 = vld [vmem:[%s3648_s11 + $0x30] sm:$0xff] }
 0x68a   :  { %v2288_v45 = vpop.eup %2287  ;;  %v1492_v2 = vmul.f32 %v2286_v16, %v1445_v60  ;;  %2289 = vrcp.f32 %v1442_v9  ;;  %vm1497_vm1 = vweird.f32 %v2286_v16  ;;  %vm1483_vm10 = vmor %vm1481_vm7, %vm1482_vm15  ;;  %v1457_v22 = vand.u32 2147483648, %v1442_v9  ;;  %v1518_v60 = vld [vmem:[%s3648_s11 + $0x40] sm:$0xff] }
 0x68b   :  { %v1478_v62 = vsub.f32 1.0, %v1477_v41  ;;  %v1443_v58 = vadd.f32 1.0, %v2288_v45  ;;  %vm1498_vm13 = vmor %vm1496_vm11, %vm1497_vm1  ;;  %v1455_v50 = vand.u32 2147483647, %v1442_v9  ;;  %vm1451_vm1 = vweird.f32 %v1442_v9 }
 0x68c   :  { %v1493_v15 = vsub.f32 1.0, %v1492_v2  ;;  %v1458_v46 = vor.u32 1.1754944e-38, %v1457_v22  ;;  %v2020_v22 = vld.sshfl [vmem:[#allocation1] sm:$0xff pattern:$0x75316420] }
 0x68d   :  { %v1479_v30 = vmul.f32 %v2284_v63, %v1478_v62  ;;  %2291 = vrcp.f32 %v1443_v58  ;;  %v1472_v4 = vand.u32 2147483648, %v1443_v58  ;;  %v1470_v7 = vand.u32 2147483647, %v1443_v58 }
 0x68e   :  { %v1494_v39 = vmul.f32 %v2286_v16, %v1493_v15  ;;  %vm1456_vm11 = vcmp.eq.f32.partialorder %v1455_v50, 8.507059e+37 }
 0x68f   :  { %v1480_v37 = vadd.f32 %v2284_v63, %v1479_v30 }
 0x690   :  { %v2290_v33 = vpop.eup %2289  ;;  %v1495_v13 = vadd.f32 %v2286_v16, %v1494_v39 }
 0x691   :  { %v1484_v47 = vsel %vm1483_vm10, %v2284_v63, %v1480_v37  ;;  %v1447_v38 = vmul.f32 %v2290_v33, %v1442_v9  ;;  %vm1452_vm15 = vweird.f32 %v2290_v33 }
 0x692   :  { %v1489_v48 = vsel %vm1486_vm12, %v1488_v53, %v1484_v47  ;;  %v1499_v19 = vsel %vm1498_vm13, %v2286_v16, %v1495_v13  ;;  %vm1453_vm7 = vmor %vm1451_vm1, %vm1452_vm15  ;;  %vm1466_vm12 = vweird.f32 %v1443_v58  ;;  %vm3717_vm15 = vcmask 1043456  }
 0x693   :  { %v2292_v3 = vpop.eup %2291  ;;  %v1504_v0 = vsel %vm1501_vm14, %v1503_v29, %v1499_v19  ;;  %v1508_v8 = vmul.f32 %v1489_v48, %v1428_v17  ;;  %v1448_v20 = vsub.f32 1.0, %v1447_v38  ;;  %vm1471_vm14 = vcmp.eq.f32.partialorder %v1470_v7, 8.507059e+37  ;;  %vm3719_vm1 = vmmov %vm3717_vm15  ;;  %v3424_v29 = vpop.permute.xlu2 %1749 }
 0x694   :  { %v1509_v51 = vmul.f32 %v1504_v0, %v1429_v59  ;;  %v1462_v10 = vmul.f32 %v2292_v3, %v1443_v58  ;;  %vm1467_vm10 = vweird.f32 %v2292_v3  ;;  %v1473_v59 = vor.u32 1.1754944e-38, %v1472_v4 }
 0x695   :  { %v1449_v14 = vmul.f32 %v2290_v33, %v1448_v20  ;;  %1769 = vmatpush.msra.mxu2 %v1508_v8  ;;  %vm1468_vm13 = vmor %vm1466_vm12, %vm1467_vm10  ;;  %vm3722_vm10 = vcmask 31744  }
 0x696   :  { %v1463_v55 = vsub.f32 1.0, %v1462_v10  ;;  %1813 = vmatpush.msra.mxu3 %v1509_v51  ;;  %2195 = vmatmul.msk.f32.vlgmr.msra.gmra.mxu2 %vm911_vm0, %v1510_v27  ;;  %v2021_v10 = vld.sshfl [vmem:[#allocation1 + $0x8] sm:$0xff pattern:$0x75316420]  ;;  %vm3724_vm12 = vmmov %vm3722_vm10 }
 0x697   :  { %v1450_v57 = vadd.f32 %v2290_v33, %v1449_v14  ;;  %2204 = vmatmul.msk.f32.vlgmr.msra.gmra.mxu3 %vm911_vm0, %v1510_v27  ;;  %v1956_v14 = vld [vmem:[%s3650_s13] sm:$0xff] }
 0x698   :  { %v1464_v11 = vmul.f32 %v2292_v3, %v1463_v55 }
 0x699   :  { %v1454_v52 = vsel %vm1453_vm7, %v2290_v33, %v1450_v57 }
 0x69a   :  { %v1459_v12 = vsel %vm1456_vm11, %v1458_v46, %v1454_v52  ;;  %v1465_v17 = vadd.f32 %v2292_v3, %v1464_v11  ;;  %vm3723_vm11 = vmmov %vm3722_vm10 }
 0x69b   :  { %v1506_v43 = vmul.f32 %v1459_v12, %v3312_v1  ;;  %v3718_v1 = vld [vmem:[#allocation7_spill] sm:$0xff] }
 0x69c   :  { %v1469_v26 = vsel %vm1468_vm13, %v2292_v3, %v1465_v17  ;;  %vm3725_vm13 = vmmov %vm3722_vm10 }
 0x69d   :  { %v1474_v23 = vsel %vm1471_vm14, %v1473_v59, %v1469_v26  ;;  %1562 = vmatpush.msra.mxu0 %v1506_v43  ;;  %vm3726_vm14 = vcmp.lt.s32.totalorder %v2650_v21, 15 }
 0x69e   :  { %v1507_v25 = vmul.f32 %v1474_v23, %v3314_v61  ;;  %2177 = vmatmul.msk.f32.vlgmr.msra.gmra.mxu0 %vm911_vm0, %v1510_v27  ;;  %2196 = vmatmul.msk.f32.gmra.mxu2 %vm911_vm0, %v1511_v18  ;;  %v1513_v61 = vld [vmem:[%s3648_s11 + $0x18] sm:$0xff] }
 0x69f   :  { %2205 = vmatmul.msk.f32.gmra.mxu3 %vm911_vm0, %v1511_v18  ;;  %2213 = vmatpush.msk.msrb.mxu0 %vm3717_vm15, %v3716_v56  ;;  %vm3727_vm15 = vmmov %vm3726_vm14 }
 0x6a0   :  { %1606 = vmatpush.msra.mxu1 %v1507_v25 }
 0x6a1   :  { %2186 = vmatmul.msk.f32.vlgmr.msra.gmra.mxu1 %vm911_vm0, %v1510_v27 }
 0x6a2   :  { %2215 = vmatpush.msk.msrb.mxu1 %vm3719_vm1, %v3718_v1 }
 0x6a6   :  { %2178 = vmatmul.msk.f32.gmra.mxu0 %vm911_vm0, %v1511_v18  ;;  %2197 = vmatmul.msk.f32.gmra.mxu2 %vm911_vm0, %v1512_v54 }
 0x6a7   :  { %2206 = vmatmul.msk.f32.gmra.mxu3 %vm911_vm0, %v1512_v54 }
 0x6a9   :  { %2187 = vmatmul.msk.f32.gmra.mxu1 %vm911_vm0, %v1511_v18 }
 0x6ae   :  { %2179 = vmatmul.msk.f32.gmra.mxu0 %vm911_vm0, %v1512_v54  ;;  %2198 = vmatmul.msk.f32.gmra.mxu2 %vm911_vm0, %v1513_v61 }
 0x6af   :  { %2207 = vmatmul.msk.f32.gmra.mxu3 %vm911_vm0, %v1513_v61 }
 0x6b1   :  { %2188 = vmatmul.msk.f32.gmra.mxu1 %vm911_vm0, %v1512_v54 }
 0x6b6   :  { %2180 = vmatmul.msk.f32.gmra.mxu0 %vm911_vm0, %v1513_v61  ;;  %2199 = vmatmul.msk.f32.gmra.mxu2 %vm911_vm0, %v1514_v44 }
 0x6b7   :  { %2208 = vmatmul.msk.f32.gmra.mxu3 %vm911_vm0, %v1514_v44 }
 0x6b9   :  { %2189 = vmatmul.msk.f32.gmra.mxu1 %vm911_vm0, %v1513_v61 }
 0x6be   :  { %2181 = vmatmul.msk.f32.gmra.mxu0 %vm911_vm0, %v1514_v44  ;;  %2200 = vmatmul.msk.f32.gmra.mxu2 %vm911_vm0, %v1515_v42 }
 0x6bf   :  { %2209 = vmatmul.msk.f32.gmra.mxu3 %vm911_vm0, %v1515_v42 }
 0x6c1   :  { %2190 = vmatmul.msk.f32.gmra.mxu1 %vm911_vm0, %v1514_v44 }
 0x6c6   :  { %2182 = vmatmul.msk.f32.gmra.mxu0 %vm911_vm0, %v1515_v42  ;;  %2201 = vmatmul.msk.f32.gmra.mxu2 %vm911_vm0, %v1516_v28 }
 0x6c7   :  { %2210 = vmatmul.msk.f32.gmra.mxu3 %vm911_vm0, %v1516_v28 }
 0x6c9   :  { %2191 = vmatmul.msk.f32.gmra.mxu1 %vm911_vm0, %v1515_v42 }
 0x6ce   :  { %2183 = vmatmul.msk.f32.gmra.mxu0 %vm911_vm0, %v1516_v28  ;;  %2202 = vmatmul.msk.f32.gmra.mxu2 %vm911_vm0, %v1517_v49 }
 0x6cf   :  { %2211 = vmatmul.msk.f32.gmra.mxu3 %vm911_vm0, %v1517_v49 }
 0x6d1   :  { %2192 = vmatmul.msk.f32.gmra.mxu1 %vm911_vm0, %v1516_v28 }
 0x6d6   :  { %2184 = vmatmul.msk.f32.gmra.mxu0 %vm911_vm0, %v1517_v49  ;;  %2203 = vmatmul.msk.f32.gmra.mxu2 %vm911_vm0, %v1518_v60 }
 0x6d7   :  { %2212 = vmatmul.msk.f32.gmra.mxu3 %vm911_vm0, %v1518_v60 }
 0x6d9   :  { %2193 = vmatmul.msk.f32.gmra.mxu1 %vm911_vm0, %v1517_v49 }
 0x6de   :  { %2185 = vmatmul.msk.f32.gmra.mxu0 %vm911_vm0, %v1518_v60 }
 0x6e1   :  { %2194 = vmatmul.msk.f32.gmra.mxu1 %vm911_vm0, %v1518_v60  ;;  %vm3720_vm0 = vmmov %vm3719_vm1  ;;  %vm3728_vm1 = vcmp.lt.s32.totalorder %v2650_v21, 31 }
 0x6e2   :  { %2217 = vmatpush.msk.msrb.mxu2 %vm3720_vm0, %v2020_v22  ;;  %vm3721_vm7 = vmmov %vm3720_vm0 }
 0x6e3   :  { %2219 = vmatpush.msk.msrb.mxu3 %vm3721_vm7, %v2021_v10  ;;  %2218 = vmatmul.msk.f32.vlgmr.msrb.gmra.mxu2 %vm3722_vm10, %v1956_v14  ;;  %vm3729_vm0 = vmmov %vm3728_vm1  ;;  %vm3730_vm7 = vcmp.lt.s32.totalorder %v2650_v21, 113 }
 0x6e4   :  { %2220 = vmatmul.msk.f32.vlgmr.msrb.gmra.mxu3 %vm3723_vm11, %v1956_v14  ;;  %vm3731_vm10 = vmmov %vm3730_vm7 }
 0x6e6   :  { %2214 = vmatmul.msk.f32.vlgmr.msrb.gmra.mxu0 %vm3724_vm12, %v1956_v14  ;;  %vm3734_vm12 = vmmov %vm3726_vm14 }
 0x6e9   :  { %2216 = vmatmul.msk.f32.vlgmr.msrb.gmra.mxu1 %vm3725_vm13, %v1956_v14 }
 0x719   :  { %v1771_v58 = vpop.f32.mrf.mxu2 }
 0x71a   :  { %v1815_v24 = vpop.f32.mrf.mxu3 }
 0x71b   :  { %v1564_v5 = vpop.f32.mrf.mxu0 }
 0x71c   :  { %1641 = vrot.lane.b32.xlu0 %v1564_v5, %s2322_s25  ;;  %1635 = vrot.lane.b32.xlu1 %v1564_v5, %s2323_s3 }
 0x71e   :  { %v1608_v63 = vpop.f32.mrf.mxu1 }
 0x71f   :  { %1637 = vrot.lane.b32.xlu2 %v1608_v63, %s2323_s3 }
 0x721   :  { %v1774_v30 = vpop.f32.mrf.mxu2 }
 0x722   :  { %v1818_v39 = vpop.f32.mrf.mxu3 }
 0x723   :  { %v1567_v9 = vpop.f32.mrf.mxu0 }
 0x724   :  { %1643 = vrot.lane.b32.xlu1 %v1608_v63, %s2322_s25 }
 0x726   :  { %v1611_v16 = vpop.f32.mrf.mxu1 }
 0x727   :  { %1651 = vrot.lane.b32.xlu0 %v1611_v16, %s2324_s2  ;;  %1649 = vrot.lane.b32.xlu2 %v1567_v9, %s2324_s2 }
 0x729   :  { %v1777_v33 = vpop.f32.mrf.mxu2 }
 0x72a   :  { %v1821_v37 = vpop.f32.mrf.mxu3 }
 0x72b   :  { %v1570_v41 = vpop.f32.mrf.mxu0 }
 0x72c   :  { %1657 = vrot.lane.b32.xlu1 %v1570_v41, %s2325_s4 }
 0x72e   :  { %v1614_v45 = vpop.f32.mrf.mxu1 }
 0x72f   :  { %1663 = vrot.lane.b32.xlu0 %v1570_v41, %s2326_s26  ;;  %1659 = vrot.lane.b32.xlu2 %v1614_v45, %s2325_s4 }
 0x731   :  { %v1780_v38 = vpop.f32.mrf.mxu2 }
 0x732   :  { %v1824_v47 = vpop.f32.mrf.mxu3 }
 0x733   :  { %v1573_v2 = vpop.f32.mrf.mxu0 }
 0x734   :  { %1665 = vrot.lane.b32.xlu1 %v1614_v45, %s2326_s26 }
 0x736   :  { %v1617_v62 = vpop.f32.mrf.mxu1 }
 0x737   :  { %1675 = vrot.lane.b32.xlu0 %v1617_v62, %s2322_s25  ;;  %1673 = vrot.lane.b32.xlu2 %v1573_v2, %s2322_s25 }
 0x739   :  { %v3429_v0 = vpop.f32.mrf.mxu2 }
 0x73a   :  { %v3434_v20 = vpop.f32.mrf.mxu3 }
 0x73b   :  { %v3402_v6 = vpop.f32.mrf.mxu0 }
 0x73c   :  { %1679 = vrot.lane.b32.xlu1 %v1573_v2, %s2327_s27 }
 0x73e   :  { %v3406_v15 = vpop.f32.mrf.mxu1 }
 0x73f   :  { %1842 = vrot.lane.b32.xlu0 %v1771_v58, %s2323_s3  ;;  %1681 = vrot.lane.b32.xlu2 %v1617_v62, %s2327_s27 }
 0x741   :  { %v1786_v27 = vpop.f32.mrf.mxu2 }
 0x742   :  { %v1830_v55 = vpop.f32.mrf.mxu3 }
 0x743   :  { %v1579_v34 = vpop.f32.mrf.mxu0 }
 0x744   :  { %1844 = vrot.lane.b32.xlu1 %v1815_v24, %s2323_s3 }
 0x746   :  { %v1623_v32 = vpop.f32.mrf.mxu1 }
 0x747   :  { %1850 = vrot.lane.b32.xlu0 %v1815_v24, %s2322_s25  ;;  %1848 = vrot.lane.b32.xlu2 %v1771_v58, %s2322_s25 }
 0x749   :  { %v1789_v52 = vpop.f32.mrf.mxu2 }
 0x74a   :  { %v1833_v12 = vpop.f32.mrf.mxu3 }
 0x74b   :  { %v1582_v53 = vpop.f32.mrf.mxu0 }
 0x74c   :  { %1856 = vrot.lane.b32.xlu1 %v1774_v30, %s2324_s2 }
 0x74e   :  { %v1626_v13 = vpop.f32.mrf.mxu1 }
 0x74f   :  { %1691 = vrot.lane.b32.xlu0 %v1579_v34, %s2328_s28  ;;  %1858 = vrot.lane.b32.xlu2 %v1818_v39, %s2324_s2 }
 0x751   :  { %v1792_v54 = vpop.f32.mrf.mxu2 }
 0x752   :  { %v1836_v42 = vpop.f32.mrf.mxu3 }
 0x753   :  { %v1585_v19 = vpop.f32.mrf.mxu0 }
 0x754   :  { %1693 = vrot.lane.b32.xlu1 %v1623_v32, %s2328_s28 }
 0x756   :  { %v1629_v48 = vpop.f32.mrf.mxu1 }
 0x757   :  { %1699 = vrot.lane.b32.xlu0 %v1623_v32, %s2325_s4  ;;  %1697 = vrot.lane.b32.xlu2 %v1579_v34, %s2325_s4 }
 0x759   :  { %v1795_v9 = vpop.f32.mrf.mxu2 }
 0x75a   :  { %v1839_v34 = vpop.f32.mrf.mxu3 }
 0x75b   :  { %v1588_v51 = vpop.f32.mrf.mxu0 }
 0x75c   :  { %1866 = vrot.lane.b32.xlu1 %v1821_v37, %s2325_s4 }
 0x75e   :  { %v1632_v8 = vpop.f32.mrf.mxu1 }
 0x75f   :  { %1864 = vrot.lane.b32.xlu0 %v1777_v33, %s2325_s4  ;;  %1870 = vrot.lane.b32.xlu2 %v1777_v33, %s2326_s26 }
 0x764   :  { %1707 = vrot.lane.b32.xlu1 %v1582_v53, %s2327_s27 }
 0x767   :  { %1872 = vrot.lane.b32.xlu0 %v1821_v37, %s2326_s26  ;;  %1709 = vrot.lane.b32.xlu2 %v1626_v13, %s2327_s27 }
 0x76c   :  { %1715 = vrot.lane.b32.xlu1 %v1626_v13, %s2329_s29 }
 0x76f   :  { %1713 = vrot.lane.b32.xlu0 %v1582_v53, %s2329_s29  ;;  %1882 = vrot.lane.b32.xlu2 %v1824_v47, %s2322_s25 }
 0x774   :  { %1880 = vrot.lane.b32.xlu1 %v1780_v38, %s2322_s25 }
 0x777   :  { %1886 = vrot.lane.b32.xlu0 %v1780_v38, %s2327_s27  ;;  %1723 = vrot.lane.b32.xlu2 %v1585_v19, %s2330_s30 }
 0x779   :  { %v1638_v3 = vpop.permute.xlu2 %1637 }
 0x77c   :  { %1888 = vrot.lane.b32.xlu1 %v1824_v47, %s2327_s27 }
 0x77f   :  { %1725 = vrot.lane.b32.xlu0 %v1629_v48, %s2330_s30  ;;  %1733 = vrot.lane.b32.xlu2 %v1632_v8, %s2331_s16 }
 0x781   :  { %v1650_v50 = vpop.permute.xlu2 %1649 }
 0x784   :  { %1731 = vrot.lane.b32.xlu1 %v1588_v51, %s2331_s16 }
 0x787   :  { %1737 = vrot.lane.b32.xlu0 %v1588_v51, %s2328_s28  ;;  %1898 = vrot.lane.b32.xlu2 %v1786_v27, %s2328_s28 }
 0x789   :  { %v1660_v57 = vpop.permute.xlu2 %1659 }
 0x78c   :  { %1739 = vrot.lane.b32.xlu1 %v1632_v8, %s2328_s28  ;;  %v1957_v8 = vld [vmem:[%s3651_s14] sm:$0xff]  ;;  %s2332_s14 = smov [#allocation2]  }
 0x78e   :  { %v1636_v4 = vpop.permute.xlu1 %1635  ;;  %v1642_v46 = vpop.permute.xlu0 %1641 }
 0x78f   :  { %1900 = vrot.lane.b32.xlu0 %v1830_v55, %s2328_s28  ;;  %v1639_v11 = vsel %vm396_vm3, %v1636_v4, %v1638_v3  ;;  %v1640_v7 = vsel %vm396_vm3, %v1638_v3, %v1636_v4  ;;  %1906 = vrot.lane.b32.xlu2 %v1830_v55, %s2325_s4 }
 0x791   :  { %v1674_v26 = vpop.permute.xlu2 %1673 }
 0x794   :  { %1904 = vrot.lane.b32.xlu1 %v1786_v27, %s2325_s4  ;;  %s2077_s4 = sshll.u32 %s2332_s14, 4  ;;  %s2078_s4 = int_to_ptr.vmem [resolvable:$true] %s2077_s4 }
 0x796   :  { %v1644_v17 = vpop.permute.xlu1 %1643 }
 0x797   :  { %1914 = vrot.lane.b32.xlu0 %v1789_v52, %s2327_s27  ;;  %v1645_v59 = vsel %vm403_vm2, %v1642_v46, %v1644_v17  ;;  %v1646_v43 = vsel %vm403_vm2, %v1644_v17, %v1642_v46  ;;  %1920 = vrot.lane.b32.xlu2 %v1789_v52, %s2329_s29 }
 0x798   :  { %v1647_v23 = vsel %vm2661_vm5, %v1646_v43, %v1640_v7  ;;  %v1648_v18 = vsel %vm2665_vm6, %v1645_v59, %v1639_v11 }
 0x799   :  { %v1652_v25 = vpop.permute.xlu0 %1651  ;;  %v1682_v63 = vpop.permute.xlu2 %1681 }
 0x79a   :  { %v1653_v56 = vsel %vm416_vm4, %v1650_v50, %v1652_v25  ;;  %v1654_v1 = vsel %vm416_vm4, %v1652_v25, %v1650_v50 }
 0x79b   :  { %v1655_v61 = vadd.f32 %v1654_v1, %v1647_v23  ;;  %v1656_v44 = vadd.f32 %v1653_v56, %v1648_v18 }
 0x79c   :  { %1916 = vrot.lane.b32.xlu1 %v1833_v12, %s2327_s27 }
 0x79e   :  { %v1658_v28 = vpop.permute.xlu1 %1657 }
 0x79f   :  { %1922 = vrot.lane.b32.xlu0 %v1833_v12, %s2329_s29  ;;  %v1661_v49 = vsel %vm3726_vm14, %v1658_v28, %v1660_v57  ;;  %v1662_v60 = vsel %vm3727_vm15, %v1660_v57, %v1658_v28  ;;  %1932 = vrot.lane.b32.xlu2 %v1836_v42, %s2330_s30  ;;  %vm3738_vm15 = vmmov %vm3729_vm0  ;;  %s2333_s29 = smov 256  }
 0x7a1   :  { %v1664_v5 = vpop.permute.xlu0 %1663  ;;  %v1849_v37 = vpop.permute.xlu2 %1848 }
 0x7a4   :  { %1930 = vrot.lane.b32.xlu1 %v1792_v54, %s2330_s30 }
 0x7a6   :  { %v1666_v16 = vpop.permute.xlu1 %1665 }
 0x7a7   :  { %1938 = vrot.lane.b32.xlu0 %v1795_v9, %s2331_s16  ;;  %v1667_v41 = vsel %vm3728_vm1, %v1664_v5, %v1666_v16  ;;  %v1668_v45 = vsel %vm3729_vm0, %v1666_v16, %v1664_v5  ;;  %1944 = vrot.lane.b32.xlu2 %v1795_v9, %s2328_s28  ;;  %vm3739_vm1 = vmmov %vm3729_vm0 }
 0x7a8   :  { %v1669_v2 = vsel %vm2670_vm8, %v1668_v45, %v1662_v60  ;;  %v1670_v62 = vsel %vm2674_vm9, %v1667_v41, %v1661_v49  ;;  %vm3740_vm0 = vmmov %vm3730_vm7 }
 0x7a9   :  { %v1676_v58 = vpop.permute.xlu0 %1675  ;;  %v1671_v24 = vadd.f32 %v1669_v2, %v1655_v61  ;;  %v1672_v30 = vadd.f32 %v1670_v62, %v1656_v44  ;;  %v1859_v51 = vpop.permute.xlu2 %1858 }
 0x7aa   :  { %v1677_v39 = vsel %vm403_vm2, %v1674_v26, %v1676_v58  ;;  %v1678_v32 = vsel %vm403_vm2, %v1676_v58, %v1674_v26 }
 0x7ac   :  { %1940 = vrot.lane.b32.xlu1 %v1839_v34, %s2331_s16 }
 0x7ae   :  { %v1680_v33 = vpop.permute.xlu1 %1679 }
 0x7af   :  { %1946 = vrot.lane.b32.xlu0 %v1839_v34, %s2328_s28  ;;  %v1683_v53 = vsel %vm3730_vm7, %v1680_v33, %v1682_v63  ;;  %v1684_v13 = vsel %vm3731_vm10, %v1682_v63, %v1680_v33  ;;  %vm3741_vm7 = vmmov %vm3740_vm0  ;;  %vm3742_vm10 = vcmp.lt.s32.totalorder %v2650_v21, 97  ;;  %s2079_s28 = sshll.u32 %s3652_s15, 4  ;;  %s2080_s28 = int_to_ptr.hbm [resolvable:$true] %s2079_s28 }
 0x7b0   :  { %v1685_v47 = vsel %vm2661_vm5, %v1683_v53, %v1678_v32  ;;  %v1686_v38 = vsel %vm2665_vm6, %v1684_v13, %v1677_v39 }
 0x7b1   :  { %v1843_v48 = vpop.permute.xlu0 %1842  ;;  %v1687_v19 = vadd.f32 %v1685_v47, %v1671_v24  ;;  %v1688_v3 = vadd.f32 %v1686_v38, %v1672_v30  ;;  %v1698_v52 = vpop.permute.xlu2 %1697 }
 0x7b3   :  { %v1689_v56 = vadd.f32 %v1687_v19, %v3402_v6  ;;  %v1690_v1 = vadd.f32 %v1688_v3, %v3406_v15 }
 0x7b4   :  { %1960 = vperm.xlu1 %2238, %v1957_v8  }
 0x7b6   :  { %v1845_v22 = vpop.permute.xlu1 %1844 }
 0x7b7   :  { %v1846_v10 = vsel %vm396_vm3, %v1843_v48, %v1845_v22  ;;  %v1847_v14 = vsel %vm396_vm3, %v1845_v22, %v1843_v48  ;;  %vm3732_vm3 = vcmp.lt.s32.totalorder %v2650_v21, 127 }
 0x7b8   :  { %vm3733_vm11 = vmmov %vm3732_vm3 }
 0x7b9   :  { %v1851_v50 = vpop.permute.xlu0 %1850  ;;  %v1871_v18 = vpop.permute.xlu2 %1870 }
 0x7ba   :  { %v1852_v27 = vsel %vm403_vm2, %v1849_v37, %v1851_v50  ;;  %v1853_v55 = vsel %vm403_vm2, %v1851_v50, %v1849_v37 }
 0x7bb   :  { %v1854_v57 = vsel %vm2661_vm5, %v1853_v55, %v1847_v14  ;;  %v1855_v4 = vsel %vm2665_vm6, %v1852_v27, %v1846_v10 }
 0x7be   :  { %v1857_v46 = vpop.permute.xlu1 %1856 }
 0x7bf   :  { %v1860_v11 = vsel %vm416_vm4, %v1857_v46, %v1859_v51  ;;  %v1861_v7 = vsel %vm416_vm4, %v1859_v51, %v1857_v46  ;;  %vm3735_vm4 = vmmov %vm3734_vm12 }
 0x7c0   :  { %v1862_v12 = vadd.f32 %v1861_v7, %v1854_v57  ;;  %v1863_v17 = vadd.f32 %v1860_v11, %v1855_v4  ;;  %vm3736_vm13 = vmmov %vm3735_vm4 }
 0x7c1   :  { %v1692_v59 = vpop.permute.xlu0 %1691  ;;  %v1710_v63 = vpop.permute.xlu2 %1709  ;;  %vm3737_vm14 = vmmov %vm3735_vm4 }
 0x7c6   :  { %v1694_v43 = vpop.permute.xlu1 %1693 }
 0x7c7   :  { %v1695_v26 = vsel %vm3732_vm3, %v1692_v59, %v1694_v43  ;;  %v1696_v23 = vsel %vm3733_vm11, %v1694_v43, %v1692_v59  ;;  %vm3743_vm3 = vmmov %vm3742_vm10 }
 0x7c8   :  { %vm3744_vm11 = vmmov %vm3740_vm0 }
 0x7c9   :  { %v1700_v25 = vpop.permute.xlu0 %1699  ;;  %v1883_v58 = vpop.permute.xlu2 %1882 }
 0x7ca   :  { %v1701_v54 = vsel %vm3734_vm12, %v1698_v52, %v1700_v25  ;;  %v1702_v61 = vsel %vm3735_vm4, %v1700_v25, %v1698_v52  ;;  %vm3745_vm12 = vmmov %vm3740_vm0 }
 0x7cb   :  { %v1703_v44 = vsel %vm2670_vm8, %v1702_v61, %v1695_v26  ;;  %v1704_v42 = vsel %vm2674_vm9, %v1701_v54, %v1696_v23 }
 0x7cc   :  { %v1705_v28 = vadd.f32 %v1703_v44, %v1689_v56  ;;  %v1706_v49 = vadd.f32 %v1704_v42, %v1690_v1 }
 0x7ce   :  { %v1867_v60 = vpop.permute.xlu1 %1866 }
 0x7d1   :  { %v1865_v5 = vpop.permute.xlu0 %1864  ;;  %v1724_v19 = vpop.permute.xlu2 %1723 }
 0x7d2   :  { %v1868_v6 = vsel %vm3736_vm13, %v1865_v5, %v1867_v60  ;;  %v1869_v15 = vsel %vm3737_vm14, %v1867_v60, %v1865_v5  ;;  %vm3746_vm13 = vmmov %vm3735_vm4  ;;  %vm3747_vm14 = vcmp.lt.s32.totalorder %v2650_v21, 127 }
 0x7d6   :  { %v1708_v9 = vpop.permute.xlu1 %1707 }
 0x7d7   :  { %v1711_v32 = vsel %vm3740_vm0, %v1708_v9, %v1710_v63  ;;  %v1712_v37 = vsel %vm3741_vm7, %v1710_v63, %v1708_v9  ;;  %vm3751_vm7 = vmmov %vm3740_vm0 }
 0x7d9   :  { %v1873_v16 = vpop.permute.xlu0 %1872  ;;  %v1734_v22 = vpop.permute.xlu2 %1733 }
 0x7da   :  { %v1874_v41 = vsel %vm3738_vm15, %v1871_v18, %v1873_v16  ;;  %v1875_v45 = vsel %vm3739_vm1, %v1873_v16, %v1871_v18  ;;  %vm3749_vm15 = vmmov %vm3743_vm3 }
 0x7db   :  { %v1876_v2 = vsel %vm2670_vm8, %v1875_v45, %v1869_v15  ;;  %v1877_v62 = vsel %vm2674_vm9, %v1874_v41, %v1868_v6  ;;  %vm3750_vm1 = vmmov %vm3743_vm3 }
 0x7dc   :  { %v1878_v24 = vadd.f32 %v1876_v2, %v1862_v12  ;;  %v1879_v30 = vadd.f32 %v1877_v62, %v1863_v17 }
 0x7de   :  { %v1716_v34 = vpop.permute.xlu1 %1715 }
 0x7e1   :  { %v1714_v39 = vpop.permute.xlu0 %1713  ;;  %v1899_v27 = vpop.permute.xlu2 %1898 }
 0x7e2   :  { %v1717_v33 = vsel %vm3742_vm10, %v1714_v39, %v1716_v34  ;;  %v1718_v53 = vsel %vm3743_vm3, %v1716_v34, %v1714_v39 }
 0x7e3   :  { %v1719_v13 = vsel %vm2661_vm5, %v1717_v33, %v1711_v32  ;;  %v1720_v47 = vsel %vm2665_vm6, %v1718_v53, %v1712_v37 }
 0x7e4   :  { %v1721_v38 = vadd.f32 %v1719_v13, %v1705_v28  ;;  %v1722_v48 = vadd.f32 %v1720_v47, %v1706_v49 }
 0x7e6   :  { %v1881_v3 = vpop.permute.xlu1 %1880 }
 0x7e7   :  { %v1884_v43 = vsel %vm403_vm2, %v1881_v3, %v1883_v58  ;;  %v1885_v26 = vsel %vm403_vm2, %v1883_v58, %v1881_v3  ;;  %vm3748_vm2 = vmmov %vm3747_vm14 }
 0x7e8   :  { %vm3752_vm10 = vmmov %vm3748_vm2 }
 0x7e9   :  { %v1887_v8 = vpop.permute.xlu0 %1886  ;;  %v1907_v4 = vpop.permute.xlu2 %1906  ;;  %vm3753_vm3 = vmmov %vm3748_vm2 }
 0x7ee   :  { %v1889_v51 = vpop.permute.xlu1 %1888 }
 0x7ef   :  { %v1890_v17 = vsel %vm3744_vm11, %v1887_v8, %v1889_v51  ;;  %v1891_v59 = vsel %vm3745_vm12, %v1889_v51, %v1887_v8  ;;  %vm3754_vm11 = vcmp.lt.s32.totalorder %v2650_v21, 112 }
 0x7f0   :  { %v1892_v23 = vsel %vm2661_vm5, %v1890_v17, %v1885_v26  ;;  %v1893_v18 = vsel %vm2665_vm6, %v1891_v59, %v1884_v43  ;;  %vm3755_vm12 = vmmov %vm3754_vm11 }
 0x7f1   :  { %v1726_v10 = vpop.permute.xlu0 %1725  ;;  %v1921_v7 = vpop.permute.xlu2 %1920  ;;  %v1894_v1 = vadd.f32 %v1892_v23, %v1878_v24  ;;  %v1895_v54 = vadd.f32 %v1893_v18, %v1879_v30 }
 0x7f2   :  { %v1727_v45 = vsel %vm3754_vm11, %v1724_v19, %v1726_v10  ;;  %v1728_v2 = vsel %vm3755_vm12, %v1726_v10, %v1724_v19 }
 0x7f3   :  { %v1896_v62 = vadd.f32 %v1894_v1, %v3429_v0  ;;  %v1897_v58 = vadd.f32 %v1895_v54, %v3434_v20  ;;  %v1729_v53 = vadd.f32 %v1727_v45, %v1721_v38  ;;  %v1730_v13 = vadd.f32 %v1728_v2, %v1722_v48 }
 0x7f6   :  { %v1732_v14 = vpop.permute.xlu1 %1731 }
 0x7f9   :  { %v1738_v50 = vpop.permute.xlu0 %1737  ;;  %v1933_v56 = vpop.permute.xlu2 %1932 }
 0x7fe   :  { %v1740_v55 = vpop.permute.xlu1 %1739 }
 0x7ff   :  { %v1741_v15 = vsel %vm3752_vm10, %v1738_v50, %v1740_v55  ;;  %v1742_v9 = vsel %vm3753_vm3, %v1740_v55, %v1738_v50 }
 0x801   :  { %v1901_v57 = vpop.permute.xlu0 %1900  ;;  %v1945_v10 = vpop.permute.xlu2 %1944 }
 0x802   :  { %v1902_v42 = vsel %vm3747_vm14, %v1899_v27, %v1901_v57  ;;  %v1903_v28 = vsel %vm3748_vm2, %v1901_v57, %v1899_v27  ;;  %vm3758_vm14 = vmmov %vm3754_vm11 }
 0x803   :  { %vm3759_vm2 = vmmov %vm3754_vm11 }
 0x806   :  { %v1905_v46 = vpop.permute.xlu1 %1904 }
 0x807   :  { %v1908_v61 = vsel %vm3735_vm4, %v1905_v46, %v1907_v4  ;;  %v1909_v44 = vsel %vm3746_vm13, %v1907_v4, %v1905_v46  ;;  %vm3756_vm4 = vcmp.lt.s32.totalorder %v2650_v21, 111  ;;  %v2010_v4 = vpop.f32.mrf.mxu1  ;;  %v2043_v46 = vpop.f32.mrf.mxu2 }
 0x808   :  { %v1910_v16 = vsel %vm2670_vm8, %v1909_v44, %v1902_v42  ;;  %v1911_v41 = vsel %vm2674_vm9, %v1908_v61, %v1903_v28  ;;  %v1735_v24 = vsel %vm3756_vm4, %v1732_v14, %v1734_v22  ;;  %vm3757_vm13 = vmmov %vm3756_vm4 }
 0x809   :  { %v1915_v11 = vpop.permute.xlu0 %1914  ;;  %v1736_v30 = vsel %vm3757_vm13, %v1734_v22, %v1732_v14  ;;  %v1743_v32 = vsel %vm2670_vm8, %v1741_v15, %v1735_v24  ;;  %v1912_v37 = vadd.f32 %v1910_v16, %v1896_v62  ;;  %v1913_v20 = vadd.f32 %v1911_v41, %v1897_v58 }
 0x80a   :  { %v1744_v0 = vsel %vm2674_vm9, %v1742_v9, %v1736_v30  ;;  %v1745_v51 = vadd.f32 %v1743_v32, %v1729_v53 }
 0x80b   :  { %v1746_v22 = vadd.f32 %v1744_v0, %v1730_v13 }
 0x80c   :  { %v1752_v26 = vadd.f32 %v3424_v29, %v1745_v51 }
 0x80d   :  { %v1753_v17 = vadd.f32 %v3424_v29, %v1746_v22 }
 0x80e   :  { %v1917_v52 = vpop.permute.xlu1 %1916 }
 0x80f   :  { %v1918_v63 = vsel %vm3740_vm0, %v1915_v11, %v1917_v52  ;;  %v1919_v6 = vsel %vm3751_vm7, %v1917_v52, %v1915_v11  ;;  %v2063_v52 = vpop.f32.mrf.mxu3 }
 0x811   :  { %v1923_v12 = vpop.permute.xlu0 %1922 }
 0x812   :  { %v1924_v60 = vsel %vm3749_vm15, %v1921_v7, %v1923_v12  ;;  %v1925_v5 = vsel %vm3750_vm1, %v1923_v12, %v1921_v7  ;;  %vm3762_vm15 = vmmov %vm3753_vm3  ;;  %v1990_v12 = vpop.f32.mrf.mxu0 }
 0x813   :  { %v1926_v34 = vsel %vm2661_vm5, %v1924_v60, %v1918_v63  ;;  %v1927_v39 = vsel %vm2665_vm6, %v1925_v5, %v1919_v6  ;;  %vm3760_vm5 = vmmov %vm3756_vm4 }
 0x814   :  { %v1928_v19 = vadd.f32 %v1926_v34, %v1912_v37  ;;  %v1929_v35 = vadd.f32 %v1927_v39, %v1913_v20  ;;  %vm3761_vm6 = vmmov %vm3756_vm4 }
 0x815   :  { %vm3763_vm1 = vmmov %vm3753_vm3 }
 0x816   :  { %v1931_v25 = vpop.permute.xlu1 %1930 }
 0x817   :  { %v1934_v47 = vsel %vm3758_vm14, %v1931_v25, %v1933_v56  ;;  %v1935_v31 = vsel %vm3759_vm2, %v1933_v56, %v1931_v25 }
 0x818   :  { %v1936_v38 = vadd.f32 %v1934_v47, %v1928_v19  ;;  %v1937_v48 = vadd.f32 %v1935_v31, %v1929_v35 }
 0x819   :  { %v1939_v49 = vpop.permute.xlu0 %1938 }
 0x81e   :  { %v1941_v33 = vpop.permute.xlu1 %1940 }
 0x81f   :  { %v1942_v3 = vsel %vm3760_vm5, %v1939_v49, %v1941_v33  ;;  %v1943_v8 = vsel %vm3761_vm6, %v1941_v33, %v1939_v49 }
 0x821   :  { %v1947_v14 = vpop.permute.xlu0 %1946 }
 0x822   :  { %v1948_v50 = vsel %vm3762_vm15, %v1945_v10, %v1947_v14  ;;  %v1949_v27 = vsel %vm3763_vm1, %v1947_v14, %v1945_v10 }
 0x823   :  { %v1950_v55 = vsel %vm2670_vm8, %v1948_v50, %v1942_v3  ;;  %v1951_v57 = vsel %vm2674_vm9, %v1949_v27, %v1943_v8 }
 0x824   :  { %v1952_v11 = vadd.f32 %v1950_v55, %v1936_v38  ;;  %v1953_v7 = vadd.f32 %v1951_v57, %v1937_v48 }
 0x826   :  { %v1954_v59 = vadd.f32 %v1952_v11, %v3424_v29  ;;  %v1955_v43 = vadd.f32 %v1953_v7, %v3424_v29  ;;  %v1961_v21 = vpop.permute.xlu1 %1960 }
 0x827   :  { %v2011_v36 = vadd.f32 %v2010_v4, %v1961_v21  ;;  %v2044_v23 = vadd.f32 %v2043_v46, %v1961_v21  ;;  %v2064_v18 = vadd.f32 %v2063_v52, %v1961_v21  ;;  %v1991_v40 = vadd.f32 %v1990_v12, %v1961_v21 }
 0x829   :  { %v2014_v25 = vadd.f32 %v2011_v36, %v1753_v17  ;;  %v2066_v56 = vadd.f32 %v2044_v23, %v1954_v59  ;;  %v2067_v1 = vadd.f32 %v2064_v18, %v1955_v43  ;;  %v2013_v54 = vadd.f32 %v1991_v40, %v1752_v26 }
 0x82b   :  { %v2016_v61 = vmul.f32 0.70710677, %v2014_v25  ;;  %v2068_v44 = vmul.f32 0.70710677, %v2066_v56  ;;  %v2069_v42 = vmul.f32 0.70710677, %v2067_v1 }
 0x82c   :  { %v2015_v28 = vmul.f32 0.70710677, %v2013_v54 }
 0x82d   :  { %2018 = vst [vmem:[#allocation2 + $0x8] sm:$0xff] %v2016_v61 }
 0x82e   :  { %2071 = vst [vmem:[#allocation2 + $0x10] sm:$0xff] %v2068_v44 }
 0x82f   :  { %2072 = vst [vmem:[#allocation2 + $0x18] sm:$0xff] %v2069_v42 }
 0x830   :  { %2017 = vst [vmem:[#allocation2] sm:$0xff] %v2015_v28 }
 0x831   :  { %2085 = dma.vmem_to_hbm [thread:$0]  %s2078_s4, 512, %s2080_s28, [#allocation3], %s2333_s29, %s2333_s29, %s2324_s2  }
 0x832   :  { %2317 = dma.done.wait [#allocation3], 512  }
 0x833   :  { %2318 = vsyncadd [#allocation3], 4294966784 }
 0x834   :  { %2090 = vsyncpa [#allocation3], 1 }

</bundles_post_ra>
